<compile_context>
chip_gen: v7x
topology: tpu7x:2x2x1
jax: 0.10.0
libtpu: 0.0.40
codegen_flags: <defaults>
</compile_context>

<pallas_src>
import functools
import math

import jax
import jax.numpy as jnp
from jax.experimental import pallas as pl
from jax.experimental.pallas import tpu as pltpu

_VMEM_LIMIT = 32 * 1024 * 1024  # safe on v5e/v6e (128 MiB phys) and v7x (64 MiB)


# ---------------------------------------------------------------------------
# Fused IDCNN forward kernel (one grid step == one batch element)
# ---------------------------------------------------------------------------
def _fused_idcnn_kernel(emb_ref, wlin_ref, blin_ref, cw_ref, cb_ref,
                        ln1g_ref, ln1b_ref, ln2g_ref, ln2b_ref,
                        out_ref, xpad_ref, xstk_ref,
                        *, seq, filters, ksize, dilations, pads, pad_max,
                        num_block, eps):
    S, C, K = seq, filters, ksize

    # Zero the padded activation scratch once per grid step; only the centre
    # rows [pad_max : pad_max+S) are ever rewritten afterwards, so the border
    # rows stay zero and implement the conv zero-padding.
    xpad_ref[...] = jnp.zeros_like(xpad_ref)

    # ---- input projection (nn.Linear): (S, In) @ (In, C) + b --------------
    emb = emb_ref[0].astype(jnp.float32)                       # (S, In)
    h = jnp.dot(emb, wlin_ref[...].astype(jnp.float32),
                preferred_element_type=jnp.float32)
    h = h + blin_ref[...].astype(jnp.float32)                  # (S, C)

    def set_act(v):
        xpad_ref[pl.ds(pad_max, S), :] = v

    def conv(v, idx, relu):
        # Stack the K dilation taps along the contraction dim and do ONE MXU
        # matmul: (S, K*C) @ (K*C, C).
        d, p = dilations[idx], pads[idx]
        set_act(v)
        for k in range(K):                                     # static unroll
            off = pad_max - p + k * d                          # static offset
            xstk_ref[:, k * C:(k + 1) * C] = xpad_ref[pl.ds(off, S), :]
        w = cw_ref[idx].astype(jnp.float32)                    # (K*C, C)
        b = cb_ref[idx].astype(jnp.float32)                    # (1, C)
        y = jnp.dot(xstk_ref[...], w,
                    preferred_element_type=jnp.float32) + b    # (S, C)
        return jnp.maximum(y, 0.0) if relu else y

    def layer_norm(v, g_ref, b_ref):
        # Module LayerNorm: mean/std over seq (our sublane axis), unbiased std
        # (ddof=1), eps added to std, exact reciprocal (one value per channel).
        g = g_ref[...].astype(jnp.float32)                     # (S, 1)
        b = b_ref[...].astype(jnp.float32)                     # (S, 1)
        mean = jnp.mean(v, axis=0, keepdims=True)              # (1, C)
        cen = v - mean
        if S == 1:
            denom = v + eps                  # x.size(2) == 1 branch, verbatim
        else:
            var = jnp.sum(cen * cen, axis=0, keepdims=True) * (1.0 / (S - 1))
            denom = jnp.sqrt(var) + eps                        # (1, C)
        inv = 1.0 / denom                                      # exact
        return g * (cen * inv) + b

    def net(v):
        # shared `net`: conv(d=1)+ReLU -> LayerNorm -> conv(d=1) -> conv(d=2)
        v = conv(v, 0, relu=True)
        v = layer_norm(v, ln1g_ref, ln1b_ref)                  # norms_1[2]
        v = conv(v, 1, relu=False)
        v = conv(v, 2, relu=False)
        return v

    # idcnn = block0(net) -> ReLU -> LayerNorm(norms_2[3]) -> block1..3(net)
    h = net(h)
    h = layer_norm(jnp.maximum(h, 0.0), ln2g_ref, ln2b_ref)
    for _ in range(num_block - 1):                             # shared weights
        h = net(h)

    out_ref[0] = h.astype(out_ref.dtype)                       # single HBM store


@functools.lru_cache(maxsize=None)
def _build_fused_call(batch, seq, d_in, filters, ksize, dilations, pads,
                      pad_max, num_block, eps, dtype_str):
    dtype = jnp.dtype(dtype_str)
    n_conv = len(dilations)
    t_pad = seq + 2 * pad_max
    kernel = functools.partial(
        _fused_idcnn_kernel, seq=seq, filters=filters, ksize=ksize,
        dilations=dilations, pads=pads, pad_max=pad_max,
        num_block=num_block, eps=eps)

    call = pl.pallas_call(
        kernel,
        out_shape=jax.ShapeDtypeStruct((batch, seq, filters), dtype),
        grid_spec=pltpu.PrefetchScalarGridSpec(
            num_scalar_prefetch=0,
            grid=(batch,),
            in_specs=[
                pl.BlockSpec((1, seq, d_in), lambda b: (b, 0, 0)),        # emb
                pl.BlockSpec((d_in, filters), lambda b: (0, 0)),          # W_lin.T
                pl.BlockSpec((1, filters), lambda b: (0, 0)),             # b_lin
                pl.BlockSpec((n_conv, ksize * filters, filters),
                             lambda b: (0, 0, 0)),                        # conv W (stacked taps)
                pl.BlockSpec((n_conv, 1, filters), lambda b: (0, 0, 0)),  # conv b
                pl.BlockSpec((seq, 1), lambda b: (0, 0)),                 # ln1 gamma
                pl.BlockSpec((seq, 1), lambda b: (0, 0)),                 # ln1 beta
                pl.BlockSpec((seq, 1), lambda b: (0, 0)),                 # ln2 gamma
                pl.BlockSpec((seq, 1), lambda b: (0, 0)),                 # ln2 beta
            ],
            out_specs=pl.BlockSpec((1, seq, filters), lambda b: (b, 0, 0)),
            scratch_shapes=[
                pltpu.VMEM((t_pad, filters), jnp.float32),          # padded act
                pltpu.VMEM((seq, ksize * filters), jnp.float32),    # stacked taps
            ],
        ),
        compiler_params=pltpu.CompilerParams(
            dimension_semantics=("parallel",),   # >=2 parallel steps feeds both v7x TCs
            vmem_limit_bytes=_VMEM_LIMIT,
        ),
    )
    return jax.jit(call)


def idcnn_forward(embeddings, params, *, dilations=(1, 1, 2), num_block=4,
                  eps=1e-6):
    """embeddings: (B, S, input_size) with S == LayerNorm features (50)."""
    batch, seq, d_in = embeddings.shape
    filters = params["w_lin"].shape[0]
    ksize = params["conv_w"][0].shape[-1]
    dtype = embeddings.dtype
    dilations = tuple(int(d) for d in dilations)

    pads = tuple(ksize // 2 + d - 1 for d in dilations)
    for d, p in zip(dilations, pads):
        # Shape-preserving convs (holds for kernel_size=3 as in the module).
        assert seq + 2 * p - d * (ksize - 1) == seq, \
            "fused kernel assumes shape-preserving convs (kernel_size=3)"
    pad_max = max(pads)

    # Weight pre-packing (tiny, weight-only; activations never leave VMEM).
    wlin_t = jnp.transpose(params["w_lin"], (1, 0)).astype(dtype)   # (In, C)
    blin = params["b_lin"].reshape(1, filters).astype(dtype)
    # stacked-tap conv weight: w2[k*C + c, o] = w[o, c, k]
    cw = jnp.stack([jnp.transpose(w, (2, 1, 0)).reshape(ksize * filters, filters)
                    for w in params["conv_w"]]).astype(dtype)       # (3, K*C, C)
    cb = jnp.stack([b.reshape(1, filters)
                    for b in params["conv_b"]]).astype(dtype)       # (3, 1, C)
    ln1g = params["ln1_gamma"].reshape(seq, 1).astype(dtype)
    ln1b = params["ln1_beta"].reshape(seq, 1).astype(dtype)
    ln2g = params["ln2_gamma"].reshape(seq, 1).astype(dtype)
    ln2b = params["ln2_beta"].reshape(seq, 1).astype(dtype)

    call = _build_fused_call(batch, seq, d_in, filters, ksize, dilations, pads,
                             pad_max, int(num_block), float(eps),
                             str(jnp.dtype(dtype)))
    return call(embeddings, wlin_t, blin, cw, cb, ln1g, ln1b, ln2g, ln2b)


# ---------------------------------------------------------------------------
# Pure-JAX reference (mirrors the PyTorch forward exactly)
# ---------------------------------------------------------------------------
def _layer_norm_ref(x, g, b, eps):
    mean = x.mean(-1, keepdims=True)
    if x.shape[2] == 1:
        std = x
    else:
        std = jnp.sqrt(((x - mean) ** 2).sum(-1, keepdims=True) / (x.shape[-1] - 1))
    return g * (x - mean) / (std + eps) + b


def _conv1d_ref(x, w, b, dilation):
    ksize = w.shape[-1]
    pad = ksize // 2 + dilation - 1
    t_in = x.shape[-1]
    t_out = t_in + 2 * pad - dilation * (ksize - 1)
    xp = jnp.pad(x, ((0, 0), (0, 0), (pad, pad)))
    out = sum(jnp.einsum("oc,bct->bot", w[:, :, k],
                         xp[:, :, k * dilation:k * dilation + t_out])
              for k in range(ksize))
    return out + b[None, :, None]


def idcnn_reference(embeddings, params, *, dilations=(1, 1, 2), num_block=4,
                    eps=1e-6):
    x = embeddings @ params["w_lin"].T + params["b_lin"]
    x = jnp.transpose(x, (0, 2, 1))
    g1, b1 = params["ln1_gamma"], params["ln1_beta"]
    g2, b2 = params["ln2_gamma"], params["ln2_beta"]

    def net(x):
        x = jnp.maximum(
            _conv1d_ref(x, params["conv_w"][0], params["conv_b"][0], dilations[0]), 0.0)
        x = _layer_norm_ref(x, g1, b1, eps)
        x = _conv1d_ref(x, params["conv_w"][1], params["conv_b"][1], dilations[1])
        x = _conv1d_ref(x, params["conv_w"][2], params["conv_b"][2], dilations[2])
        return x

    x = net(x)
    x = _layer_norm_ref(jnp.maximum(x, 0.0), g2, b2, eps)
    for _ in range(num_block - 1):
        x = net(x)
    return jnp.transpose(x, (0, 2, 1))


if __name__ == "__main__":
    B = 2
    seq = 50            # LayerNorm(50) in the module fixes the sequence length
    input_size = 32
    filters = 16
    ksize = 3
    num_block = 4
    dilations = (1, 1, 2)

    key = jax.random.PRNGKey(0)
    k_emb, k_wl, k_bl, *k_conv = jax.random.split(key, 3 + 2 * len(dilations))

    embeddings = jax.random.normal(k_emb, (B, seq, input_size), dtype=jnp.float32)

    fan_lin = 1.0 / math.sqrt(input_size)
    fan_conv = 1.0 / math.sqrt(filters * ksize)
    params = {
        "w_lin": jax.random.normal(k_wl, (filters, input_size), jnp.float32) * fan_lin,
        "b_lin": jax.random.normal(k_bl, (filters,), jnp.float32) * fan_lin,
        "conv_w": [jax.random.normal(k_conv[2 * i], (filters, filters, ksize),
                                     jnp.float32) * fan_conv
                   for i in range(len(dilations))],
        "conv_b": [jax.random.normal(k_conv[2 * i + 1], (filters,),
                                     jnp.float32) * fan_conv
                   for i in range(len(dilations))],
        # Only norms_1[2] and norms_2[3] are used by the forward; both are
        # default-init (ones / zeros) LayerNorm(50) instances.
        "ln1_gamma": jnp.ones((seq,), jnp.float32),
        "ln1_beta": jnp.zeros((seq,), jnp.float32),
        "ln2_gamma": jnp.ones((seq,), jnp.float32),
        "ln2_beta": jnp.zeros((seq,), jnp.float32),
    }

    out = idcnn_forward(embeddings, params, dilations=dilations,
                        num_block=num_block)
    out = jax.block_until_ready(out)

    ref = idcnn_reference(embeddings, params, dilations=dilations,
                          num_block=num_block)
    assert out.shape == (B, seq, filters), out.shape
    # Exact LayerNorm reciprocal now -> tight tolerance.
    assert jnp.allclose(out, ref, atol=1e-3, rtol=1e-3), \
        float(jnp.max(jnp.abs(out - ref)))

    print("KERNEL_OK")
</pallas_src>

<mosaic_0001>
module attributes {stable_mosaic.version = 11 : i64} {
  func.func @_fused_idcnn_kernel(%arg0: i32, %arg1: memref<1x50x32xf32, #tpu.memory_space<vmem>>, %arg2: memref<32x16xf32, #tpu.memory_space<vmem>>, %arg3: memref<1x16xf32, #tpu.memory_space<vmem>>, %arg4: memref<3x48x16xf32, #tpu.memory_space<vmem>>, %arg5: memref<3x1x16xf32, #tpu.memory_space<vmem>>, %arg6: memref<50x1xf32, #tpu.memory_space<vmem>>, %arg7: memref<50x1xf32, #tpu.memory_space<vmem>>, %arg8: memref<50x1xf32, #tpu.memory_space<vmem>>, %arg9: memref<50x1xf32, #tpu.memory_space<vmem>>, %arg10: memref<1x50x16xf32, #tpu.memory_space<vmem>>, %arg11: memref<54x16xf32, #tpu.memory_space<vmem>>, %arg12: memref<50x48xf32, #tpu.memory_space<vmem>>) attributes {dimension_semantics = [#tpu.dimension_semantics<parallel>], iteration_bounds = array<i64: 2>, scalar_prefetch = 0 : i64, scratch_operands = 2 : i64, tpu.core_type = #tpu.core_type<tc>, window_params = [{transform_indices = @transform_0, window_bounds = array<i64: 1, 50, 32>}, {pipeline_mode = #tpu.pipeline_mode<synchronous>, transform_indices = @transform_1, window_bounds = array<i64: 32, 16>}, {pipeline_mode = #tpu.pipeline_mode<synchronous>, transform_indices = @transform_2, window_bounds = array<i64: 1, 16>}, {pipeline_mode = #tpu.pipeline_mode<synchronous>, transform_indices = @transform_3, window_bounds = array<i64: 3, 48, 16>}, {pipeline_mode = #tpu.pipeline_mode<synchronous>, transform_indices = @transform_4, window_bounds = array<i64: 3, 1, 16>}, {pipeline_mode = #tpu.pipeline_mode<synchronous>, transform_indices = @transform_5, window_bounds = array<i64: 50, 1>}, {pipeline_mode = #tpu.pipeline_mode<synchronous>, transform_indices = @transform_6, window_bounds = array<i64: 50, 1>}, {pipeline_mode = #tpu.pipeline_mode<synchronous>, transform_indices = @transform_7, window_bounds = array<i64: 50, 1>}, {pipeline_mode = #tpu.pipeline_mode<synchronous>, transform_indices = @transform_8, window_bounds = array<i64: 50, 1>}, {transform_indices = @transform_9, window_bounds = array<i64: 1, 50, 16>}]} {
    %cst = arith.constant 0.000000e+00 : f32
    %0 = vector.broadcast %cst : f32 to vector<54x16xf32>
    %c0 = arith.constant 0 : index
    %c0_0 = arith.constant 0 : index
    %1 = vector.load %arg11[%c0, %c0_0] : memref<54x16xf32, #tpu.memory_space<vmem>>, vector<54x16xf32>
    tpu.vector_store %arg11[%c0, %c0_0], %0 {strides = array<i32>} : memref<54x16xf32, #tpu.memory_space<vmem>>, vector<54x16xf32>,
    %c0_1 = arith.constant 0 : index
    %c0_2 = arith.constant 0 : index
    %c0_3 = arith.constant 0 : index
    %2 = vector.load %arg1[%c0_1, %c0_2, %c0_3] : memref<1x50x32xf32, #tpu.memory_space<vmem>>, vector<1x50x32xf32>
    %3 = vector.shape_cast %2 : vector<1x50x32xf32> to vector<50x32xf32>
    %c0_4 = arith.constant 0 : index
    %c0_5 = arith.constant 0 : index
    %4 = vector.load %arg2[%c0_4, %c0_5] : memref<32x16xf32, #tpu.memory_space<vmem>>, vector<32x16xf32>
    %cst_6 = arith.constant dense<0.000000e+00> : vector<50x16xf32>
    %5 = tpu.matmul %3, %4, %cst_6 {dimension_numbers = #tpu.dot_dimension_numbers<[1], [0], [0], [1], [0, 0, 1, 1], [], []>} : vector<50x32xf32>, vector<32x16xf32>, vector<50x16xf32> -> vector<50x16xf32>
    %c0_7 = arith.constant 0 : index
    %c0_8 = arith.constant 0 : index
    %6 = vector.load %arg3[%c0_7, %c0_8] : memref<1x16xf32, #tpu.memory_space<vmem>>, vector<1x16xf32>
    %7 = vector.broadcast %6 : vector<1x16xf32> to vector<50x16xf32>
    %8 = arith.addf %5, %7 : vector<50x16xf32>
    %c2 = arith.constant 2 : index
    %c0_9 = arith.constant 0 : index
    %9 = vector.load %arg11[%c2, %c0_9] : memref<54x16xf32, #tpu.memory_space<vmem>>, vector<50x16xf32>
    tpu.vector_store %arg11[%c2, %c0_9], %8 {strides = array<i32>} : memref<54x16xf32, #tpu.memory_space<vmem>>, vector<50x16xf32>,
    %c1 = arith.constant 1 : index
    %c0_10 = arith.constant 0 : index
    %10 = vector.load %arg11[%c1, %c0_10] : memref<54x16xf32, #tpu.memory_space<vmem>>, vector<50x16xf32>
    %c0_11 = arith.constant 0 : index
    %c0_12 = arith.constant 0 : index
    %11 = vector.load %arg12[%c0_11, %c0_12] : memref<50x48xf32, #tpu.memory_space<vmem>>, vector<50x16xf32>
    tpu.vector_store %arg12[%c0_11, %c0_12], %10 {strides = array<i32>} : memref<50x48xf32, #tpu.memory_space<vmem>>, vector<50x16xf32>,
    %c2_13 = arith.constant 2 : index
    %c0_14 = arith.constant 0 : index
    %12 = vector.load %arg11[%c2_13, %c0_14] : memref<54x16xf32, #tpu.memory_space<vmem>>, vector<50x16xf32>
    %c0_15 = arith.constant 0 : index
    %c16 = arith.constant 16 : index
    %13 = vector.load %arg12[%c0_15, %c16] : memref<50x48xf32, #tpu.memory_space<vmem>>, vector<50x16xf32>
    tpu.vector_store %arg12[%c0_15, %c16], %12 {strides = array<i32>} : memref<50x48xf32, #tpu.memory_space<vmem>>, vector<50x16xf32>,
    %c3 = arith.constant 3 : index
    %c0_16 = arith.constant 0 : index
    %14 = vector.load %arg11[%c3, %c0_16] : memref<54x16xf32, #tpu.memory_space<vmem>>, vector<50x16xf32>
    %c0_17 = arith.constant 0 : index
    %c32 = arith.constant 32 : index
    %15 = vector.load %arg12[%c0_17, %c32] : memref<50x48xf32, #tpu.memory_space<vmem>>, vector<50x16xf32>
    tpu.vector_store %arg12[%c0_17, %c32], %14 {strides = array<i32>} : memref<50x48xf32, #tpu.memory_space<vmem>>, vector<50x16xf32>,
    %c0_18 = arith.constant 0 : index
    %c0_19 = arith.constant 0 : index
    %c0_20 = arith.constant 0 : index
    %16 = vector.load %arg4[%c0_18, %c0_19, %c0_20] : memref<3x48x16xf32, #tpu.memory_space<vmem>>, vector<1x48x16xf32>
    %17 = vector.shape_cast %16 : vector<1x48x16xf32> to vector<48x16xf32>
    %c0_21 = arith.constant 0 : index
    %c0_22 = arith.constant 0 : index
    %c0_23 = arith.constant 0 : index
    %18 = vector.load %arg5[%c0_21, %c0_22, %c0_23] : memref<3x1x16xf32, #tpu.memory_space<vmem>>, vector<1x1x16xf32>
    %19 = vector.shape_cast %18 : vector<1x1x16xf32> to vector<1x16xf32>
    %c0_24 = arith.constant 0 : index
    %c0_25 = arith.constant 0 : index
    %20 = vector.load %arg12[%c0_24, %c0_25] : memref<50x48xf32, #tpu.memory_space<vmem>>, vector<50x48xf32>
    %cst_26 = arith.constant dense<0.000000e+00> : vector<50x16xf32>
    %21 = tpu.matmul %20, %17, %cst_26 {dimension_numbers = #tpu.dot_dimension_numbers<[1], [0], [0], [1], [0, 0, 1, 1], [], []>} : vector<50x48xf32>, vector<48x16xf32>, vector<50x16xf32> -> vector<50x16xf32>
    %22 = vector.broadcast %19 : vector<1x16xf32> to vector<50x16xf32>
    %23 = arith.addf %21, %22 : vector<50x16xf32>
    %cst_27 = arith.constant 0.000000e+00 : f32
    %24 = vector.broadcast %cst_27 : f32 to vector<50x16xf32>
    %25 = arith.maximumf %23, %24 : vector<50x16xf32>
    %c0_28 = arith.constant 0 : index
    %c0_29 = arith.constant 0 : index
    %26 = vector.load %arg6[%c0_28, %c0_29] : memref<50x1xf32, #tpu.memory_space<vmem>>, vector<50x1xf32>
    %c0_30 = arith.constant 0 : index
    %c0_31 = arith.constant 0 : index
    %27 = vector.load %arg7[%c0_30, %c0_31] : memref<50x1xf32, #tpu.memory_space<vmem>>, vector<50x1xf32>
    %cst_32 = arith.constant dense<0.000000e+00> : vector<16xf32>
    %28 = vector.multi_reduction <add>, %25, %cst_32 [0] : vector<50x16xf32> to vector<16xf32>
    %29 = vector.shape_cast %28 : vector<16xf32> to vector<1x16xf32>
    %cst_33 = arith.constant 5.000000e+01 : f32
    %30 = vector.broadcast %cst_33 : f32 to vector<1x16xf32>
    %31 = arith.divf %29, %30 : vector<1x16xf32>
    %32 = vector.broadcast %31 : vector<1x16xf32> to vector<50x16xf32>
    %33 = arith.subf %25, %32 : vector<50x16xf32>
    %34 = arith.mulf %33, %33 : vector<50x16xf32>
    %cst_34 = arith.constant dense<0.000000e+00> : vector<16xf32>
    %35 = vector.multi_reduction <add>, %34, %cst_34 [0] : vector<50x16xf32> to vector<16xf32>
    %36 = vector.shape_cast %35 : vector<16xf32> to vector<1x16xf32>
    %cst_35 = arith.constant 0.0204081628 : f32
    %37 = vector.broadcast %cst_35 : f32 to vector<1x16xf32>
    %38 = arith.mulf %36, %37 : vector<1x16xf32>
    %39 = math.sqrt %38 : vector<1x16xf32>
    %cst_36 = arith.constant 9.99999997E-7 : f32
    %40 = vector.broadcast %cst_36 : f32 to vector<1x16xf32>
    %41 = arith.addf %39, %40 : vector<1x16xf32>
    %cst_37 = arith.constant 1.000000e+00 : f32
    %42 = vector.broadcast %cst_37 : f32 to vector<1x16xf32>
    %43 = arith.divf %42, %41 : vector<1x16xf32>
    %44 = vector.broadcast %43 : vector<1x16xf32> to vector<50x16xf32>
    %45 = arith.mulf %33, %44 : vector<50x16xf32>
    %46 = vector.broadcast %26 : vector<50x1xf32> to vector<50x16xf32>
    %47 = arith.mulf %46, %45 : vector<50x16xf32>
    %48 = vector.broadcast %27 : vector<50x1xf32> to vector<50x16xf32>
    %49 = arith.addf %47, %48 : vector<50x16xf32>
    %c2_38 = arith.constant 2 : index
    %c0_39 = arith.constant 0 : index
    %50 = vector.load %arg11[%c2_38, %c0_39] : memref<54x16xf32, #tpu.memory_space<vmem>>, vector<50x16xf32>
    tpu.vector_store %arg11[%c2_38, %c0_39], %49 {strides = array<i32>} : memref<54x16xf32, #tpu.memory_space<vmem>>, vector<50x16xf32>,
    %c1_40 = arith.constant 1 : index
    %c0_41 = arith.constant 0 : index
    %51 = vector.load %arg11[%c1_40, %c0_41] : memref<54x16xf32, #tpu.memory_space<vmem>>, vector<50x16xf32>
    %c0_42 = arith.constant 0 : index
    %c0_43 = arith.constant 0 : index
    %52 = vector.load %arg12[%c0_42, %c0_43] : memref<50x48xf32, #tpu.memory_space<vmem>>, vector<50x16xf32>
    tpu.vector_store %arg12[%c0_42, %c0_43], %51 {strides = array<i32>} : memref<50x48xf32, #tpu.memory_space<vmem>>, vector<50x16xf32>,
    %c2_44 = arith.constant 2 : index
    %c0_45 = arith.constant 0 : index
    %53 = vector.load %arg11[%c2_44, %c0_45] : memref<54x16xf32, #tpu.memory_space<vmem>>, vector<50x16xf32>
    %c0_46 = arith.constant 0 : index
    %c16_47 = arith.constant 16 : index
    %54 = vector.load %arg12[%c0_46, %c16_47] : memref<50x48xf32, #tpu.memory_space<vmem>>, vector<50x16xf32>
    tpu.vector_store %arg12[%c0_46, %c16_47], %53 {strides = array<i32>} : memref<50x48xf32, #tpu.memory_space<vmem>>, vector<50x16xf32>,
    %c3_48 = arith.constant 3 : index
    %c0_49 = arith.constant 0 : index
    %55 = vector.load %arg11[%c3_48, %c0_49] : memref<54x16xf32, #tpu.memory_space<vmem>>, vector<50x16xf32>
    %c0_50 = arith.constant 0 : index
    %c32_51 = arith.constant 32 : index
    %56 = vector.load %arg12[%c0_50, %c32_51] : memref<50x48xf32, #tpu.memory_space<vmem>>, vector<50x16xf32>
    tpu.vector_store %arg12[%c0_50, %c32_51], %55 {strides = array<i32>} : memref<50x48xf32, #tpu.memory_space<vmem>>, vector<50x16xf32>,
    %c1_52 = arith.constant 1 : index
    %c0_53 = arith.constant 0 : index
    %c0_54 = arith.constant 0 : index
    %57 = vector.load %arg4[%c1_52, %c0_53, %c0_54] : memref<3x48x16xf32, #tpu.memory_space<vmem>>, vector<1x48x16xf32>
    %58 = vector.shape_cast %57 : vector<1x48x16xf32> to vector<48x16xf32>
    %c1_55 = arith.constant 1 : index
    %c0_56 = arith.constant 0 : index
    %c0_57 = arith.constant 0 : index
    %59 = vector.load %arg5[%c1_55, %c0_56, %c0_57] : memref<3x1x16xf32, #tpu.memory_space<vmem>>, vector<1x1x16xf32>
    %60 = vector.shape_cast %59 : vector<1x1x16xf32> to vector<1x16xf32>
    %c0_58 = arith.constant 0 : index
    %c0_59 = arith.constant 0 : index
    %61 = vector.load %arg12[%c0_58, %c0_59] : memref<50x48xf32, #tpu.memory_space<vmem>>, vector<50x48xf32>
    %cst_60 = arith.constant dense<0.000000e+00> : vector<50x16xf32>
    %62 = tpu.matmul %61, %58, %cst_60 {dimension_numbers = #tpu.dot_dimension_numbers<[1], [0], [0], [1], [0, 0, 1, 1], [], []>} : vector<50x48xf32>, vector<48x16xf32>, vector<50x16xf32> -> vector<50x16xf32>
    %63 = vector.broadcast %60 : vector<1x16xf32> to vector<50x16xf32>
    %64 = arith.addf %62, %63 : vector<50x16xf32>
    %c2_61 = arith.constant 2 : index
    %c0_62 = arith.constant 0 : index
    %65 = vector.load %arg11[%c2_61, %c0_62] : memref<54x16xf32, #tpu.memory_space<vmem>>, vector<50x16xf32>
    tpu.vector_store %arg11[%c2_61, %c0_62], %64 {strides = array<i32>} : memref<54x16xf32, #tpu.memory_space<vmem>>, vector<50x16xf32>,
    %c0_63 = arith.constant 0 : index
    %c0_64 = arith.constant 0 : index
    %66 = vector.load %arg11[%c0_63, %c0_64] : memref<54x16xf32, #tpu.memory_space<vmem>>, vector<50x16xf32>
    %c0_65 = arith.constant 0 : index
    %c0_66 = arith.constant 0 : index
    %67 = vector.load %arg12[%c0_65, %c0_66] : memref<50x48xf32, #tpu.memory_space<vmem>>, vector<50x16xf32>
    tpu.vector_store %arg12[%c0_65, %c0_66], %66 {strides = array<i32>} : memref<50x48xf32, #tpu.memory_space<vmem>>, vector<50x16xf32>,
    %c2_67 = arith.constant 2 : index
    %c0_68 = arith.constant 0 : index
    %68 = vector.load %arg11[%c2_67, %c0_68] : memref<54x16xf32, #tpu.memory_space<vmem>>, vector<50x16xf32>
    %c0_69 = arith.constant 0 : index
    %c16_70 = arith.constant 16 : index
    %69 = vector.load %arg12[%c0_69, %c16_70] : memref<50x48xf32, #tpu.memory_space<vmem>>, vector<50x16xf32>
    tpu.vector_store %arg12[%c0_69, %c16_70], %68 {strides = array<i32>} : memref<50x48xf32, #tpu.memory_space<vmem>>, vector<50x16xf32>,
    %c4 = arith.constant 4 : index
    %c0_71 = arith.constant 0 : index
    %70 = vector.load %arg11[%c4, %c0_71] : memref<54x16xf32, #tpu.memory_space<vmem>>, vector<50x16xf32>
    %c0_72 = arith.constant 0 : index
    %c32_73 = arith.constant 32 : index
    %71 = vector.load %arg12[%c0_72, %c32_73] : memref<50x48xf32, #tpu.memory_space<vmem>>, vector<50x16xf32>
    tpu.vector_store %arg12[%c0_72, %c32_73], %70 {strides = array<i32>} : memref<50x48xf32, #tpu.memory_space<vmem>>, vector<50x16xf32>,
    %c2_74 = arith.constant 2 : index
    %c0_75 = arith.constant 0 : index
    %c0_76 = arith.constant 0 : index
    %72 = vector.load %arg4[%c2_74, %c0_75, %c0_76] : memref<3x48x16xf32, #tpu.memory_space<vmem>>, vector<1x48x16xf32>
    %73 = vector.shape_cast %72 : vector<1x48x16xf32> to vector<48x16xf32>
    %c2_77 = arith.constant 2 : index
    %c0_78 = arith.constant 0 : index
    %c0_79 = arith.constant 0 : index
    %74 = vector.load %arg5[%c2_77, %c0_78, %c0_79] : memref<3x1x16xf32, #tpu.memory_space<vmem>>, vector<1x1x16xf32>
    %75 = vector.shape_cast %74 : vector<1x1x16xf32> to vector<1x16xf32>
    %c0_80 = arith.constant 0 : index
    %c0_81 = arith.constant 0 : index
    %76 = vector.load %arg12[%c0_80, %c0_81] : memref<50x48xf32, #tpu.memory_space<vmem>>, vector<50x48xf32>
    %cst_82 = arith.constant dense<0.000000e+00> : vector<50x16xf32>
    %77 = tpu.matmul %76, %73, %cst_82 {dimension_numbers = #tpu.dot_dimension_numbers<[1], [0], [0], [1], [0, 0, 1, 1], [], []>} : vector<50x48xf32>, vector<48x16xf32>, vector<50x16xf32> -> vector<50x16xf32>
    %78 = vector.broadcast %75 : vector<1x16xf32> to vector<50x16xf32>
    %79 = arith.addf %77, %78 : vector<50x16xf32>
    %cst_83 = arith.constant 0.000000e+00 : f32
    %80 = vector.broadcast %cst_83 : f32 to vector<50x16xf32>
    %81 = arith.maximumf %79, %80 : vector<50x16xf32>
    %c0_84 = arith.constant 0 : index
    %c0_85 = arith.constant 0 : index
    %82 = vector.load %arg8[%c0_84, %c0_85] : memref<50x1xf32, #tpu.memory_space<vmem>>, vector<50x1xf32>
    %c0_86 = arith.constant 0 : index
    %c0_87 = arith.constant 0 : index
    %83 = vector.load %arg9[%c0_86, %c0_87] : memref<50x1xf32, #tpu.memory_space<vmem>>, vector<50x1xf32>
    %cst_88 = arith.constant dense<0.000000e+00> : vector<16xf32>
    %84 = vector.multi_reduction <add>, %81, %cst_88 [0] : vector<50x16xf32> to vector<16xf32>
    %85 = vector.shape_cast %84 : vector<16xf32> to vector<1x16xf32>
    %cst_89 = arith.constant 5.000000e+01 : f32
    %86 = vector.broadcast %cst_89 : f32 to vector<1x16xf32>
    %87 = arith.divf %85, %86 : vector<1x16xf32>
    %88 = vector.broadcast %87 : vector<1x16xf32> to vector<50x16xf32>
    %89 = arith.subf %81, %88 : vector<50x16xf32>
    %90 = arith.mulf %89, %89 : vector<50x16xf32>
    %cst_90 = arith.constant dense<0.000000e+00> : vector<16xf32>
    %91 = vector.multi_reduction <add>, %90, %cst_90 [0] : vector<50x16xf32> to vector<16xf32>
    %92 = vector.shape_cast %91 : vector<16xf32> to vector<1x16xf32>
    %cst_91 = arith.constant 0.0204081628 : f32
    %93 = vector.broadcast %cst_91 : f32 to vector<1x16xf32>
    %94 = arith.mulf %92, %93 : vector<1x16xf32>
    %95 = math.sqrt %94 : vector<1x16xf32>
    %cst_92 = arith.constant 9.99999997E-7 : f32
    %96 = vector.broadcast %cst_92 : f32 to vector<1x16xf32>
    %97 = arith.addf %95, %96 : vector<1x16xf32>
    %cst_93 = arith.constant 1.000000e+00 : f32
    %98 = vector.broadcast %cst_93 : f32 to vector<1x16xf32>
    %99 = arith.divf %98, %97 : vector<1x16xf32>
    %100 = vector.broadcast %99 : vector<1x16xf32> to vector<50x16xf32>
    %101 = arith.mulf %89, %100 : vector<50x16xf32>
    %102 = vector.broadcast %82 : vector<50x1xf32> to vector<50x16xf32>
    %103 = arith.mulf %102, %101 : vector<50x16xf32>
    %104 = vector.broadcast %83 : vector<50x1xf32> to vector<50x16xf32>
    %105 = arith.addf %103, %104 : vector<50x16xf32>
    %c2_94 = arith.constant 2 : index
    %c0_95 = arith.constant 0 : index
    %106 = vector.load %arg11[%c2_94, %c0_95] : memref<54x16xf32, #tpu.memory_space<vmem>>, vector<50x16xf32>
    tpu.vector_store %arg11[%c2_94, %c0_95], %105 {strides = array<i32>} : memref<54x16xf32, #tpu.memory_space<vmem>>, vector<50x16xf32>,
    %c1_96 = arith.constant 1 : index
    %c0_97 = arith.constant 0 : index
    %107 = vector.load %arg11[%c1_96, %c0_97] : memref<54x16xf32, #tpu.memory_space<vmem>>, vector<50x16xf32>
    %c0_98 = arith.constant 0 : index
    %c0_99 = arith.constant 0 : index
    %108 = vector.load %arg12[%c0_98, %c0_99] : memref<50x48xf32, #tpu.memory_space<vmem>>, vector<50x16xf32>
    tpu.vector_store %arg12[%c0_98, %c0_99], %107 {strides = array<i32>} : memref<50x48xf32, #tpu.memory_space<vmem>>, vector<50x16xf32>,
    %c2_100 = arith.constant 2 : index
    %c0_101 = arith.constant 0 : index
    %109 = vector.load %arg11[%c2_100, %c0_101] : memref<54x16xf32, #tpu.memory_space<vmem>>, vector<50x16xf32>
    %c0_102 = arith.constant 0 : index
    %c16_103 = arith.constant 16 : index
    %110 = vector.load %arg12[%c0_102, %c16_103] : memref<50x48xf32, #tpu.memory_space<vmem>>, vector<50x16xf32>
    tpu.vector_store %arg12[%c0_102, %c16_103], %109 {strides = array<i32>} : memref<50x48xf32, #tpu.memory_space<vmem>>, vector<50x16xf32>,
    %c3_104 = arith.constant 3 : index
    %c0_105 = arith.constant 0 : index
    %111 = vector.load %arg11[%c3_104, %c0_105] : memref<54x16xf32, #tpu.memory_space<vmem>>, vector<50x16xf32>
    %c0_106 = arith.constant 0 : index
    %c32_107 = arith.constant 32 : index
    %112 = vector.load %arg12[%c0_106, %c32_107] : memref<50x48xf32, #tpu.memory_space<vmem>>, vector<50x16xf32>
    tpu.vector_store %arg12[%c0_106, %c32_107], %111 {strides = array<i32>} : memref<50x48xf32, #tpu.memory_space<vmem>>, vector<50x16xf32>,
    %c0_108 = arith.constant 0 : index
    %c0_109 = arith.constant 0 : index
    %c0_110 = arith.constant 0 : index
    %113 = vector.load %arg4[%c0_108, %c0_109, %c0_110] : memref<3x48x16xf32, #tpu.memory_space<vmem>>, vector<1x48x16xf32>
    %114 = vector.shape_cast %113 : vector<1x48x16xf32> to vector<48x16xf32>
    %c0_111 = arith.constant 0 : index
    %c0_112 = arith.constant 0 : index
    %c0_113 = arith.constant 0 : index
    %115 = vector.load %arg5[%c0_111, %c0_112, %c0_113] : memref<3x1x16xf32, #tpu.memory_space<vmem>>, vector<1x1x16xf32>
    %116 = vector.shape_cast %115 : vector<1x1x16xf32> to vector<1x16xf32>
    %c0_114 = arith.constant 0 : index
    %c0_115 = arith.constant 0 : index
    %117 = vector.load %arg12[%c0_114, %c0_115] : memref<50x48xf32, #tpu.memory_space<vmem>>, vector<50x48xf32>
    %cst_116 = arith.constant dense<0.000000e+00> : vector<50x16xf32>
    %118 = tpu.matmul %117, %114, %cst_116 {dimension_numbers = #tpu.dot_dimension_numbers<[1], [0], [0], [1], [0, 0, 1, 1], [], []>} : vector<50x48xf32>, vector<48x16xf32>, vector<50x16xf32> -> vector<50x16xf32>
    %119 = vector.broadcast %116 : vector<1x16xf32> to vector<50x16xf32>
    %120 = arith.addf %118, %119 : vector<50x16xf32>
    %cst_117 = arith.constant 0.000000e+00 : f32
    %121 = vector.broadcast %cst_117 : f32 to vector<50x16xf32>
    %122 = arith.maximumf %120, %121 : vector<50x16xf32>
    %c0_118 = arith.constant 0 : index
    %c0_119 = arith.constant 0 : index
    %123 = vector.load %arg6[%c0_118, %c0_119] : memref<50x1xf32, #tpu.memory_space<vmem>>, vector<50x1xf32>
    %c0_120 = arith.constant 0 : index
    %c0_121 = arith.constant 0 : index
    %124 = vector.load %arg7[%c0_120, %c0_121] : memref<50x1xf32, #tpu.memory_space<vmem>>, vector<50x1xf32>
    %cst_122 = arith.constant dense<0.000000e+00> : vector<16xf32>
    %125 = vector.multi_reduction <add>, %122, %cst_122 [0] : vector<50x16xf32> to vector<16xf32>
    %126 = vector.shape_cast %125 : vector<16xf32> to vector<1x16xf32>
    %cst_123 = arith.constant 5.000000e+01 : f32
    %127 = vector.broadcast %cst_123 : f32 to vector<1x16xf32>
    %128 = arith.divf %126, %127 : vector<1x16xf32>
    %129 = vector.broadcast %128 : vector<1x16xf32> to vector<50x16xf32>
    %130 = arith.subf %122, %129 : vector<50x16xf32>
    %131 = arith.mulf %130, %130 : vector<50x16xf32>
    %cst_124 = arith.constant dense<0.000000e+00> : vector<16xf32>
    %132 = vector.multi_reduction <add>, %131, %cst_124 [0] : vector<50x16xf32> to vector<16xf32>
    %133 = vector.shape_cast %132 : vector<16xf32> to vector<1x16xf32>
    %cst_125 = arith.constant 0.0204081628 : f32
    %134 = vector.broadcast %cst_125 : f32 to vector<1x16xf32>
    %135 = arith.mulf %133, %134 : vector<1x16xf32>
    %136 = math.sqrt %135 : vector<1x16xf32>
    %cst_126 = arith.constant 9.99999997E-7 : f32
    %137 = vector.broadcast %cst_126 : f32 to vector<1x16xf32>
    %138 = arith.addf %136, %137 : vector<1x16xf32>
    %cst_127 = arith.constant 1.000000e+00 : f32
    %139 = vector.broadcast %cst_127 : f32 to vector<1x16xf32>
    %140 = arith.divf %139, %138 : vector<1x16xf32>
    %141 = vector.broadcast %140 : vector<1x16xf32> to vector<50x16xf32>
    %142 = arith.mulf %130, %141 : vector<50x16xf32>
    %143 = vector.broadcast %123 : vector<50x1xf32> to vector<50x16xf32>
    %144 = arith.mulf %143, %142 : vector<50x16xf32>
    %145 = vector.broadcast %124 : vector<50x1xf32> to vector<50x16xf32>
    %146 = arith.addf %144, %145 : vector<50x16xf32>
    %c2_128 = arith.constant 2 : index
    %c0_129 = arith.constant 0 : index
    %147 = vector.load %arg11[%c2_128, %c0_129] : memref<54x16xf32, #tpu.memory_space<vmem>>, vector<50x16xf32>
    tpu.vector_store %arg11[%c2_128, %c0_129], %146 {strides = array<i32>} : memref<54x16xf32, #tpu.memory_space<vmem>>, vector<50x16xf32>,
    %c1_130 = arith.constant 1 : index
    %c0_131 = arith.constant 0 : index
    %148 = vector.load %arg11[%c1_130, %c0_131] : memref<54x16xf32, #tpu.memory_space<vmem>>, vector<50x16xf32>
    %c0_132 = arith.constant 0 : index
    %c0_133 = arith.constant 0 : index
    %149 = vector.load %arg12[%c0_132, %c0_133] : memref<50x48xf32, #tpu.memory_space<vmem>>, vector<50x16xf32>
    tpu.vector_store %arg12[%c0_132, %c0_133], %148 {strides = array<i32>} : memref<50x48xf32, #tpu.memory_space<vmem>>, vector<50x16xf32>,
    %c2_134 = arith.constant 2 : index
    %c0_135 = arith.constant 0 : index
    %150 = vector.load %arg11[%c2_134, %c0_135] : memref<54x16xf32, #tpu.memory_space<vmem>>, vector<50x16xf32>
    %c0_136 = arith.constant 0 : index
    %c16_137 = arith.constant 16 : index
    %151 = vector.load %arg12[%c0_136, %c16_137] : memref<50x48xf32, #tpu.memory_space<vmem>>, vector<50x16xf32>
    tpu.vector_store %arg12[%c0_136, %c16_137], %150 {strides = array<i32>} : memref<50x48xf32, #tpu.memory_space<vmem>>, vector<50x16xf32>,
    %c3_138 = arith.constant 3 : index
    %c0_139 = arith.constant 0 : index
    %152 = vector.load %arg11[%c3_138, %c0_139] : memref<54x16xf32, #tpu.memory_space<vmem>>, vector<50x16xf32>
    %c0_140 = arith.constant 0 : index
    %c32_141 = arith.constant 32 : index
    %153 = vector.load %arg12[%c0_140, %c32_141] : memref<50x48xf32, #tpu.memory_space<vmem>>, vector<50x16xf32>
    tpu.vector_store %arg12[%c0_140, %c32_141], %152 {strides = array<i32>} : memref<50x48xf32, #tpu.memory_space<vmem>>, vector<50x16xf32>,
    %c1_142 = arith.constant 1 : index
    %c0_143 = arith.constant 0 : index
    %c0_144 = arith.constant 0 : index
    %154 = vector.load %arg4[%c1_142, %c0_143, %c0_144] : memref<3x48x16xf32, #tpu.memory_space<vmem>>, vector<1x48x16xf32>
    %155 = vector.shape_cast %154 : vector<1x48x16xf32> to vector<48x16xf32>
    %c1_145 = arith.constant 1 : index
    %c0_146 = arith.constant 0 : index
    %c0_147 = arith.constant 0 : index
    %156 = vector.load %arg5[%c1_145, %c0_146, %c0_147] : memref<3x1x16xf32, #tpu.memory_space<vmem>>, vector<1x1x16xf32>
    %157 = vector.shape_cast %156 : vector<1x1x16xf32> to vector<1x16xf32>
    %c0_148 = arith.constant 0 : index
    %c0_149 = arith.constant 0 : index
    %158 = vector.load %arg12[%c0_148, %c0_149] : memref<50x48xf32, #tpu.memory_space<vmem>>, vector<50x48xf32>
    %cst_150 = arith.constant dense<0.000000e+00> : vector<50x16xf32>
    %159 = tpu.matmul %158, %155, %cst_150 {dimension_numbers = #tpu.dot_dimension_numbers<[1], [0], [0], [1], [0, 0, 1, 1], [], []>} : vector<50x48xf32>, vector<48x16xf32>, vector<50x16xf32> -> vector<50x16xf32>
    %160 = vector.broadcast %157 : vector<1x16xf32> to vector<50x16xf32>
    %161 = arith.addf %159, %160 : vector<50x16xf32>
    %c2_151 = arith.constant 2 : index
    %c0_152 = arith.constant 0 : index
    %162 = vector.load %arg11[%c2_151, %c0_152] : memref<54x16xf32, #tpu.memory_space<vmem>>, vector<50x16xf32>
    tpu.vector_store %arg11[%c2_151, %c0_152], %161 {strides = array<i32>} : memref<54x16xf32, #tpu.memory_space<vmem>>, vector<50x16xf32>,
    %c0_153 = arith.constant 0 : index
    %c0_154 = arith.constant 0 : index
    %163 = vector.load %arg11[%c0_153, %c0_154] : memref<54x16xf32, #tpu.memory_space<vmem>>, vector<50x16xf32>
    %c0_155 = arith.constant 0 : index
    %c0_156 = arith.constant 0 : index
    %164 = vector.load %arg12[%c0_155, %c0_156] : memref<50x48xf32, #tpu.memory_space<vmem>>, vector<50x16xf32>
    tpu.vector_store %arg12[%c0_155, %c0_156], %163 {strides = array<i32>} : memref<50x48xf32, #tpu.memory_space<vmem>>, vector<50x16xf32>,
    %c2_157 = arith.constant 2 : index
    %c0_158 = arith.constant 0 : index
    %165 = vector.load %arg11[%c2_157, %c0_158] : memref<54x16xf32, #tpu.memory_space<vmem>>, vector<50x16xf32>
    %c0_159 = arith.constant 0 : index
    %c16_160 = arith.constant 16 : index
    %166 = vector.load %arg12[%c0_159, %c16_160] : memref<50x48xf32, #tpu.memory_space<vmem>>, vector<50x16xf32>
    tpu.vector_store %arg12[%c0_159, %c16_160], %165 {strides = array<i32>} : memref<50x48xf32, #tpu.memory_space<vmem>>, vector<50x16xf32>,
    %c4_161 = arith.constant 4 : index
    %c0_162 = arith.constant 0 : index
    %167 = vector.load %arg11[%c4_161, %c0_162] : memref<54x16xf32, #tpu.memory_space<vmem>>, vector<50x16xf32>
    %c0_163 = arith.constant 0 : index
    %c32_164 = arith.constant 32 : index
    %168 = vector.load %arg12[%c0_163, %c32_164] : memref<50x48xf32, #tpu.memory_space<vmem>>, vector<50x16xf32>
    tpu.vector_store %arg12[%c0_163, %c32_164], %167 {strides = array<i32>} : memref<50x48xf32, #tpu.memory_space<vmem>>, vector<50x16xf32>,
    %c2_165 = arith.constant 2 : index
    %c0_166 = arith.constant 0 : index
    %c0_167 = arith.constant 0 : index
    %169 = vector.load %arg4[%c2_165, %c0_166, %c0_167] : memref<3x48x16xf32, #tpu.memory_space<vmem>>, vector<1x48x16xf32>
    %170 = vector.shape_cast %169 : vector<1x48x16xf32> to vector<48x16xf32>
    %c2_168 = arith.constant 2 : index
    %c0_169 = arith.constant 0 : index
    %c0_170 = arith.constant 0 : index
    %171 = vector.load %arg5[%c2_168, %c0_169, %c0_170] : memref<3x1x16xf32, #tpu.memory_space<vmem>>, vector<1x1x16xf32>
    %172 = vector.shape_cast %171 : vector<1x1x16xf32> to vector<1x16xf32>
    %c0_171 = arith.constant 0 : index
    %c0_172 = arith.constant 0 : index
    %173 = vector.load %arg12[%c0_171, %c0_172] : memref<50x48xf32, #tpu.memory_space<vmem>>, vector<50x48xf32>
    %cst_173 = arith.constant dense<0.000000e+00> : vector<50x16xf32>
    %174 = tpu.matmul %173, %170, %cst_173 {dimension_numbers = #tpu.dot_dimension_numbers<[1], [0], [0], [1], [0, 0, 1, 1], [], []>} : vector<50x48xf32>, vector<48x16xf32>, vector<50x16xf32> -> vector<50x16xf32>
    %175 = vector.broadcast %172 : vector<1x16xf32> to vector<50x16xf32>
    %176 = arith.addf %174, %175 : vector<50x16xf32>
    %c2_174 = arith.constant 2 : index
    %c0_175 = arith.constant 0 : index
    %177 = vector.load %arg11[%c2_174, %c0_175] : memref<54x16xf32, #tpu.memory_space<vmem>>, vector<50x16xf32>
    tpu.vector_store %arg11[%c2_174, %c0_175], %176 {strides = array<i32>} : memref<54x16xf32, #tpu.memory_space<vmem>>, vector<50x16xf32>,
    %c1_176 = arith.constant 1 : index
    %c0_177 = arith.constant 0 : index
    %178 = vector.load %arg11[%c1_176, %c0_177] : memref<54x16xf32, #tpu.memory_space<vmem>>, vector<50x16xf32>
    %c0_178 = arith.constant 0 : index
    %c0_179 = arith.constant 0 : index
    %179 = vector.load %arg12[%c0_178, %c0_179] : memref<50x48xf32, #tpu.memory_space<vmem>>, vector<50x16xf32>
    tpu.vector_store %arg12[%c0_178, %c0_179], %178 {strides = array<i32>} : memref<50x48xf32, #tpu.memory_space<vmem>>, vector<50x16xf32>,
    %c2_180 = arith.constant 2 : index
    %c0_181 = arith.constant 0 : index
    %180 = vector.load %arg11[%c2_180, %c0_181] : memref<54x16xf32, #tpu.memory_space<vmem>>, vector<50x16xf32>
    %c0_182 = arith.constant 0 : index
    %c16_183 = arith.constant 16 : index
    %181 = vector.load %arg12[%c0_182, %c16_183] : memref<50x48xf32, #tpu.memory_space<vmem>>, vector<50x16xf32>
    tpu.vector_store %arg12[%c0_182, %c16_183], %180 {strides = array<i32>} : memref<50x48xf32, #tpu.memory_space<vmem>>, vector<50x16xf32>,
    %c3_184 = arith.constant 3 : index
    %c0_185 = arith.constant 0 : index
    %182 = vector.load %arg11[%c3_184, %c0_185] : memref<54x16xf32, #tpu.memory_space<vmem>>, vector<50x16xf32>
    %c0_186 = arith.constant 0 : index
    %c32_187 = arith.constant 32 : index
    %183 = vector.load %arg12[%c0_186, %c32_187] : memref<50x48xf32, #tpu.memory_space<vmem>>, vector<50x16xf32>
    tpu.vector_store %arg12[%c0_186, %c32_187], %182 {strides = array<i32>} : memref<50x48xf32, #tpu.memory_space<vmem>>, vector<50x16xf32>,
    %c0_188 = arith.constant 0 : index
    %c0_189 = arith.constant 0 : index
    %c0_190 = arith.constant 0 : index
    %184 = vector.load %arg4[%c0_188, %c0_189, %c0_190] : memref<3x48x16xf32, #tpu.memory_space<vmem>>, vector<1x48x16xf32>
    %185 = vector.shape_cast %184 : vector<1x48x16xf32> to vector<48x16xf32>
    %c0_191 = arith.constant 0 : index
    %c0_192 = arith.constant 0 : index
    %c0_193 = arith.constant 0 : index
    %186 = vector.load %arg5[%c0_191, %c0_192, %c0_193] : memref<3x1x16xf32, #tpu.memory_space<vmem>>, vector<1x1x16xf32>
    %187 = vector.shape_cast %186 : vector<1x1x16xf32> to vector<1x16xf32>
    %c0_194 = arith.constant 0 : index
    %c0_195 = arith.constant 0 : index
    %188 = vector.load %arg12[%c0_194, %c0_195] : memref<50x48xf32, #tpu.memory_space<vmem>>, vector<50x48xf32>
    %cst_196 = arith.constant dense<0.000000e+00> : vector<50x16xf32>
    %189 = tpu.matmul %188, %185, %cst_196 {dimension_numbers = #tpu.dot_dimension_numbers<[1], [0], [0], [1], [0, 0, 1, 1], [], []>} : vector<50x48xf32>, vector<48x16xf32>, vector<50x16xf32> -> vector<50x16xf32>
    %190 = vector.broadcast %187 : vector<1x16xf32> to vector<50x16xf32>
    %191 = arith.addf %189, %190 : vector<50x16xf32>
    %cst_197 = arith.constant 0.000000e+00 : f32
    %192 = vector.broadcast %cst_197 : f32 to vector<50x16xf32>
    %193 = arith.maximumf %191, %192 : vector<50x16xf32>
    %c0_198 = arith.constant 0 : index
    %c0_199 = arith.constant 0 : index
    %194 = vector.load %arg6[%c0_198, %c0_199] : memref<50x1xf32, #tpu.memory_space<vmem>>, vector<50x1xf32>
    %c0_200 = arith.constant 0 : index
    %c0_201 = arith.constant 0 : index
    %195 = vector.load %arg7[%c0_200, %c0_201] : memref<50x1xf32, #tpu.memory_space<vmem>>, vector<50x1xf32>
    %cst_202 = arith.constant dense<0.000000e+00> : vector<16xf32>
    %196 = vector.multi_reduction <add>, %193, %cst_202 [0] : vector<50x16xf32> to vector<16xf32>
    %197 = vector.shape_cast %196 : vector<16xf32> to vector<1x16xf32>
    %cst_203 = arith.constant 5.000000e+01 : f32
    %198 = vector.broadcast %cst_203 : f32 to vector<1x16xf32>
    %199 = arith.divf %197, %198 : vector<1x16xf32>
    %200 = vector.broadcast %199 : vector<1x16xf32> to vector<50x16xf32>
    %201 = arith.subf %193, %200 : vector<50x16xf32>
    %202 = arith.mulf %201, %201 : vector<50x16xf32>
    %cst_204 = arith.constant dense<0.000000e+00> : vector<16xf32>
    %203 = vector.multi_reduction <add>, %202, %cst_204 [0] : vector<50x16xf32> to vector<16xf32>
    %204 = vector.shape_cast %203 : vector<16xf32> to vector<1x16xf32>
    %cst_205 = arith.constant 0.0204081628 : f32
    %205 = vector.broadcast %cst_205 : f32 to vector<1x16xf32>
    %206 = arith.mulf %204, %205 : vector<1x16xf32>
    %207 = math.sqrt %206 : vector<1x16xf32>
    %cst_206 = arith.constant 9.99999997E-7 : f32
    %208 = vector.broadcast %cst_206 : f32 to vector<1x16xf32>
    %209 = arith.addf %207, %208 : vector<1x16xf32>
    %cst_207 = arith.constant 1.000000e+00 : f32
    %210 = vector.broadcast %cst_207 : f32 to vector<1x16xf32>
    %211 = arith.divf %210, %209 : vector<1x16xf32>
    %212 = vector.broadcast %211 : vector<1x16xf32> to vector<50x16xf32>
    %213 = arith.mulf %201, %212 : vector<50x16xf32>
    %214 = vector.broadcast %194 : vector<50x1xf32> to vector<50x16xf32>
    %215 = arith.mulf %214, %213 : vector<50x16xf32>
    %216 = vector.broadcast %195 : vector<50x1xf32> to vector<50x16xf32>
    %217 = arith.addf %215, %216 : vector<50x16xf32>
    %c2_208 = arith.constant 2 : index
    %c0_209 = arith.constant 0 : index
    %218 = vector.load %arg11[%c2_208, %c0_209] : memref<54x16xf32, #tpu.memory_space<vmem>>, vector<50x16xf32>
    tpu.vector_store %arg11[%c2_208, %c0_209], %217 {strides = array<i32>} : memref<54x16xf32, #tpu.memory_space<vmem>>, vector<50x16xf32>,
    %c1_210 = arith.constant 1 : index
    %c0_211 = arith.constant 0 : index
    %219 = vector.load %arg11[%c1_210, %c0_211] : memref<54x16xf32, #tpu.memory_space<vmem>>, vector<50x16xf32>
    %c0_212 = arith.constant 0 : index
    %c0_213 = arith.constant 0 : index
    %220 = vector.load %arg12[%c0_212, %c0_213] : memref<50x48xf32, #tpu.memory_space<vmem>>, vector<50x16xf32>
    tpu.vector_store %arg12[%c0_212, %c0_213], %219 {strides = array<i32>} : memref<50x48xf32, #tpu.memory_space<vmem>>, vector<50x16xf32>,
    %c2_214 = arith.constant 2 : index
    %c0_215 = arith.constant 0 : index
    %221 = vector.load %arg11[%c2_214, %c0_215] : memref<54x16xf32, #tpu.memory_space<vmem>>, vector<50x16xf32>
    %c0_216 = arith.constant 0 : index
    %c16_217 = arith.constant 16 : index
    %222 = vector.load %arg12[%c0_216, %c16_217] : memref<50x48xf32, #tpu.memory_space<vmem>>, vector<50x16xf32>
    tpu.vector_store %arg12[%c0_216, %c16_217], %221 {strides = array<i32>} : memref<50x48xf32, #tpu.memory_space<vmem>>, vector<50x16xf32>,
    %c3_218 = arith.constant 3 : index
    %c0_219 = arith.constant 0 : index
    %223 = vector.load %arg11[%c3_218, %c0_219] : memref<54x16xf32, #tpu.memory_space<vmem>>, vector<50x16xf32>
    %c0_220 = arith.constant 0 : index
    %c32_221 = arith.constant 32 : index
    %224 = vector.load %arg12[%c0_220, %c32_221] : memref<50x48xf32, #tpu.memory_space<vmem>>, vector<50x16xf32>
    tpu.vector_store %arg12[%c0_220, %c32_221], %223 {strides = array<i32>} : memref<50x48xf32, #tpu.memory_space<vmem>>, vector<50x16xf32>,
    %c1_222 = arith.constant 1 : index
    %c0_223 = arith.constant 0 : index
    %c0_224 = arith.constant 0 : index
    %225 = vector.load %arg4[%c1_222, %c0_223, %c0_224] : memref<3x48x16xf32, #tpu.memory_space<vmem>>, vector<1x48x16xf32>
    %226 = vector.shape_cast %225 : vector<1x48x16xf32> to vector<48x16xf32>
    %c1_225 = arith.constant 1 : index
    %c0_226 = arith.constant 0 : index
    %c0_227 = arith.constant 0 : index
    %227 = vector.load %arg5[%c1_225, %c0_226, %c0_227] : memref<3x1x16xf32, #tpu.memory_space<vmem>>, vector<1x1x16xf32>
    %228 = vector.shape_cast %227 : vector<1x1x16xf32> to vector<1x16xf32>
    %c0_228 = arith.constant 0 : index
    %c0_229 = arith.constant 0 : index
    %229 = vector.load %arg12[%c0_228, %c0_229] : memref<50x48xf32, #tpu.memory_space<vmem>>, vector<50x48xf32>
    %cst_230 = arith.constant dense<0.000000e+00> : vector<50x16xf32>
    %230 = tpu.matmul %229, %226, %cst_230 {dimension_numbers = #tpu.dot_dimension_numbers<[1], [0], [0], [1], [0, 0, 1, 1], [], []>} : vector<50x48xf32>, vector<48x16xf32>, vector<50x16xf32> -> vector<50x16xf32>
    %231 = vector.broadcast %228 : vector<1x16xf32> to vector<50x16xf32>
    %232 = arith.addf %230, %231 : vector<50x16xf32>
    %c2_231 = arith.constant 2 : index
    %c0_232 = arith.constant 0 : index
    %233 = vector.load %arg11[%c2_231, %c0_232] : memref<54x16xf32, #tpu.memory_space<vmem>>, vector<50x16xf32>
    tpu.vector_store %arg11[%c2_231, %c0_232], %232 {strides = array<i32>} : memref<54x16xf32, #tpu.memory_space<vmem>>, vector<50x16xf32>,
    %c0_233 = arith.constant 0 : index
    %c0_234 = arith.constant 0 : index
    %234 = vector.load %arg11[%c0_233, %c0_234] : memref<54x16xf32, #tpu.memory_space<vmem>>, vector<50x16xf32>
    %c0_235 = arith.constant 0 : index
    %c0_236 = arith.constant 0 : index
    %235 = vector.load %arg12[%c0_235, %c0_236] : memref<50x48xf32, #tpu.memory_space<vmem>>, vector<50x16xf32>
    tpu.vector_store %arg12[%c0_235, %c0_236], %234 {strides = array<i32>} : memref<50x48xf32, #tpu.memory_space<vmem>>, vector<50x16xf32>,
    %c2_237 = arith.constant 2 : index
    %c0_238 = arith.constant 0 : index
    %236 = vector.load %arg11[%c2_237, %c0_238] : memref<54x16xf32, #tpu.memory_space<vmem>>, vector<50x16xf32>
    %c0_239 = arith.constant 0 : index
    %c16_240 = arith.constant 16 : index
    %237 = vector.load %arg12[%c0_239, %c16_240] : memref<50x48xf32, #tpu.memory_space<vmem>>, vector<50x16xf32>
    tpu.vector_store %arg12[%c0_239, %c16_240], %236 {strides = array<i32>} : memref<50x48xf32, #tpu.memory_space<vmem>>, vector<50x16xf32>,
    %c4_241 = arith.constant 4 : index
    %c0_242 = arith.constant 0 : index
    %238 = vector.load %arg11[%c4_241, %c0_242] : memref<54x16xf32, #tpu.memory_space<vmem>>, vector<50x16xf32>
    %c0_243 = arith.constant 0 : index
    %c32_244 = arith.constant 32 : index
    %239 = vector.load %arg12[%c0_243, %c32_244] : memref<50x48xf32, #tpu.memory_space<vmem>>, vector<50x16xf32>
    tpu.vector_store %arg12[%c0_243, %c32_244], %238 {strides = array<i32>} : memref<50x48xf32, #tpu.memory_space<vmem>>, vector<50x16xf32>,
    %c2_245 = arith.constant 2 : index
    %c0_246 = arith.constant 0 : index
    %c0_247 = arith.constant 0 : index
    %240 = vector.load %arg4[%c2_245, %c0_246, %c0_247] : memref<3x48x16xf32, #tpu.memory_space<vmem>>, vector<1x48x16xf32>
    %241 = vector.shape_cast %240 : vector<1x48x16xf32> to vector<48x16xf32>
    %c2_248 = arith.constant 2 : index
    %c0_249 = arith.constant 0 : index
    %c0_250 = arith.constant 0 : index
    %242 = vector.load %arg5[%c2_248, %c0_249, %c0_250] : memref<3x1x16xf32, #tpu.memory_space<vmem>>, vector<1x1x16xf32>
    %243 = vector.shape_cast %242 : vector<1x1x16xf32> to vector<1x16xf32>
    %c0_251 = arith.constant 0 : index
    %c0_252 = arith.constant 0 : index
    %244 = vector.load %arg12[%c0_251, %c0_252] : memref<50x48xf32, #tpu.memory_space<vmem>>, vector<50x48xf32>
    %cst_253 = arith.constant dense<0.000000e+00> : vector<50x16xf32>
    %245 = tpu.matmul %244, %241, %cst_253 {dimension_numbers = #tpu.dot_dimension_numbers<[1], [0], [0], [1], [0, 0, 1, 1], [], []>} : vector<50x48xf32>, vector<48x16xf32>, vector<50x16xf32> -> vector<50x16xf32>
    %246 = vector.broadcast %243 : vector<1x16xf32> to vector<50x16xf32>
    %247 = arith.addf %245, %246 : vector<50x16xf32>
    %c2_254 = arith.constant 2 : index
    %c0_255 = arith.constant 0 : index
    %248 = vector.load %arg11[%c2_254, %c0_255] : memref<54x16xf32, #tpu.memory_space<vmem>>, vector<50x16xf32>
    tpu.vector_store %arg11[%c2_254, %c0_255], %247 {strides = array<i32>} : memref<54x16xf32, #tpu.memory_space<vmem>>, vector<50x16xf32>,
    %c1_256 = arith.constant 1 : index
    %c0_257 = arith.constant 0 : index
    %249 = vector.load %arg11[%c1_256, %c0_257] : memref<54x16xf32, #tpu.memory_space<vmem>>, vector<50x16xf32>
    %c0_258 = arith.constant 0 : index
    %c0_259 = arith.constant 0 : index
    %250 = vector.load %arg12[%c0_258, %c0_259] : memref<50x48xf32, #tpu.memory_space<vmem>>, vector<50x16xf32>
    tpu.vector_store %arg12[%c0_258, %c0_259], %249 {strides = array<i32>} : memref<50x48xf32, #tpu.memory_space<vmem>>, vector<50x16xf32>,
    %c2_260 = arith.constant 2 : index
    %c0_261 = arith.constant 0 : index
    %251 = vector.load %arg11[%c2_260, %c0_261] : memref<54x16xf32, #tpu.memory_space<vmem>>, vector<50x16xf32>
    %c0_262 = arith.constant 0 : index
    %c16_263 = arith.constant 16 : index
    %252 = vector.load %arg12[%c0_262, %c16_263] : memref<50x48xf32, #tpu.memory_space<vmem>>, vector<50x16xf32>
    tpu.vector_store %arg12[%c0_262, %c16_263], %251 {strides = array<i32>} : memref<50x48xf32, #tpu.memory_space<vmem>>, vector<50x16xf32>,
    %c3_264 = arith.constant 3 : index
    %c0_265 = arith.constant 0 : index
    %253 = vector.load %arg11[%c3_264, %c0_265] : memref<54x16xf32, #tpu.memory_space<vmem>>, vector<50x16xf32>
    %c0_266 = arith.constant 0 : index
    %c32_267 = arith.constant 32 : index
    %254 = vector.load %arg12[%c0_266, %c32_267] : memref<50x48xf32, #tpu.memory_space<vmem>>, vector<50x16xf32>
    tpu.vector_store %arg12[%c0_266, %c32_267], %253 {strides = array<i32>} : memref<50x48xf32, #tpu.memory_space<vmem>>, vector<50x16xf32>,
    %c0_268 = arith.constant 0 : index
    %c0_269 = arith.constant 0 : index
    %c0_270 = arith.constant 0 : index
    %255 = vector.load %arg4[%c0_268, %c0_269, %c0_270] : memref<3x48x16xf32, #tpu.memory_space<vmem>>, vector<1x48x16xf32>
    %256 = vector.shape_cast %255 : vector<1x48x16xf32> to vector<48x16xf32>
    %c0_271 = arith.constant 0 : index
    %c0_272 = arith.constant 0 : index
    %c0_273 = arith.constant 0 : index
    %257 = vector.load %arg5[%c0_271, %c0_272, %c0_273] : memref<3x1x16xf32, #tpu.memory_space<vmem>>, vector<1x1x16xf32>
    %258 = vector.shape_cast %257 : vector<1x1x16xf32> to vector<1x16xf32>
    %c0_274 = arith.constant 0 : index
    %c0_275 = arith.constant 0 : index
    %259 = vector.load %arg12[%c0_274, %c0_275] : memref<50x48xf32, #tpu.memory_space<vmem>>, vector<50x48xf32>
    %cst_276 = arith.constant dense<0.000000e+00> : vector<50x16xf32>
    %260 = tpu.matmul %259, %256, %cst_276 {dimension_numbers = #tpu.dot_dimension_numbers<[1], [0], [0], [1], [0, 0, 1, 1], [], []>} : vector<50x48xf32>, vector<48x16xf32>, vector<50x16xf32> -> vector<50x16xf32>
    %261 = vector.broadcast %258 : vector<1x16xf32> to vector<50x16xf32>
    %262 = arith.addf %260, %261 : vector<50x16xf32>
    %cst_277 = arith.constant 0.000000e+00 : f32
    %263 = vector.broadcast %cst_277 : f32 to vector<50x16xf32>
    %264 = arith.maximumf %262, %263 : vector<50x16xf32>
    %c0_278 = arith.constant 0 : index
    %c0_279 = arith.constant 0 : index
    %265 = vector.load %arg6[%c0_278, %c0_279] : memref<50x1xf32, #tpu.memory_space<vmem>>, vector<50x1xf32>
    %c0_280 = arith.constant 0 : index
    %c0_281 = arith.constant 0 : index
    %266 = vector.load %arg7[%c0_280, %c0_281] : memref<50x1xf32, #tpu.memory_space<vmem>>, vector<50x1xf32>
    %cst_282 = arith.constant dense<0.000000e+00> : vector<16xf32>
    %267 = vector.multi_reduction <add>, %264, %cst_282 [0] : vector<50x16xf32> to vector<16xf32>
    %268 = vector.shape_cast %267 : vector<16xf32> to vector<1x16xf32>
    %cst_283 = arith.constant 5.000000e+01 : f32
    %269 = vector.broadcast %cst_283 : f32 to vector<1x16xf32>
    %270 = arith.divf %268, %269 : vector<1x16xf32>
    %271 = vector.broadcast %270 : vector<1x16xf32> to vector<50x16xf32>
    %272 = arith.subf %264, %271 : vector<50x16xf32>
    %273 = arith.mulf %272, %272 : vector<50x16xf32>
    %cst_284 = arith.constant dense<0.000000e+00> : vector<16xf32>
    %274 = vector.multi_reduction <add>, %273, %cst_284 [0] : vector<50x16xf32> to vector<16xf32>
    %275 = vector.shape_cast %274 : vector<16xf32> to vector<1x16xf32>
    %cst_285 = arith.constant 0.0204081628 : f32
    %276 = vector.broadcast %cst_285 : f32 to vector<1x16xf32>
    %277 = arith.mulf %275, %276 : vector<1x16xf32>
    %278 = math.sqrt %277 : vector<1x16xf32>
    %cst_286 = arith.constant 9.99999997E-7 : f32
    %279 = vector.broadcast %cst_286 : f32 to vector<1x16xf32>
    %280 = arith.addf %278, %279 : vector<1x16xf32>
    %cst_287 = arith.constant 1.000000e+00 : f32
    %281 = vector.broadcast %cst_287 : f32 to vector<1x16xf32>
    %282 = arith.divf %281, %280 : vector<1x16xf32>
    %283 = vector.broadcast %282 : vector<1x16xf32> to vector<50x16xf32>
    %284 = arith.mulf %272, %283 : vector<50x16xf32>
    %285 = vector.broadcast %265 : vector<50x1xf32> to vector<50x16xf32>
    %286 = arith.mulf %285, %284 : vector<50x16xf32>
    %287 = vector.broadcast %266 : vector<50x1xf32> to vector<50x16xf32>
    %288 = arith.addf %286, %287 : vector<50x16xf32>
    %c2_288 = arith.constant 2 : index
    %c0_289 = arith.constant 0 : index
    %289 = vector.load %arg11[%c2_288, %c0_289] : memref<54x16xf32, #tpu.memory_space<vmem>>, vector<50x16xf32>
    tpu.vector_store %arg11[%c2_288, %c0_289], %288 {strides = array<i32>} : memref<54x16xf32, #tpu.memory_space<vmem>>, vector<50x16xf32>,
    %c1_290 = arith.constant 1 : index
    %c0_291 = arith.constant 0 : index
    %290 = vector.load %arg11[%c1_290, %c0_291] : memref<54x16xf32, #tpu.memory_space<vmem>>, vector<50x16xf32>
    %c0_292 = arith.constant 0 : index
    %c0_293 = arith.constant 0 : index
    %291 = vector.load %arg12[%c0_292, %c0_293] : memref<50x48xf32, #tpu.memory_space<vmem>>, vector<50x16xf32>
    tpu.vector_store %arg12[%c0_292, %c0_293], %290 {strides = array<i32>} : memref<50x48xf32, #tpu.memory_space<vmem>>, vector<50x16xf32>,
    %c2_294 = arith.constant 2 : index
    %c0_295 = arith.constant 0 : index
    %292 = vector.load %arg11[%c2_294, %c0_295] : memref<54x16xf32, #tpu.memory_space<vmem>>, vector<50x16xf32>
    %c0_296 = arith.constant 0 : index
    %c16_297 = arith.constant 16 : index
    %293 = vector.load %arg12[%c0_296, %c16_297] : memref<50x48xf32, #tpu.memory_space<vmem>>, vector<50x16xf32>
    tpu.vector_store %arg12[%c0_296, %c16_297], %292 {strides = array<i32>} : memref<50x48xf32, #tpu.memory_space<vmem>>, vector<50x16xf32>,
    %c3_298 = arith.constant 3 : index
    %c0_299 = arith.constant 0 : index
    %294 = vector.load %arg11[%c3_298, %c0_299] : memref<54x16xf32, #tpu.memory_space<vmem>>, vector<50x16xf32>
    %c0_300 = arith.constant 0 : index
    %c32_301 = arith.constant 32 : index
    %295 = vector.load %arg12[%c0_300, %c32_301] : memref<50x48xf32, #tpu.memory_space<vmem>>, vector<50x16xf32>
    tpu.vector_store %arg12[%c0_300, %c32_301], %294 {strides = array<i32>} : memref<50x48xf32, #tpu.memory_space<vmem>>, vector<50x16xf32>,
    %c1_302 = arith.constant 1 : index
    %c0_303 = arith.constant 0 : index
    %c0_304 = arith.constant 0 : index
    %296 = vector.load %arg4[%c1_302, %c0_303, %c0_304] : memref<3x48x16xf32, #tpu.memory_space<vmem>>, vector<1x48x16xf32>
    %297 = vector.shape_cast %296 : vector<1x48x16xf32> to vector<48x16xf32>
    %c1_305 = arith.constant 1 : index
    %c0_306 = arith.constant 0 : index
    %c0_307 = arith.constant 0 : index
    %298 = vector.load %arg5[%c1_305, %c0_306, %c0_307] : memref<3x1x16xf32, #tpu.memory_space<vmem>>, vector<1x1x16xf32>
    %299 = vector.shape_cast %298 : vector<1x1x16xf32> to vector<1x16xf32>
    %c0_308 = arith.constant 0 : index
    %c0_309 = arith.constant 0 : index
    %300 = vector.load %arg12[%c0_308, %c0_309] : memref<50x48xf32, #tpu.memory_space<vmem>>, vector<50x48xf32>
    %cst_310 = arith.constant dense<0.000000e+00> : vector<50x16xf32>
    %301 = tpu.matmul %300, %297, %cst_310 {dimension_numbers = #tpu.dot_dimension_numbers<[1], [0], [0], [1], [0, 0, 1, 1], [], []>} : vector<50x48xf32>, vector<48x16xf32>, vector<50x16xf32> -> vector<50x16xf32>
    %302 = vector.broadcast %299 : vector<1x16xf32> to vector<50x16xf32>
    %303 = arith.addf %301, %302 : vector<50x16xf32>
    %c2_311 = arith.constant 2 : index
    %c0_312 = arith.constant 0 : index
    %304 = vector.load %arg11[%c2_311, %c0_312] : memref<54x16xf32, #tpu.memory_space<vmem>>, vector<50x16xf32>
    tpu.vector_store %arg11[%c2_311, %c0_312], %303 {strides = array<i32>} : memref<54x16xf32, #tpu.memory_space<vmem>>, vector<50x16xf32>,
    %c0_313 = arith.constant 0 : index
    %c0_314 = arith.constant 0 : index
    %305 = vector.load %arg11[%c0_313, %c0_314] : memref<54x16xf32, #tpu.memory_space<vmem>>, vector<50x16xf32>
    %c0_315 = arith.constant 0 : index
    %c0_316 = arith.constant 0 : index
    %306 = vector.load %arg12[%c0_315, %c0_316] : memref<50x48xf32, #tpu.memory_space<vmem>>, vector<50x16xf32>
    tpu.vector_store %arg12[%c0_315, %c0_316], %305 {strides = array<i32>} : memref<50x48xf32, #tpu.memory_space<vmem>>, vector<50x16xf32>,
    %c2_317 = arith.constant 2 : index
    %c0_318 = arith.constant 0 : index
    %307 = vector.load %arg11[%c2_317, %c0_318] : memref<54x16xf32, #tpu.memory_space<vmem>>, vector<50x16xf32>
    %c0_319 = arith.constant 0 : index
    %c16_320 = arith.constant 16 : index
    %308 = vector.load %arg12[%c0_319, %c16_320] : memref<50x48xf32, #tpu.memory_space<vmem>>, vector<50x16xf32>
    tpu.vector_store %arg12[%c0_319, %c16_320], %307 {strides = array<i32>} : memref<50x48xf32, #tpu.memory_space<vmem>>, vector<50x16xf32>,
    %c4_321 = arith.constant 4 : index
    %c0_322 = arith.constant 0 : index
    %309 = vector.load %arg11[%c4_321, %c0_322] : memref<54x16xf32, #tpu.memory_space<vmem>>, vector<50x16xf32>
    %c0_323 = arith.constant 0 : index
    %c32_324 = arith.constant 32 : index
    %310 = vector.load %arg12[%c0_323, %c32_324] : memref<50x48xf32, #tpu.memory_space<vmem>>, vector<50x16xf32>
    tpu.vector_store %arg12[%c0_323, %c32_324], %309 {strides = array<i32>} : memref<50x48xf32, #tpu.memory_space<vmem>>, vector<50x16xf32>,
    %c2_325 = arith.constant 2 : index
    %c0_326 = arith.constant 0 : index
    %c0_327 = arith.constant 0 : index
    %311 = vector.load %arg4[%c2_325, %c0_326, %c0_327] : memref<3x48x16xf32, #tpu.memory_space<vmem>>, vector<1x48x16xf32>
    %312 = vector.shape_cast %311 : vector<1x48x16xf32> to vector<48x16xf32>
    %c2_328 = arith.constant 2 : index
    %c0_329 = arith.constant 0 : index
    %c0_330 = arith.constant 0 : index
    %313 = vector.load %arg5[%c2_328, %c0_329, %c0_330] : memref<3x1x16xf32, #tpu.memory_space<vmem>>, vector<1x1x16xf32>
    %314 = vector.shape_cast %313 : vector<1x1x16xf32> to vector<1x16xf32>
    %c0_331 = arith.constant 0 : index
    %c0_332 = arith.constant 0 : index
    %315 = vector.load %arg12[%c0_331, %c0_332] : memref<50x48xf32, #tpu.memory_space<vmem>>, vector<50x48xf32>
    %cst_333 = arith.constant dense<0.000000e+00> : vector<50x16xf32>
    %316 = tpu.matmul %315, %312, %cst_333 {dimension_numbers = #tpu.dot_dimension_numbers<[1], [0], [0], [1], [0, 0, 1, 1], [], []>} : vector<50x48xf32>, vector<48x16xf32>, vector<50x16xf32> -> vector<50x16xf32>
    %317 = vector.broadcast %314 : vector<1x16xf32> to vector<50x16xf32>
    %318 = arith.addf %316, %317 : vector<50x16xf32>
    %c0_334 = arith.constant 0 : index
    %c0_335 = arith.constant 0 : index
    %c0_336 = arith.constant 0 : index
    %319 = vector.load %arg10[%c0_334, %c0_335, %c0_336] : memref<1x50x16xf32, #tpu.memory_space<vmem>>, vector<1x50x16xf32>
    %320 = vector.shape_cast %319 : vector<1x50x16xf32> to vector<50x16xf32>
    %321 = vector.shape_cast %318 : vector<50x16xf32> to vector<1x50x16xf32>
    tpu.vector_store %arg10[%c0_334, %c0_335, %c0_336], %321 {strides = array<i32>} : memref<1x50x16xf32, #tpu.memory_space<vmem>>, vector<1x50x16xf32>,
    return
  }
  func.func @transform_0(%arg0: i32) -> (i32, i32, i32) {
    %c0_i32 = arith.constant 0 : i32
    %c0_i32_0 = arith.constant 0 : i32
    %c0_i32_1 = arith.constant 0 : i32
    return %arg0, %c0_i32, %c0_i32_0 : i32, i32, i32
  }
  func.func @transform_1(%arg0: i32) -> (i32, i32) {
    %c0_i32 = arith.constant 0 : i32
    %c0_i32_0 = arith.constant 0 : i32
    %c0_i32_1 = arith.constant 0 : i32
    return %c0_i32, %c0_i32_0 : i32, i32
  }
  func.func @transform_2(%arg0: i32) -> (i32, i32) {
    %c0_i32 = arith.constant 0 : i32
    %c0_i32_0 = arith.constant 0 : i32
    %c0_i32_1 = arith.constant 0 : i32
    return %c0_i32, %c0_i32_0 : i32, i32
  }
  func.func @transform_3(%arg0: i32) -> (i32, i32, i32) {
    %c0_i32 = arith.constant 0 : i32
    %c0_i32_0 = arith.constant 0 : i32
    %c0_i32_1 = arith.constant 0 : i32
    %c0_i32_2 = arith.constant 0 : i32
    return %c0_i32, %c0_i32_0, %c0_i32_1 : i32, i32, i32
  }
  func.func @transform_4(%arg0: i32) -> (i32, i32, i32) {
    %c0_i32 = arith.constant 0 : i32
    %c0_i32_0 = arith.constant 0 : i32
    %c0_i32_1 = arith.constant 0 : i32
    %c0_i32_2 = arith.constant 0 : i32
    return %c0_i32, %c0_i32_0, %c0_i32_1 : i32, i32, i32
  }
  func.func @transform_5(%arg0: i32) -> (i32, i32) {
    %c0_i32 = arith.constant 0 : i32
    %c0_i32_0 = arith.constant 0 : i32
    %c0_i32_1 = arith.constant 0 : i32
    return %c0_i32, %c0_i32_0 : i32, i32
  }
  func.func @transform_6(%arg0: i32) -> (i32, i32) {
    %c0_i32 = arith.constant 0 : i32
    %c0_i32_0 = arith.constant 0 : i32
    %c0_i32_1 = arith.constant 0 : i32
    return %c0_i32, %c0_i32_0 : i32, i32
  }
  func.func @transform_7(%arg0: i32) -> (i32, i32) {
    %c0_i32 = arith.constant 0 : i32
    %c0_i32_0 = arith.constant 0 : i32
    %c0_i32_1 = arith.constant 0 : i32
    return %c0_i32, %c0_i32_0 : i32, i32
  }
  func.func @transform_8(%arg0: i32) -> (i32, i32) {
    %c0_i32 = arith.constant 0 : i32
    %c0_i32_0 = arith.constant 0 : i32
    %c0_i32_1 = arith.constant 0 : i32
    return %c0_i32, %c0_i32_0 : i32, i32
  }
  func.func @transform_9(%arg0: i32) -> (i32, i32, i32) {
    %c0_i32 = arith.constant 0 : i32
    %c0_i32_0 = arith.constant 0 : i32
    %c0_i32_1 = arith.constant 0 : i32
    return %arg0, %c0_i32, %c0_i32_0 : i32, i32, i32
  }
}

</mosaic_0001>

<bundles_post_ra>
// kernel: tpu_custom_call.1
= control target key start
LH: loop header
LB: loop body
LE: loop exit
PB: predicated region body
PF: predicated region fallthrough
CT: control target
= control target key end

     0   :  { %s5367_s30 = smov 0   ;;  %s6775_s0 = inlined_call_operand.vmem [shape: f32[2,50,32], index: 0, kind: input, shape index: {}]   ;;  %s6776_s1 = inlined_call_operand.vmem [shape: f32[32,16], index: 1, kind: input, shape index: {}]   ;;  %s6777_s2 = inlined_call_operand.vmem [shape: f32[1,16], index: 2, kind: input, shape index: {}]   ;;  %s6778_s3 = inlined_call_operand.vmem [shape: f32[3,48,16], index: 3, kind: input, shape index: {}]   ;;  %s6779_s4 = inlined_call_operand.vmem [shape: f32[3,1,16], index: 4, kind: input, shape index: {}]   ;;  %s6780_s5 = inlined_call_operand.vmem [shape: f32[50,1], index: 5, kind: input, shape index: {}]   ;;  %s6781_s6 = inlined_call_operand.vmem [shape: f32[50,1], index: 6, kind: input, shape index: {}]   ;;  %s6782_s7 = inlined_call_operand.vmem [shape: f32[50,1], index: 7, kind: input, shape index: {}]   ;;  %s6783_s8 = inlined_call_operand.vmem [shape: f32[50,1], index: 8, kind: input, shape index: {}]   ;;  %s6784_s9 = inlined_call_operand.vmem [shape: f32[2,50,16], index: 9, kind: output, shape index: {}]  }
   0x1 LB: > { %s4387_s10 = sadd.s32 4294967295, %s5309_s30   ;;  %p4391_p0 = scmp.ge.s32.totalorder %s5309_s30, 1  ;;  %s5309_s30 = sphi %s5367_s30, %s19_s30  }
   0x2   : > { %p287_p1 = scmp.lt.s32.totalorder %s5309_s30, 3 }
   0x4   : > { %p288_p2 = pnand %p4391_p0, %p287_p1 }
   0x5   : > { %v349_v0 = vld [vmem:[%s6776_s1] sm:$0xff] (!%p288_p2)  ;;  %v350_v1 = vld [vmem:[%s6776_s1 + $0x8] sm:$0xff] (!%p288_p2)  ;;  %v351_v2 = vld [vmem:[%s6776_s1 + $0x10] sm:$0xff] (!%p288_p2)  ;;  %v5311_v3 = vmov (!%p288_p2), 0.0|0.0   ;;  %vm5312_vm0 = vmmov (!%p288_p2), 0   ;;  %v5313_v6 = vmov (!%p288_p2), 0.0  }
   0x6   : > { %291 = sbr.rel (%p288_p2) target bundleno = 4980 (0x1374), region = 56  ;;  %5148 = vmatprep.subr.bf16.mxu0 (!%p288_p2), %v5311_v3  ;;  %v5149_v4 = vpack.c.bf16 (!%p288_p2), %v350_v1, %v349_v0  ;;  %v352_v5 = vld [vmem:[%s6776_s1 + $0x18] sm:$0xff] (!%p288_p2)  ;;  %4731 = vmatprep.mubr.msk.f32.mxu0 (!%p288_p2), %vm5312_vm0, %v5313_v6  ;;  %p323_p3 = scmp.lt.s32.totalorder (!%p288_p2), %s4387_s10, 1  ;;  %vm333_vm1 = vcmask (!%p288_p2), 130048   ;;  %vm360_vm2 = vcmask (!%p288_p2), 261120   ;;  %vm340_vm3 = vcmask (!%p288_p2), 128000  }
   0x7   : > { %5262 = vmatprep.subr.bf16.mxu1 (!%p288_p2), %v5311_v3  ;;  %4740 = vmatprep.mubr.msk.f32.mxu1 (!%p288_p2), %vm5312_vm0, %v5313_v6  ;;  %334 = vst.msk [vmem:[#allocation2] sm:$0xff] (!%p288_p2), %vm333_vm1, %v5313_v6  ;;  %335 = vst.msk [vmem:[#allocation2 + $0x8] sm:$0xff] (!%p288_p2), %vm333_vm1, %v5313_v6  ;;  %v5152_v7 = vpack.c.bf16 (!%p288_p2), %v352_v5, %v351_v2  ;;  %v592_v15 = vld [vmem:[%s6778_s3] sm:$0xff] (!%p288_p2)  ;;  %v593_v16 = vld [vmem:[%s6778_s3 + $0x8] sm:$0xff] (!%p288_p2)  ;;  %s5314_s18 = smov (!%p288_p2), 16   ;;  %vm488_vm4 = vcmask (!%p288_p2), 123904  }
   0x8   : > { %336 = vst.msk [vmem:[#allocation2 + $0x10] sm:$0xff] (!%p288_p2), %vm333_vm1, %v5313_v6  ;;  %337 = vst.msk [vmem:[#allocation2 + $0x18] sm:$0xff] (!%p288_p2), %vm333_vm1, %v5313_v6  ;;  %5150 = vmatpush3.bf16.msra.mxu0 (!%p288_p2), %v5149_v4  ;;  %5264 = vmatpush3.bf16.msra.mxu1 (!%p288_p2), %v5149_v4  ;;  %v5155_v17 = vpack.c.bf16 (!%p288_p2), %v593_v16, %v592_v15  ;;  %v4394_v18 = vld [vmem:[%s6777_s2] ss:$0 sm:$0xff] (!%p288_p2)  ;;  %v594_v19 = vld [vmem:[%s6778_s3 + $0x10] sm:$0xff] (!%p288_p2)  ;;  %s5315_s20 = smov (!%p288_p2), 32  }
   0x9   : > { %338 = vst.msk [vmem:[#allocation2 + $0x20] sm:$0xff] (!%p288_p2), %vm333_vm1, %v5313_v6  ;;  %339 = vst.msk [vmem:[#allocation2 + $0x28] sm:$0xff] (!%p288_p2), %vm333_vm1, %v5313_v6  ;;  %5151 = vmatprep.subr.bf16.mxu0 (!%p288_p2), %v5311_v3  ;;  %5263 = vmatprep.subr.bf16.mxu1 (!%p288_p2), %v5311_v3  ;;  %v595_v20 = vld [vmem:[%s6778_s3 + $0x18] sm:$0xff] (!%p288_p2)  ;;  %v596_v28 = vld [vmem:[%s6778_s3 + $0x20] sm:$0xff] (!%p288_p2)  ;;  %v5316_v2 = vmov (!%p288_p2), 0   ;;  %vm539_vm5 = vcmask (!%p288_p2), 261248  }
   0xa   : > { %341 = vst.msk [vmem:[#allocation2 + $0x30] sm:$0x3f] (!%p288_p2), %vm340_vm3, %v5313_v6  ;;  %v5158_v21 = vpack.c.bf16 (!%p288_p2), %v595_v20, %v594_v19  ;;  %v597_v29 = vld [vmem:[%s6778_s3 + $0x28] sm:$0xff] (!%p288_p2)  ;;  %5281 = vset.pattern.permute.xlu0 (!%p288_p2), %v5316_v2  ;;  %5282 = vset.pattern.permute.xlu1 (!%p288_p2), %v5316_v2  ;;  %v741_v4 = vld [vmem:[%s6780_s5] sm:$0xff] (!%p288_p2)  ;;  %v747_v19 = vld [vmem:[%s6780_s5 + $0x30] sm:$0x3] (!%p288_p2) }
   0xb   : > { %v5161_v32 = vpack.c.bf16 (!%p288_p2), %v597_v29, %v596_v28  ;;  %v745_v15 = vld [vmem:[%s6780_s5 + $0x20] sm:$0xff] (!%p288_p2)  ;;  %v753_v16 = vld [vmem:[%s6781_s6 + $0x28] sm:$0xff] (!%p288_p2)  ;;  %vm583_vm6 = vcmask (!%p288_p2), 392448   ;;  %vm612_vm7 = vcmask (!%p288_p2), 392192   ;;  %vm546_vm8 = vcmask (!%p288_p2), 255104  }
   0xc   : > { %5153 = vmatpush3.bf16.msra.mxu0 (!%p288_p2), %v5152_v7  ;;  %5265 = vmatpush3.bf16.msra.mxu1 (!%p288_p2), %v5152_v7  ;;  %v742_v7 = vld [vmem:[%s6780_s5 + $0x8] sm:$0xff] (!%p288_p2)  ;;  %vm590_vm9 = vcmask (!%p288_p2), 386304  }
   0xd   : > { %s6786_s10 = smov (!%p323_p3, %s4387_s10), 1  ;;  %5154 = vmatprep.subr.bf16.mxu1 %v5311_v3  ;;  %5163 = vmatprep.subr.bf16.mxu0 %v5311_v3 }
   0xe   : > { %s5266_s19 = smul.u32 56, %s6786_s10 }
  0x10   : > { %s327_s22 = scalar_lea.vmem %s6775_s0, %s5266_s19  ;;  %s332_s29 = scalar_lea.vmem %s6784_s9, %s5266_s19 }
  0x11   : > { %v342_v8 = vld [vmem:[%s327_s22] sm:$0xff]  ;;  %v345_v9 = vld [vmem:[%s327_s22 + $0x18] sm:$0xff]  ;;  %v343_v10 = vld [vmem:[%s327_s22 + $0x8] sm:$0xff] }
  0x12   : > { %4732 = vmatmul.mubr.msk.f32.vlgmr.msra.gmra.mrb[0].mxu0 %vm360_vm2, %v342_v8  ;;  %4741 = vmatmul.mubr.msk.f32.vlgmr.msra.gmra.mrb[0].mxu1 %vm360_vm2, %v345_v9  ;;  %v346_v11 = vld [vmem:[%s327_s22 + $0x20] sm:$0xff]  ;;  %v344_v12 = vld [vmem:[%s327_s22 + $0x10] sm:$0xff]  ;;  %v347_v13 = vld [vmem:[%s327_s22 + $0x28] sm:$0xff] }
  0x13   : > { %4734 = vmatprep.mubr.msk.f32.mxu0 %vm5312_vm0, %v5313_v6  ;;  %4743 = vmatprep.mubr.msk.f32.mxu1 %vm5312_vm0, %v5313_v6  ;;  %v348_v14 = vld [vmem:[%s327_s22 + $0x30] sm:$0x3]  ;;  %v749_v8 = vld [vmem:[%s6781_s6 + $0x8] sm:$0xff]  ;;  %v748_v9 = vld [vmem:[%s6781_s6] sm:$0xff] }
  0x14   : > { %5156 = vmatpush3.bf16.msra.mxu1 %v5155_v17  ;;  %v746_v17 = vld [vmem:[%s6780_s5 + $0x28] sm:$0xff] }
  0x15   : > { %5157 = vmatprep.subr.bf16.mxu1 %v5311_v3 }
  0x16   : > { %4735 = vmatmul.mubr.msk.f32.gmra.mrb[2].mxu0 %vm360_vm2, %v343_v10  ;;  %4744 = vmatmul.mubr.msk.f32.gmra.mrb[2].mxu1 %vm360_vm2, %v346_v11  ;;  %v750_v10 = vld [vmem:[%s6781_s6 + $0x10] sm:$0xff] }
  0x17   : > { %4737 = vmatprep.mubr.msk.f32.mxu0 %vm5312_vm0, %v5313_v6  ;;  %4746 = vmatprep.mubr.msk.f32.mxu1 %vm5312_vm0, %v5313_v6  ;;  %v743_v11 = vld [vmem:[%s6780_s5 + $0x10] sm:$0xff] }
  0x18   : > { %5159 = vmatpush3.bf16.msra.mxu1 %v5158_v21 }
  0x19   : > { %5160 = vmatprep.subr.bf16.mxu1 %v5311_v3 }
  0x1a   : > { %4738 = vmatmul.mubr.msk.f32.gmra.mrb[4].mxu0 %vm360_vm2, %v344_v12  ;;  %4747 = vmatmul.mubr.msk.f32.gmra.mrb[4].mxu1 %vm360_vm2, %v347_v13  ;;  %v751_v12 = vld [vmem:[%s6781_s6 + $0x18] sm:$0xff] }
  0x1b   : > { %4749 = vmatprep.mubr.msk.f32.mxu1 %vm5312_vm0, %v5313_v6  ;;  %4797 = vmatprep.mubr.msk.f32.mxu0 %vm5312_vm0, %v5313_v6  ;;  %v744_v13 = vld [vmem:[%s6780_s5 + $0x18] sm:$0xff] }
  0x1c   : > { %5162 = vmatpush3.bf16.msra.mxu1 %v5161_v32 }
  0x1d   : > { %5172 = vmatprep.subr.bf16.mxu1 %v5311_v3 }
  0x1e   : > { %4750 = vmatmul.mubr.msk.f32.gmra.mrb[6].mxu1 %vm360_vm2, %v348_v14  ;;  %v752_v14 = vld [vmem:[%s6781_s6 + $0x20] sm:$0xff] }
  0x1f   : > { %4764 = vmatprep.mubr.msk.f32.mxu1 %vm5312_vm0, %v5313_v6 }
  0xe5   : > { %v448_v22 = vpop.f32.mrb[0].mxu0  ;;  %v463_v23 = vpop.f32.mrb[0].mxu1 }
  0xe6   : > { %v449_v24 = vadd.f32 %v4394_v18, %v448_v22  ;;  %v4733_v25 = vpop.f32.mrb[1].mxu0  ;;  %v464_v26 = vadd.f32 %v4394_v18, %v463_v23  ;;  %v4742_v27 = vpop.f32.mrb[1].mxu1 }
  0xe8   : > { %482 = vst.msk [vmem:[#allocation2 + $0x2] sm:$0xff] %vm333_vm1, %v449_v24  ;;  %485 = vst.msk [vmem:[#allocation2 + $0x1a] sm:$0xff] %vm333_vm1, %v464_v26 }
  0xe9   : > { %v453_v30 = vpop.f32.mrb[2].mxu0  ;;  %v468_v31 = vpop.f32.mrb[2].mxu1 }
  0xea   : > { %v454_v33 = vadd.f32 %v4394_v18, %v453_v30  ;;  %v4736_v34 = vpop.f32.mrb[3].mxu0  ;;  %v469_v35 = vadd.f32 %v4394_v18, %v468_v31  ;;  %v4745_v36 = vpop.f32.mrb[3].mxu1 }
  0xec   : > { %483 = vst.msk [vmem:[#allocation2 + $0xa] sm:$0xff] %vm333_vm1, %v454_v33  ;;  %486 = vst.msk [vmem:[#allocation2 + $0x22] sm:$0xff] %vm333_vm1, %v469_v35 }
  0xed   : > { %v458_v37 = vpop.f32.mrb[4].mxu0  ;;  %v473_v38 = vpop.f32.mrb[4].mxu1 }
  0xee   : > { %v459_v39 = vadd.f32 %v4394_v18, %v458_v37  ;;  %v4739_v40 = vpop.f32.mrb[5].mxu0  ;;  %v474_v41 = vadd.f32 %v4394_v18, %v473_v38  ;;  %v4748_v42 = vpop.f32.mrb[5].mxu1 }
  0xef   : > { %v504_v43 = vld [vmem:[#allocation2 + $0x2] sm:$0xff]  ;;  %v507_v58 = vld [vmem:[#allocation2 + $0x1a] sm:$0xff] }
  0xf0   : > { %v490_v44 = vld [vmem:[#allocation2 + $0x1] sm:$0xff]  ;;  %484 = vst.msk [vmem:[#allocation2 + $0x12] sm:$0xff] %vm333_vm1, %v459_v39  ;;  %518 = vrot.lane.b32.xlu0 %v504_v43, %s5314_s18  ;;  %487 = vst.msk [vmem:[#allocation2 + $0x2a] sm:$0xff] %vm333_vm1, %v474_v41  ;;  %v4402_v41 = vld [vmem:[%s6779_s4] ss:$0 sm:$0xff] }
  0xf1   : > { %497 = vst.msk [vmem:[#allocation3] sm:$0xff] %vm333_vm1, %v490_v44  ;;  %v478_v45 = vpop.f32.mrb[6].mxu1 }
  0xf2   : > { %v479_v46 = vadd.f32 %v4394_v18, %v478_v45  ;;  %v4751_v47 = vpop.f32.mrb[7].mxu1  ;;  %v754_v18 = vld [vmem:[%s6781_s6 + $0x30] sm:$0x3] }
  0xf3   : > { %v491_v48 = vld [vmem:[#allocation2 + $0x9] sm:$0xff]  ;;  %v494_v50 = vld [vmem:[#allocation2 + $0x21] sm:$0xff] }
  0xf4   : > { %v548_v49 = vld [vmem:[#allocation2 + $0x3] sm:$0xff]  ;;  %498 = vst.msk [vmem:[#allocation3 + $0x8] sm:$0xff] %vm333_vm1, %v491_v48  ;;  %501 = vst.msk [vmem:[#allocation3 + $0x20] sm:$0xff] %vm333_vm1, %v494_v50  ;;  %v551_v61 = vld [vmem:[#allocation2 + $0x1b] sm:$0xff] }
  0xf5   : > { %562 = vrot.lane.b32.xlu0 %v548_v49, %s5315_s20  ;;  %v505_v51 = vld [vmem:[#allocation2 + $0xa] sm:$0xff]  ;;  %489 = vst.msk [vmem:[#allocation2 + $0x32] sm:$0x3] %vm488_vm4, %v479_v46  ;;  %v508_v60 = vld [vmem:[#allocation2 + $0x22] sm:$0xff] }
  0xf6   : > { %520 = vrot.lane.b32.xlu1 %v505_v51, %s5314_s18 }
  0xf7   : > { %v492_v52 = vld [vmem:[#allocation2 + $0x11] sm:$0xff]  ;;  %v493_v54 = vld [vmem:[#allocation2 + $0x19] sm:$0xff]  ;;  %v495_v55 = vld [vmem:[#allocation2 + $0x29] sm:$0xff] }
  0xf8   : > { %v549_v53 = vld [vmem:[#allocation2 + $0xb] sm:$0xff]  ;;  %499 = vst.msk [vmem:[#allocation3 + $0x10] sm:$0xff] %vm333_vm1, %v492_v52  ;;  %500 = vst.msk [vmem:[#allocation3 + $0x18] sm:$0xff] %vm333_vm1, %v493_v54  ;;  %v550_v59 = vld [vmem:[#allocation2 + $0x13] sm:$0xff] }
  0xf9   : > { %502 = vst.msk [vmem:[#allocation3 + $0x28] sm:$0xff] %vm333_vm1, %v495_v55  ;;  %v506_v56 = vld [vmem:[#allocation2 + $0x12] sm:$0xff]  ;;  %v509_v62 = vld [vmem:[#allocation2 + $0x2a] sm:$0xff] }
  0xfa   : > { %564 = vrot.lane.b32.xlu1 %v549_v53, %s5315_s20  ;;  %522 = vrot.lane.b32.xlu0 %v506_v56, %s5314_s18  ;;  %v552_v63 = vld [vmem:[#allocation2 + $0x23] sm:$0xff] }
  0xfc   : > { %v496_v57 = vld [vmem:[#allocation2 + $0x31] sm:$0x3]  ;;  %v554_v5 = vld [vmem:[#allocation2 + $0x33] sm:$0x3] }
  0xfd   : > { %503 = vst.msk [vmem:[#allocation3 + $0x30] sm:$0x3] %vm488_vm4, %v496_v57  ;;  %v510_v0 = vld [vmem:[#allocation2 + $0x32] sm:$0x3] }
  0xfe   : > { %566 = vrot.lane.b32.xlu1 %v550_v59, %s5315_s20  ;;  %524 = vrot.lane.b32.xlu0 %v507_v58, %s5314_s18  ;;  %v553_v1 = vld [vmem:[#allocation2 + $0x2b] sm:$0xff] }
 0x102   : > { %568 = vrot.lane.b32.xlu1 %v551_v61, %s5315_s20  ;;  %526 = vrot.lane.b32.xlu0 %v508_v60, %s5314_s18 }
 0x106   : > { %570 = vrot.lane.b32.xlu1 %v552_v63, %s5315_s20  ;;  %528 = vrot.lane.b32.xlu0 %v509_v62, %s5314_s18 }
 0x10a   : > { %572 = vrot.lane.b32.xlu1 %v553_v1, %s5315_s20  ;;  %530 = vrot.lane.b32.xlu0 %v510_v0, %s5314_s18 }
 0x10e   : > { %574 = vrot.lane.b32.xlu1 %v554_v5, %s5315_s20  ;;  %829 = vperm.xlu0 %5281, %v741_v4  }
 0x112   : > { %834 = vperm.xlu1 %5282, %v742_v7   ;;  %876 = vperm.xlu0 %5281, %v749_v8   ;;  %v4410_v7 = vld [vmem:[%s6778_s3 + $0x30] sm:$0xff]  ;;  %v4411_v8 = vld [vmem:[%s6778_s3 + $0x38] sm:$0xff] }
 0x116   : > { %871 = vperm.xlu1 %5282, %v748_v9   ;;  %881 = vperm.xlu0 %5281, %v750_v10   ;;  %v5164_v10 = vpack.c.bf16 %v4411_v8, %v4410_v7 }
 0x118   : > { %5165 = vmatpush3.bf16.msra.mxu0 %v5164_v10 }
 0x119   : > { %5166 = vmatprep.subr.bf16.mxu0 %v5311_v3 }
 0x11a   : > { %839 = vperm.xlu1 %5282, %v743_v11   ;;  %886 = vperm.xlu0 %5281, %v751_v12  }
 0x11e   : > { %844 = vperm.xlu1 %5282, %v744_v13   ;;  %891 = vperm.xlu0 %5281, %v752_v14  }
 0x122   : > { %849 = vperm.xlu1 %5282, %v745_v15   ;;  %896 = vperm.xlu0 %5281, %v753_v16  }
 0x126   : > { %854 = vperm.xlu1 %5282, %v746_v17   ;;  %901 = vperm.xlu0 %5281, %v754_v18  }
 0x12a   : > { %859 = vperm.xlu1 %5282, %v747_v19  }
 0x162   : > { %v519_v20 = vpop.permute.xlu0 %518 }
 0x163   : > { %540 = vst.msk [vmem:[#allocation3] sm:$0xff] %vm539_vm5, %v519_v20 }
 0x167   : > { %v563_v21 = vpop.permute.xlu0 %562 }
 0x168   : > { %584 = vst.msk [vmem:[#allocation3] sm:$0xff] %vm583_vm6, %v563_v21  ;;  %v521_v22 = vpop.permute.xlu1 %520 }
 0x169   : > { %541 = vst.msk [vmem:[#allocation3 + $0x8] sm:$0xff] %vm539_vm5, %v521_v22 }
 0x16c   : > { %v565_v23 = vpop.permute.xlu1 %564  ;;  %v523_v24 = vpop.permute.xlu0 %522 }
 0x16d   : > { %585 = vst.msk [vmem:[#allocation3 + $0x8] sm:$0xff] %vm583_vm6, %v565_v23 }
 0x16e   : > { %542 = vst.msk [vmem:[#allocation3 + $0x10] sm:$0xff] %vm539_vm5, %v523_v24 }
 0x16f   : > { %v599_v25 = vld [vmem:[#allocation3] sm:$0xff] }
 0x170   : > { %v567_v26 = vpop.permute.xlu1 %566  ;;  %4765 = vmatmul.mubr.msk.f32.vlgmr.msra.gmra.mrb[8].mxu1 %vm612_vm7, %v599_v25  ;;  %v525_v27 = vpop.permute.xlu0 %524 }
 0x171   : > { %586 = vst.msk [vmem:[#allocation3 + $0x10] sm:$0xff] %vm583_vm6, %v567_v26  ;;  %4767 = vmatprep.mubr.msk.f32.mxu1 %vm5312_vm0, %v5313_v6 }
 0x172   : > { %543 = vst.msk [vmem:[#allocation3 + $0x18] sm:$0xff] %vm539_vm5, %v525_v27 }
 0x174   : > { %v569_v28 = vpop.permute.xlu1 %568  ;;  %v600_v29 = vld [vmem:[#allocation3 + $0x8] sm:$0xff]  ;;  %v527_v30 = vpop.permute.xlu0 %526 }
 0x175   : > { %587 = vst.msk [vmem:[#allocation3 + $0x18] sm:$0xff] %vm583_vm6, %v569_v28  ;;  %4768 = vmatmul.mubr.msk.f32.gmra.mrb[10].mxu1 %vm612_vm7, %v600_v29 }
 0x176   : > { %544 = vst.msk [vmem:[#allocation3 + $0x20] sm:$0xff] %vm539_vm5, %v527_v30  ;;  %4770 = vmatprep.mubr.msk.f32.mxu1 %vm5312_vm0, %v5313_v6 }
 0x178   : > { %v571_v31 = vpop.permute.xlu1 %570  ;;  %v601_v32 = vld [vmem:[#allocation3 + $0x10] sm:$0xff]  ;;  %v529_v33 = vpop.permute.xlu0 %528 }
 0x179   : > { %588 = vst.msk [vmem:[#allocation3 + $0x20] sm:$0xff] %vm583_vm6, %v571_v31  ;;  %4771 = vmatmul.mubr.msk.f32.gmra.mrb[12].mxu1 %vm612_vm7, %v601_v32 }
 0x17a   : > { %545 = vst.msk [vmem:[#allocation3 + $0x28] sm:$0xff] %vm539_vm5, %v529_v33  ;;  %4773 = vmatprep.mubr.msk.f32.mxu1 %vm5312_vm0, %v5313_v6 }
 0x17c   : > { %v573_v34 = vpop.permute.xlu1 %572  ;;  %v602_v35 = vld [vmem:[#allocation3 + $0x18] sm:$0xff]  ;;  %v531_v36 = vpop.permute.xlu0 %530 }
 0x17d   : > { %589 = vst.msk [vmem:[#allocation3 + $0x28] sm:$0xff] %vm583_vm6, %v573_v34  ;;  %4774 = vmatmul.mubr.msk.f32.gmra.mrb[14].mxu1 %vm612_vm7, %v602_v35 }
 0x17e   : > { %547 = vst.msk [vmem:[#allocation3 + $0x30] sm:$0x3] %vm546_vm8, %v531_v36  ;;  %4776 = vmatprep.mubr.msk.f32.mxu1 %vm5312_vm0, %v5313_v6 }
 0x180   : > { %v575_v37 = vpop.permute.xlu1 %574  ;;  %v603_v38 = vld [vmem:[#allocation3 + $0x20] sm:$0xff] }
 0x181   : > { %591 = vst.msk [vmem:[#allocation3 + $0x30] sm:$0x3] %vm590_vm9, %v575_v37  ;;  %4777 = vmatmul.mubr.msk.f32.gmra.mrb[16].mxu1 %vm612_vm7, %v603_v38 }
 0x182   : > { %4779 = vmatprep.mubr.msk.f32.mxu1 %vm5312_vm0, %v5313_v6 }
 0x184   : > { %v604_v39 = vld [vmem:[#allocation3 + $0x28] sm:$0xff] }
 0x185   : > { %4780 = vmatmul.mubr.msk.f32.gmra.mrb[18].mxu1 %vm612_vm7, %v604_v39 }
 0x186   : > { %4782 = vmatprep.mubr.msk.f32.mxu1 %vm5312_vm0, %v5313_v6 }
 0x188   : > { %v605_v40 = vld [vmem:[#allocation3 + $0x30] sm:$0x3] }
 0x189   : > { %4783 = vmatmul.mubr.msk.f32.gmra.mrb[20].mxu1 %vm612_vm7, %v605_v40 }
 0x18a   : > { %4830 = vmatprep.mubr.msk.f32.mxu1 %vm5312_vm0, %v5313_v6 }
 0x243   : > { %v700_v42 = vpop.f32.mrb[8].mxu1 }
 0x244   : > { %v4766_v43 = vpop.f32.mrb[9].mxu1  ;;  %v701_v44 = vadd.f32 %v4402_v41, %v700_v42 }
 0x246   : > { %v734_v46 = vmax.f32 %v701_v44, 0.0 }
 0x248   : > { %v705_v45 = vpop.f32.mrb[10].mxu1  ;;  %v755_v51 = vsel %vm333_vm1, %v734_v46, 0.0 }
 0x249   : > { %v706_v47 = vadd.f32 %v4402_v41, %v705_v45  ;;  %v4769_v48 = vpop.f32.mrb[11].mxu1 }
 0x24b   : > { %v735_v49 = vmax.f32 %v706_v47, 0.0 }
 0x24c   : > { %v710_v50 = vpop.f32.mrb[12].mxu1 }
 0x24d   : > { %v756_v52 = vsel %vm333_vm1, %v735_v49, 0.0  ;;  %v711_v53 = vadd.f32 %v4402_v41, %v710_v50  ;;  %v4772_v54 = vpop.f32.mrb[13].mxu1 }
 0x24e   : > { %v757_v55 = vadd.f32 %v756_v52, %v755_v51 }
 0x24f   : > { %v736_v56 = vmax.f32 %v711_v53, 0.0 }
 0x250   : > { %v715_v57 = vpop.f32.mrb[14].mxu1 }
 0x251   : > { %v758_v58 = vsel %vm333_vm1, %v736_v56, 0.0  ;;  %v716_v59 = vadd.f32 %v4402_v41, %v715_v57  ;;  %v4775_v60 = vpop.f32.mrb[15].mxu1 }
 0x252   : > { %v759_v61 = vadd.f32 %v758_v58, %v757_v55 }
 0x253   : > { %v737_v62 = vmax.f32 %v716_v59, 0.0 }
 0x254   : > { %v720_v63 = vpop.f32.mrb[16].mxu1 }
 0x255   : > { %v760_v0 = vsel %vm333_vm1, %v737_v62, 0.0  ;;  %v721_v1 = vadd.f32 %v4402_v41, %v720_v63  ;;  %v4778_v2 = vpop.f32.mrb[17].mxu1  ;;  %v835_v63 = vpop.permute.xlu1 %834 }
 0x256   : > { %v761_v4 = vadd.f32 %v760_v0, %v759_v61 }
 0x257   : > { %v738_v5 = vmax.f32 %v721_v1, 0.0  ;;  %v830_v1 = vpop.permute.xlu0 %829 }
 0x258   : > { %v725_v9 = vpop.f32.mrb[18].mxu1 }
 0x259   : > { %v762_v11 = vsel %vm333_vm1, %v738_v5, 0.0  ;;  %v726_v12 = vadd.f32 %v4402_v41, %v725_v9  ;;  %v4781_v13 = vpop.f32.mrb[19].mxu1 }
 0x25a   : > { %v763_v14 = vadd.f32 %v762_v11, %v761_v4  ;;  %v872_v4 = vpop.permute.xlu1 %871 }
 0x25b   : > { %v739_v15 = vmax.f32 %v726_v12, 0.0 }
 0x25c   : > { %v730_v16 = vpop.f32.mrb[20].mxu1 }
 0x25d   : > { %v764_v17 = vsel %vm333_vm1, %v739_v15, 0.0  ;;  %v731_v18 = vadd.f32 %v4402_v41, %v730_v16  ;;  %v4784_v19 = vpop.f32.mrb[21].mxu1 }
 0x25e   : > { %v765_v20 = vadd.f32 %v764_v17, %v763_v14  ;;  %v840_v7 = vpop.permute.xlu1 %839 }
 0x25f   : > { %v740_v21 = vmax.f32 %v731_v18, 0.0 }
 0x261   : > { %v766_v22 = vsel %vm488_vm4, %v740_v21, 0.0 }
 0x262   : > { %v767_v23 = vadd.f32 %v766_v22, %v765_v20  ;;  %v845_v12 = vpop.permute.xlu1 %844 }
 0x264   : > { %v768_v24 = vrot.slane %v767_v23, 4 }
 0x266   : > { %v769_v25 = vadd.f32 %v768_v24, %v767_v23  ;;  %v850_v17 = vpop.permute.xlu1 %849 }
 0x268   : > { %v770_v26 = vrot.slane %v769_v25, 2 }
 0x26a   : > { %v771_v27 = vadd.f32 %v770_v26, %v769_v25  ;;  %v855_v19 = vpop.permute.xlu1 %854 }
 0x26c   : > { %v772_v28 = vrot.slane %v771_v27, 1 }
 0x26e   : > { %v773_v29 = vadd.f32 %v772_v28, %v771_v27 }
 0x270   : > { %v775_v30 = vmul.f32 0.02, %v773_v29 }
 0x272   : > { %v776_v31 = vsub.f32 %v734_v46, %v775_v30  ;;  %v777_v32 = vsub.f32 %v735_v49, %v775_v30  ;;  %v778_v33 = vsub.f32 %v736_v56, %v775_v30  ;;  %v779_v34 = vsub.f32 %v737_v62, %v775_v30 }
 0x273   : > { %v780_v35 = vsub.f32 %v738_v5, %v775_v30  ;;  %v781_v36 = vsub.f32 %v739_v15, %v775_v30  ;;  %v782_v37 = vsub.f32 %v740_v21, %v775_v30  ;;  %v877_v5 = vpop.permute.xlu0 %876 }
 0x274   : > { %v783_v38 = vmul.f32 %v776_v31, %v776_v31  ;;  %v784_v39 = vmul.f32 %v777_v32, %v777_v32  ;;  %v785_v40 = vmul.f32 %v778_v33, %v778_v33  ;;  %v786_v41 = vmul.f32 %v779_v34, %v779_v34 }
 0x275   : > { %v787_v45 = vmul.f32 %v780_v35, %v780_v35  ;;  %v788_v46 = vmul.f32 %v781_v36, %v781_v36  ;;  %v789_v51 = vmul.f32 %v782_v37, %v782_v37 }
 0x276   : > { %v790_v42 = vsel %vm333_vm1, %v783_v38, 0.0  ;;  %v791_v43 = vsel %vm333_vm1, %v784_v39, 0.0  ;;  %v793_v47 = vsel %vm333_vm1, %v785_v40, 0.0  ;;  %v795_v49 = vsel %vm333_vm1, %v786_v41, 0.0  ;;  %v860_v40 = vpop.permute.xlu1 %859 }
 0x277   : > { %v792_v44 = vadd.f32 %v791_v43, %v790_v42  ;;  %v797_v52 = vsel %vm333_vm1, %v787_v45, 0.0  ;;  %v799_v54 = vsel %vm333_vm1, %v788_v46, 0.0  ;;  %v801_v56 = vsel %vm488_vm4, %v789_v51, 0.0  ;;  %v882_v8 = vpop.permute.xlu0 %881 }
 0x279   : > { %v794_v48 = vadd.f32 %v793_v47, %v792_v44 }
 0x27b   : > { %v796_v50 = vadd.f32 %v795_v49, %v794_v48  ;;  %v887_v15 = vpop.permute.xlu0 %886  ;;  %v4415_v49 = vld [vmem:[%s6778_s3 + $0x58] sm:$0xff] }
 0x27d   : > { %v798_v53 = vadd.f32 %v797_v52, %v796_v50 }
 0x27f   : > { %v800_v55 = vadd.f32 %v799_v54, %v798_v53  ;;  %v892_v18 = vpop.permute.xlu0 %891 }
 0x281   : > { %v802_v57 = vadd.f32 %v801_v56, %v800_v55 }
 0x283   : > { %v803_v58 = vrot.slane %v802_v57, 4  ;;  %v897_v20 = vpop.permute.xlu0 %896 }
 0x285   : > { %v804_v59 = vadd.f32 %v803_v58, %v802_v57 }
 0x287   : > { %v805_v60 = vrot.slane %v804_v59, 2  ;;  %v902_v46 = vpop.permute.xlu0 %901 }
 0x289   : > { %v806_v61 = vadd.f32 %v805_v60, %v804_v59 }
 0x28b   : > { %v807_v62 = vrot.slane %v806_v61, 1 }
 0x28d   : > { %v808_v0 = vadd.f32 %v807_v62, %v806_v61 }
 0x28f   : > { %v809_v2 = vmul.f32 0.020408163, %v808_v0 }
 0x291   : > { %5283 = vrsqrt.f32 %v809_v2  ;;  %vm812_vm10 = vcmp.eq.f32.partialorder %v809_v2, inf  ;;  %v815_v11 = vand.u32 2147483648, %v809_v2  ;;  %vm814_vm11 = vcmp.eq.f32.partialorder %v809_v2, 0.0 }
 0x29b   : > { %v5284_v9 = vpop.eup %5283 }
 0x29c   : > { %v811_v10 = vmul.f32 %v5284_v9, %v809_v2 }
 0x29e   : > { %v813_v13 = vsel %vm812_vm10, %v809_v2, %v811_v10 }
 0x29f   : > { %v816_v14 = vsel %vm814_vm11, %v815_v11, %v813_v13 }
 0x2a0   : > { %v817_v16 = vadd.f32 1e-06, %v816_v14 }
 0x2a2   : > { %5285 = vrcp.f32 %v817_v16 }
 0x2ac   : > { %v5286_v21 = vpop.eup %5285 }
 0x2ad   : > { %v821_v22 = vmul.f32 %v5286_v21, %v777_v32  ;;  %v820_v23 = vmul.f32 %v5286_v21, %v776_v31  ;;  %v822_v24 = vmul.f32 %v5286_v21, %v778_v33  ;;  %v823_v25 = vmul.f32 %v5286_v21, %v779_v34  ;;  %v4412_v34 = vld [vmem:[%s6778_s3 + $0x40] sm:$0xff] }
 0x2ae   : > { %v824_v26 = vmul.f32 %v5286_v21, %v780_v35  ;;  %v825_v27 = vmul.f32 %v5286_v21, %v781_v36  ;;  %v826_v28 = vmul.f32 %v5286_v21, %v782_v37  ;;  %v4413_v35 = vld [vmem:[%s6778_s3 + $0x48] sm:$0xff]  ;;  %v4414_v37 = vld [vmem:[%s6778_s3 + $0x50] sm:$0xff] }
 0x2af   : > { %v863_v29 = vmul.f32 %v835_v63, %v821_v22  ;;  %v862_v30 = vmul.f32 %v830_v1, %v820_v23  ;;  %v864_v38 = vmul.f32 %v840_v7, %v822_v24  ;;  %v865_v39 = vmul.f32 %v845_v12, %v823_v25 }
 0x2b0   : > { %v866_v41 = vmul.f32 %v850_v17, %v824_v26  ;;  %v867_v42 = vmul.f32 %v855_v19, %v825_v27  ;;  %v868_v43 = vmul.f32 %v860_v40, %v826_v28  ;;  %v5167_v36 = vpack.c.bf16 %v4413_v35, %v4412_v34  ;;  %v4427_v40 = vld [vmem:[%s6778_s3 + $0x70] sm:$0xff] }
 0x2b1   : > { %v904_v44 = vadd.f32 %v872_v4, %v862_v30  ;;  %v905_v45 = vadd.f32 %v877_v5, %v863_v29  ;;  %v906_v47 = vadd.f32 %v882_v8, %v864_v38  ;;  %v907_v48 = vadd.f32 %v887_v15, %v865_v39  ;;  %v4425_v38 = vld [vmem:[%s6778_s3 + $0x60] sm:$0xff]  ;;  %v4426_v39 = vld [vmem:[%s6778_s3 + $0x68] sm:$0xff] }
 0x2b2   : > { %v908_v32 = vadd.f32 %v892_v18, %v866_v41  ;;  %v909_v31 = vadd.f32 %v897_v20, %v867_v42  ;;  %v910_v33 = vadd.f32 %v902_v46, %v868_v43  ;;  %5168 = vmatpush3.bf16.msra.mxu0 %v5167_v36  ;;  %v5170_v50 = vpack.c.bf16 %v4415_v49, %v4414_v37  ;;  %v4428_v42 = vld [vmem:[%s6778_s3 + $0x78] sm:$0xff] }
 0x2b3   : > { %911 = vst.msk [vmem:[#allocation2 + $0x2] sm:$0xff] %vm333_vm1, %v904_v44  ;;  %912 = vst.msk [vmem:[#allocation2 + $0xa] sm:$0xff] %vm333_vm1, %v905_v45  ;;  %5169 = vmatprep.subr.bf16.mxu0 %v5311_v3  ;;  %v5173_v41 = vpack.c.bf16 %v4426_v39, %v4425_v38  ;;  %v5176_v43 = vpack.c.bf16 %v4428_v42, %v4427_v40  ;;  %v4417_v44 = vld [vmem:[%s6779_s4 + $0x1] ss:$0 sm:$0xff]  ;;  %v1419_v38 = vld [vmem:[%s6782_s7 + $0x28] sm:$0xff] }
 0x2b4   : > { %913 = vst.msk [vmem:[#allocation2 + $0x12] sm:$0xff] %vm333_vm1, %v906_v47  ;;  %914 = vst.msk [vmem:[#allocation2 + $0x1a] sm:$0xff] %vm333_vm1, %v907_v48  ;;  %v4429_v45 = vld [vmem:[%s6778_s3 + $0x80] sm:$0xff]  ;;  %v4430_v47 = vld [vmem:[%s6778_s3 + $0x88] sm:$0xff] }
 0x2b5   : > { %915 = vst.msk [vmem:[#allocation2 + $0x22] sm:$0xff] %vm333_vm1, %v908_v32  ;;  %916 = vst.msk [vmem:[#allocation2 + $0x2a] sm:$0xff] %vm333_vm1, %v909_v31  ;;  %5174 = vmatpush3.bf16.msra.mxu1 %v5173_v41  ;;  %v5179_v48 = vpack.c.bf16 %v4430_v47, %v4429_v45  ;;  %v1426_v39 = vld [vmem:[%s6783_s8 + $0x28] sm:$0xff]  ;;  %v1420_v40 = vld [vmem:[%s6782_s7 + $0x30] sm:$0x3] }
 0x2b6   : > { %917 = vst.msk [vmem:[#allocation2 + $0x32] sm:$0x3] %vm488_vm4, %v910_v33  ;;  %5171 = vmatpush3.bf16.msra.mxu0 %v5170_v50  ;;  %5175 = vmatprep.subr.bf16.mxu1 %v5311_v3  ;;  %v1427_v41 = vld [vmem:[%s6783_s8 + $0x30] sm:$0x3] }
 0x2b7   : > { %5181 = vmatprep.subr.bf16.mxu0 %v5311_v3 }
 0x2b9   : > { %5177 = vmatpush3.bf16.msra.mxu1 %v5176_v43 }
 0x2ba   : > { %v919_v51 = vld [vmem:[#allocation2 + $0x9] sm:$0xff]  ;;  %v918_v60 = vld [vmem:[#allocation2 + $0x1] sm:$0xff]  ;;  %5178 = vmatprep.subr.bf16.mxu1 %v5311_v3 }
 0x2bb   : > { %v974_v52 = vld [vmem:[#allocation2 + $0x3] sm:$0xff]  ;;  %v920_v53 = vld [vmem:[#allocation2 + $0x11] sm:$0xff]  ;;  %926 = vst.msk [vmem:[#allocation3 + $0x8] sm:$0xff] %vm333_vm1, %v919_v51  ;;  %v921_v54 = vld [vmem:[#allocation2 + $0x19] sm:$0xff] }
 0x2bc   : > { %927 = vst.msk [vmem:[#allocation3 + $0x10] sm:$0xff] %vm333_vm1, %v920_v53  ;;  %988 = vrot.lane.b32.xlu0 %v974_v52, %s5315_s20  ;;  %928 = vst.msk [vmem:[#allocation3 + $0x18] sm:$0xff] %vm333_vm1, %v921_v54  ;;  %v922_v55 = vld [vmem:[#allocation2 + $0x21] sm:$0xff]  ;;  %v923_v56 = vld [vmem:[#allocation2 + $0x29] sm:$0xff] }
 0x2bd   : > { %929 = vst.msk [vmem:[#allocation3 + $0x20] sm:$0xff] %vm333_vm1, %v922_v55  ;;  %930 = vst.msk [vmem:[#allocation3 + $0x28] sm:$0xff] %vm333_vm1, %v923_v56  ;;  %v924_v57 = vld [vmem:[#allocation2 + $0x31] sm:$0x3]  ;;  %v932_v59 = vld [vmem:[#allocation2 + $0x2] sm:$0xff]  ;;  %5180 = vmatpush3.bf16.msra.mxu1 %v5179_v48 }
 0x2be   : > { %v975_v58 = vld [vmem:[#allocation2 + $0xb] sm:$0xff]  ;;  %931 = vst.msk [vmem:[#allocation3 + $0x30] sm:$0x3] %vm488_vm4, %v924_v57  ;;  %946 = vrot.lane.b32.xlu1 %v932_v59, %s5314_s18  ;;  %v976_v61 = vld [vmem:[#allocation2 + $0x13] sm:$0xff]  ;;  %v977_v63 = vld [vmem:[#allocation2 + $0x1b] sm:$0xff]  ;;  %5190 = vmatprep.subr.bf16.mxu1 %v5311_v3 }
 0x2bf   : > { %925 = vst.msk [vmem:[#allocation3] sm:$0xff] %vm333_vm1, %v918_v60  ;;  %v933_v62 = vld [vmem:[#allocation2 + $0xa] sm:$0xff]  ;;  %v934_v0 = vld [vmem:[#allocation2 + $0x12] sm:$0xff]  ;;  %v935_v2 = vld [vmem:[#allocation2 + $0x1a] sm:$0xff] }
 0x2c0   : > { %990 = vrot.lane.b32.xlu0 %v975_v58, %s5315_s20  ;;  %v978_v1 = vld [vmem:[#allocation2 + $0x23] sm:$0xff]  ;;  %v979_v4 = vld [vmem:[#allocation2 + $0x2b] sm:$0xff]  ;;  %v980_v8 = vld [vmem:[#allocation2 + $0x33] sm:$0x3] }
 0x2c1   : > { %v936_v5 = vld [vmem:[#allocation2 + $0x22] sm:$0xff]  ;;  %v937_v7 = vld [vmem:[#allocation2 + $0x2a] sm:$0xff]  ;;  %v938_v9 = vld [vmem:[#allocation2 + $0x32] sm:$0x3] }
 0x2c2   : > { %948 = vrot.lane.b32.xlu1 %v933_v62, %s5314_s18 }
 0x2c4   : > { %992 = vrot.lane.b32.xlu0 %v976_v61, %s5315_s20 }
 0x2c6   : > { %950 = vrot.lane.b32.xlu1 %v934_v0, %s5314_s18 }
 0x2c8   : > { %994 = vrot.lane.b32.xlu0 %v977_v63, %s5315_s20 }
 0x2ca   : > { %952 = vrot.lane.b32.xlu1 %v935_v2, %s5314_s18 }
 0x2cc   : > { %996 = vrot.lane.b32.xlu0 %v978_v1, %s5315_s20 }
 0x2ce   : > { %954 = vrot.lane.b32.xlu1 %v936_v5, %s5314_s18 }
 0x2d0   : > { %998 = vrot.lane.b32.xlu0 %v979_v4, %s5315_s20 }
 0x2d2   : > { %956 = vrot.lane.b32.xlu1 %v937_v7, %s5314_s18 }
 0x2d4   : > { %1000 = vrot.lane.b32.xlu0 %v980_v8, %s5315_s20 }
 0x2d6   : > { %958 = vrot.lane.b32.xlu1 %v938_v9, %s5314_s18 }
 0x32e   : > { %v989_v10 = vpop.permute.xlu0 %988 }
 0x330   : > { %v947_v11 = vpop.permute.xlu1 %946 }
 0x331   : > { %967 = vst.msk [vmem:[#allocation3] sm:$0xff] %vm539_vm5, %v947_v11 }
 0x332   : > { %v991_v12 = vpop.permute.xlu0 %990  ;;  %1009 = vst.msk [vmem:[#allocation3] sm:$0xff] %vm583_vm6, %v989_v10 }
 0x334   : > { %v949_v13 = vpop.permute.xlu1 %948 }
 0x335   : > { %968 = vst.msk [vmem:[#allocation3 + $0x8] sm:$0xff] %vm539_vm5, %v949_v13 }
 0x336   : > { %v993_v14 = vpop.permute.xlu0 %992  ;;  %1010 = vst.msk [vmem:[#allocation3 + $0x8] sm:$0xff] %vm583_vm6, %v991_v12 }
 0x338   : > { %v951_v15 = vpop.permute.xlu1 %950 }
 0x339   : > { %969 = vst.msk [vmem:[#allocation3 + $0x10] sm:$0xff] %vm539_vm5, %v951_v15  ;;  %v1025_v17 = vld [vmem:[#allocation3] sm:$0xff] }
 0x33a   : > { %v995_v16 = vpop.permute.xlu0 %994  ;;  %1011 = vst.msk [vmem:[#allocation3 + $0x10] sm:$0xff] %vm583_vm6, %v993_v14  ;;  %4798 = vmatmul.mubr.msk.f32.vlgmr.msra.gmra.mrb[6].mxu0 %vm612_vm7, %v1025_v17 }
 0x33b   : > { %4800 = vmatprep.mubr.msk.f32.mxu0 %vm5312_vm0, %v5313_v6 }
 0x33c   : > { %v953_v18 = vpop.permute.xlu1 %952 }
 0x33d   : > { %970 = vst.msk [vmem:[#allocation3 + $0x18] sm:$0xff] %vm539_vm5, %v953_v18  ;;  %v1026_v20 = vld [vmem:[#allocation3 + $0x8] sm:$0xff] }
 0x33e   : > { %v997_v19 = vpop.permute.xlu0 %996  ;;  %1012 = vst.msk [vmem:[#allocation3 + $0x18] sm:$0xff] %vm583_vm6, %v995_v16  ;;  %4801 = vmatmul.mubr.msk.f32.gmra.mrb[8].mxu0 %vm612_vm7, %v1026_v20  ;;  %v1228_v20 = vld [vmem:[#allocation2 + $0x34] sm:$0x3] }
 0x33f   : > { %4803 = vmatprep.mubr.msk.f32.mxu0 %vm5312_vm0, %v5313_v6 }
 0x340   : > { %v955_v21 = vpop.permute.xlu1 %954 }
 0x341   : > { %971 = vst.msk [vmem:[#allocation3 + $0x20] sm:$0xff] %vm539_vm5, %v955_v21  ;;  %v1027_v22 = vld [vmem:[#allocation3 + $0x10] sm:$0xff]  ;;  %v1414_v21 = vld [vmem:[%s6782_s7] sm:$0xff] }
 0x342   : > { %v999_v23 = vpop.permute.xlu0 %998  ;;  %1013 = vst.msk [vmem:[#allocation3 + $0x20] sm:$0xff] %vm583_vm6, %v997_v19  ;;  %4804 = vmatmul.mubr.msk.f32.gmra.mrb[10].mxu0 %vm612_vm7, %v1027_v22  ;;  %v1415_v22 = vld [vmem:[%s6782_s7 + $0x8] sm:$0xff] }
 0x343   : > { %4806 = vmatprep.mubr.msk.f32.mxu0 %vm5312_vm0, %v5313_v6 }
 0x344   : > { %v957_v24 = vpop.permute.xlu1 %956 }
 0x345   : > { %972 = vst.msk [vmem:[#allocation3 + $0x28] sm:$0xff] %vm539_vm5, %v957_v24  ;;  %v1028_v25 = vld [vmem:[#allocation3 + $0x18] sm:$0xff]  ;;  %v1422_v24 = vld [vmem:[%s6783_s8 + $0x8] sm:$0xff] }
 0x346   : > { %1014 = vst.msk [vmem:[#allocation3 + $0x28] sm:$0xff] %vm583_vm6, %v999_v23  ;;  %4807 = vmatmul.mubr.msk.f32.gmra.mrb[12].mxu0 %vm612_vm7, %v1028_v25  ;;  %v1001_v26 = vpop.permute.xlu0 %1000  ;;  %v1421_v23 = vld [vmem:[%s6783_s8] sm:$0xff]  ;;  %v1416_v25 = vld [vmem:[%s6782_s7 + $0x10] sm:$0xff] }
 0x347   : > { %4809 = vmatprep.mubr.msk.f32.mxu0 %vm5312_vm0, %v5313_v6 }
 0x348   : > { %v959_v27 = vpop.permute.xlu1 %958 }
 0x349   : > { %973 = vst.msk [vmem:[#allocation3 + $0x30] sm:$0x3] %vm546_vm8, %v959_v27  ;;  %v1029_v28 = vld [vmem:[#allocation3 + $0x20] sm:$0xff] }
 0x34a   : > { %1015 = vst.msk [vmem:[#allocation3 + $0x30] sm:$0x3] %vm590_vm9, %v1001_v26  ;;  %4810 = vmatmul.mubr.msk.f32.gmra.mrb[14].mxu0 %vm612_vm7, %v1029_v28  ;;  %v1423_v26 = vld [vmem:[%s6783_s8 + $0x10] sm:$0xff]  ;;  %v1417_v27 = vld [vmem:[%s6782_s7 + $0x18] sm:$0xff] }
 0x34b   : > { %4812 = vmatprep.mubr.msk.f32.mxu0 %vm5312_vm0, %v5313_v6  ;;  %v1424_v28 = vld [vmem:[%s6783_s8 + $0x18] sm:$0xff] }
 0x34d   : > { %v1030_v29 = vld [vmem:[#allocation3 + $0x28] sm:$0xff] }
 0x34e   : > { %4813 = vmatmul.mubr.msk.f32.gmra.mrb[16].mxu0 %vm612_vm7, %v1030_v29  ;;  %v1418_v29 = vld [vmem:[%s6782_s7 + $0x20] sm:$0xff] }
 0x34f   : > { %4815 = vmatprep.mubr.msk.f32.mxu0 %vm5312_vm0, %v5313_v6 }
 0x351   : > { %v1031_v30 = vld [vmem:[#allocation3 + $0x30] sm:$0x3] }
 0x352   : > { %4816 = vmatmul.mubr.msk.f32.gmra.mrb[18].mxu0 %vm612_vm7, %v1031_v30  ;;  %v1425_v30 = vld [vmem:[%s6783_s8 + $0x20] sm:$0xff] }
 0x353   : > { %4863 = vmatprep.mubr.msk.f32.mxu0 %vm5312_vm0, %v5313_v6 }
 0x40d   : > { %v1125_v46 = vpop.f32.mrb[6].mxu0 }
 0x40e   : > { %v1126_v32 = vadd.f32 %v4417_v44, %v1125_v46  ;;  %v4799_v31 = vpop.f32.mrb[7].mxu0 }
 0x410   : > { %1159 = vst.msk [vmem:[#allocation2 + $0x2] sm:$0xff] %vm333_vm1, %v1126_v32 }
 0x411   : > { %v1130_v33 = vpop.f32.mrb[8].mxu0 }
 0x412   : > { %v1131_v34 = vadd.f32 %v4417_v44, %v1130_v33  ;;  %v4802_v35 = vpop.f32.mrb[9].mxu0 }
 0x414   : > { %1160 = vst.msk [vmem:[#allocation2 + $0xa] sm:$0xff] %vm333_vm1, %v1131_v34 }
 0x415   : > { %v1135_v36 = vpop.f32.mrb[10].mxu0 }
 0x416   : > { %v1136_v37 = vadd.f32 %v4417_v44, %v1135_v36  ;;  %v4805_v49 = vpop.f32.mrb[11].mxu0 }
 0x417   : > { %v1180_v50 = vld [vmem:[#allocation2 + $0x2] sm:$0xff] }
 0x418   : > { %v1166_v51 = vld [vmem:[#allocation2] sm:$0xff]  ;;  %1161 = vst.msk [vmem:[#allocation2 + $0x12] sm:$0xff] %vm333_vm1, %v1136_v37  ;;  %1194 = vrot.lane.b32.xlu1 %v1180_v50, %s5314_s18 }
 0x419   : > { %1173 = vst.msk [vmem:[#allocation3] sm:$0xff] %vm333_vm1, %v1166_v51  ;;  %v1140_v52 = vpop.f32.mrb[12].mxu0 }
 0x41a   : > { %v1141_v53 = vadd.f32 %v4417_v44, %v1140_v52  ;;  %v4808_v54 = vpop.f32.mrb[13].mxu0 }
 0x41b   : > { %v1167_v55 = vld [vmem:[#allocation2 + $0x8] sm:$0xff] }
 0x41c   : > { %v1222_v56 = vld [vmem:[#allocation2 + $0x4] sm:$0xff]  ;;  %1174 = vst.msk [vmem:[#allocation3 + $0x8] sm:$0xff] %vm333_vm1, %v1167_v55  ;;  %1162 = vst.msk [vmem:[#allocation2 + $0x1a] sm:$0xff] %vm333_vm1, %v1141_v53 }
 0x41d   : > { %v1181_v57 = vld [vmem:[#allocation2 + $0xa] sm:$0xff]  ;;  %1236 = vrot.lane.b32.xlu0 %v1222_v56, %s5315_s20  ;;  %v1145_v58 = vpop.f32.mrb[14].mxu0  ;;  %v4432_v56 = vld [vmem:[%s6779_s4 + $0x2] ss:$0 sm:$0xff] }
 0x41e   : > { %1196 = vrot.lane.b32.xlu1 %v1181_v57, %s5314_s18  ;;  %v1146_v59 = vadd.f32 %v4417_v44, %v1145_v58  ;;  %v4811_v60 = vpop.f32.mrb[15].mxu0 }
 0x41f   : > { %v1223_v61 = vld [vmem:[#allocation2 + $0xc] sm:$0xff] }
 0x420   : > { %v1182_v62 = vld [vmem:[#allocation2 + $0x12] sm:$0xff]  ;;  %1163 = vst.msk [vmem:[#allocation2 + $0x22] sm:$0xff] %vm333_vm1, %v1146_v59 }
 0x421   : > { %v1168_v63 = vld [vmem:[#allocation2 + $0x10] sm:$0xff]  ;;  %1238 = vrot.lane.b32.xlu0 %v1223_v61, %s5315_s20  ;;  %v1150_v0 = vpop.f32.mrb[16].mxu0 }
 0x422   : > { %1198 = vrot.lane.b32.xlu1 %v1182_v62, %s5314_s18  ;;  %1175 = vst.msk [vmem:[#allocation3 + $0x10] sm:$0xff] %vm333_vm1, %v1168_v63  ;;  %v1151_v1 = vadd.f32 %v4417_v44, %v1150_v0  ;;  %v4814_v2 = vpop.f32.mrb[17].mxu0 }
 0x423   : > { %v1224_v4 = vld [vmem:[#allocation2 + $0x14] sm:$0xff] }
 0x424   : > { %v1183_v5 = vld [vmem:[#allocation2 + $0x1a] sm:$0xff]  ;;  %1164 = vst.msk [vmem:[#allocation2 + $0x2a] sm:$0xff] %vm333_vm1, %v1151_v1 }
 0x425   : > { %v1169_v7 = vld [vmem:[#allocation2 + $0x18] sm:$0xff]  ;;  %1240 = vrot.lane.b32.xlu0 %v1224_v4, %s5315_s20  ;;  %v1155_v8 = vpop.f32.mrb[18].mxu0 }
 0x426   : > { %1200 = vrot.lane.b32.xlu1 %v1183_v5, %s5314_s18  ;;  %1176 = vst.msk [vmem:[#allocation3 + $0x18] sm:$0xff] %vm333_vm1, %v1169_v7  ;;  %v1156_v9 = vadd.f32 %v4417_v44, %v1155_v8  ;;  %v4817_v10 = vpop.f32.mrb[19].mxu0 }
 0x427   : > { %v1225_v11 = vld [vmem:[#allocation2 + $0x1c] sm:$0xff] }
 0x428   : > { %v1184_v12 = vld [vmem:[#allocation2 + $0x22] sm:$0xff]  ;;  %1165 = vst.msk [vmem:[#allocation2 + $0x32] sm:$0x3] %vm488_vm4, %v1156_v9 }
 0x429   : > { %v1170_v13 = vld [vmem:[#allocation2 + $0x20] sm:$0xff]  ;;  %1242 = vrot.lane.b32.xlu0 %v1225_v11, %s5315_s20 }
 0x42a   : > { %1202 = vrot.lane.b32.xlu1 %v1184_v12, %s5314_s18  ;;  %1177 = vst.msk [vmem:[#allocation3 + $0x20] sm:$0xff] %vm333_vm1, %v1170_v13 }
 0x42b   : > { %v1226_v14 = vld [vmem:[#allocation2 + $0x24] sm:$0xff]  ;;  %v1172_v17 = vld [vmem:[#allocation2 + $0x30] sm:$0x3] }
 0x42c   : > { %v1185_v15 = vld [vmem:[#allocation2 + $0x2a] sm:$0xff]  ;;  %1179 = vst.msk [vmem:[#allocation3 + $0x30] sm:$0x3] %vm488_vm4, %v1172_v17 }
 0x42d   : > { %v1171_v16 = vld [vmem:[#allocation2 + $0x28] sm:$0xff]  ;;  %1244 = vrot.lane.b32.xlu0 %v1226_v14, %s5315_s20 }
 0x42e   : > { %1204 = vrot.lane.b32.xlu1 %v1185_v15, %s5314_s18  ;;  %1178 = vst.msk [vmem:[#allocation3 + $0x28] sm:$0xff] %vm333_vm1, %v1171_v16 }
 0x42f   : > { %v1227_v18 = vld [vmem:[#allocation2 + $0x2c] sm:$0xff] }
 0x430   : > { %v1186_v19 = vld [vmem:[#allocation2 + $0x32] sm:$0x3] }
 0x431   : > { %1246 = vrot.lane.b32.xlu0 %v1227_v18, %s5315_s20 }
 0x432   : > { %1206 = vrot.lane.b32.xlu1 %v1186_v19, %s5314_s18 }
 0x435   : > { %1248 = vrot.lane.b32.xlu0 %v1228_v20, %s5315_s20 }
 0x436   : > { %1501 = vperm.xlu1 %5282, %v1414_v21  }
 0x439   : > { %1506 = vperm.xlu0 %5281, %v1415_v22  }
 0x43a   : > { %1543 = vperm.xlu1 %5282, %v1421_v23  }
 0x43d   : > { %1548 = vperm.xlu0 %5281, %v1422_v24  }
 0x43e   : > { %1511 = vperm.xlu1 %5282, %v1416_v25  }
 0x441   : > { %1553 = vperm.xlu0 %5281, %v1423_v26  }
 0x442   : > { %1516 = vperm.xlu1 %5282, %v1417_v27  }
 0x445   : > { %1558 = vperm.xlu0 %5281, %v1424_v28  }
 0x446   : > { %1521 = vperm.xlu1 %5282, %v1418_v29  }
 0x449   : > { %1563 = vperm.xlu0 %5281, %v1425_v30  }
 0x44a   : > { %1526 = vperm.xlu1 %5282, %v1419_v38  }
 0x44d   : > { %1568 = vperm.xlu0 %5281, %v1426_v39  }
 0x44e   : > { %1531 = vperm.xlu1 %5282, %v1420_v40  }
 0x451   : > { %1573 = vperm.xlu0 %5281, %v1427_v41  }
 0x48a   : > { %v1195_v42 = vpop.permute.xlu1 %1194 }
 0x48b   : > { %1215 = vst.msk [vmem:[#allocation3] sm:$0xff] %vm539_vm5, %v1195_v42 }
 0x48f   : > { %v1237_v43 = vpop.permute.xlu0 %1236 }
 0x490   : > { %v1197_v44 = vpop.permute.xlu1 %1196  ;;  %1257 = vst.msk [vmem:[#allocation3] sm:$0xff] %vm583_vm6, %v1237_v43 }
 0x491   : > { %1216 = vst.msk [vmem:[#allocation3 + $0x8] sm:$0xff] %vm539_vm5, %v1197_v44 }
 0x493   : > { %v1239_v45 = vpop.permute.xlu0 %1238 }
 0x494   : > { %v1199_v47 = vpop.permute.xlu1 %1198  ;;  %1258 = vst.msk [vmem:[#allocation3 + $0x8] sm:$0xff] %vm583_vm6, %v1239_v45 }
 0x495   : > { %1217 = vst.msk [vmem:[#allocation3 + $0x10] sm:$0xff] %vm539_vm5, %v1199_v47 }
 0x497   : > { %v1241_v48 = vpop.permute.xlu0 %1240  ;;  %v1273_v32 = vld [vmem:[#allocation3] sm:$0xff] }
 0x498   : > { %v1201_v46 = vpop.permute.xlu1 %1200  ;;  %1259 = vst.msk [vmem:[#allocation3 + $0x10] sm:$0xff] %vm583_vm6, %v1241_v48  ;;  %4831 = vmatmul.mubr.msk.f32.vlgmr.msra.gmra.mrb[22].mxu1 %vm612_vm7, %v1273_v32  ;;  %v1688_v32 = vld [vmem:[%s6778_s3] sm:$0xff] }
 0x499   : > { %1218 = vst.msk [vmem:[#allocation3 + $0x18] sm:$0xff] %vm539_vm5, %v1201_v46  ;;  %4833 = vmatprep.mubr.msk.f32.mxu1 %vm5312_vm0, %v5313_v6 }
 0x49b   : > { %v1243_v31 = vpop.permute.xlu0 %1242  ;;  %v1274_v34 = vld [vmem:[#allocation3 + $0x8] sm:$0xff] }
 0x49c   : > { %v1203_v33 = vpop.permute.xlu1 %1202  ;;  %1260 = vst.msk [vmem:[#allocation3 + $0x18] sm:$0xff] %vm583_vm6, %v1243_v31  ;;  %4834 = vmatmul.mubr.msk.f32.gmra.mrb[24].mxu1 %vm612_vm7, %v1274_v34  ;;  %v1689_v31 = vld [vmem:[%s6778_s3 + $0x8] sm:$0xff] }
 0x49d   : > { %1219 = vst.msk [vmem:[#allocation3 + $0x20] sm:$0xff] %vm539_vm5, %v1203_v33  ;;  %4836 = vmatprep.mubr.msk.f32.mxu1 %vm5312_vm0, %v5313_v6  ;;  %v5182_v34 = vpack.c.bf16 %v1689_v31, %v1688_v32 }
 0x49f   : > { %v1245_v35 = vpop.permute.xlu0 %1244  ;;  %v1275_v37 = vld [vmem:[#allocation3 + $0x10] sm:$0xff]  ;;  %5183 = vmatpush3.bf16.msra.mxu0 %v5182_v34 }
 0x4a0   : > { %v1205_v36 = vpop.permute.xlu1 %1204  ;;  %1261 = vst.msk [vmem:[#allocation3 + $0x20] sm:$0xff] %vm583_vm6, %v1245_v35  ;;  %4837 = vmatmul.mubr.msk.f32.gmra.mrb[26].mxu1 %vm612_vm7, %v1275_v37  ;;  %v1690_v35 = vld [vmem:[%s6778_s3 + $0x10] sm:$0xff]  ;;  %5184 = vmatprep.subr.bf16.mxu0 %v5311_v3 }
 0x4a1   : > { %1220 = vst.msk [vmem:[#allocation3 + $0x28] sm:$0xff] %vm539_vm5, %v1205_v36  ;;  %4839 = vmatprep.mubr.msk.f32.mxu1 %vm5312_vm0, %v5313_v6  ;;  %v1691_v36 = vld [vmem:[%s6778_s3 + $0x18] sm:$0xff] }
 0x4a2   : > { %v5185_v37 = vpack.c.bf16 %v1691_v36, %v1690_v35 }
 0x4a3   : > { %v1247_v49 = vpop.permute.xlu0 %1246  ;;  %v1276_v51 = vld [vmem:[#allocation3 + $0x18] sm:$0xff] }
 0x4a4   : > { %v1207_v50 = vpop.permute.xlu1 %1206  ;;  %1262 = vst.msk [vmem:[#allocation3 + $0x28] sm:$0xff] %vm583_vm6, %v1247_v49  ;;  %4840 = vmatmul.mubr.msk.f32.gmra.mrb[28].mxu1 %vm612_vm7, %v1276_v51  ;;  %5186 = vmatpush3.bf16.msra.mxu0 %v5185_v37 }
 0x4a5   : > { %1221 = vst.msk [vmem:[#allocation3 + $0x30] sm:$0x3] %vm546_vm8, %v1207_v50  ;;  %4842 = vmatprep.mubr.msk.f32.mxu1 %vm5312_vm0, %v5313_v6  ;;  %5187 = vmatprep.subr.bf16.mxu0 %v5311_v3 }
 0x4a7   : > { %v1249_v52 = vpop.permute.xlu0 %1248  ;;  %v1277_v53 = vld [vmem:[#allocation3 + $0x20] sm:$0xff] }
 0x4a8   : > { %1263 = vst.msk [vmem:[#allocation3 + $0x30] sm:$0x3] %vm590_vm9, %v1249_v52  ;;  %4843 = vmatmul.mubr.msk.f32.gmra.mrb[30].mxu1 %vm612_vm7, %v1277_v53 }
 0x4a9   : > { %4845 = vmatprep.mubr.msk.f32.mxu1 %vm5312_vm0, %v5313_v6 }
 0x4ab   : > { %v1278_v54 = vld [vmem:[#allocation3 + $0x28] sm:$0xff] }
 0x4ac   : > { %4846 = vmatmul.mubr.msk.f32.gmra.mrb[32].mxu1 %vm612_vm7, %v1278_v54 }
 0x4ad   : > { %4848 = vmatprep.mubr.msk.f32.mxu1 %vm5312_vm0, %v5313_v6 }
 0x4af   : > { %v1279_v55 = vld [vmem:[#allocation3 + $0x30] sm:$0x3] }
 0x4b0   : > { %4849 = vmatmul.mubr.msk.f32.gmra.mrb[34].mxu1 %vm612_vm7, %v1279_v55 }
 0x4b1   : > { %4896 = vmatprep.mubr.msk.f32.mxu1 %vm5312_vm0, %v5313_v6 }
 0x56b   : > { %v1373_v57 = vpop.f32.mrb[22].mxu1 }
 0x56c   : > { %v1374_v58 = vadd.f32 %v4432_v56, %v1373_v57  ;;  %v4832_v59 = vpop.f32.mrb[23].mxu1 }
 0x56e   : > { %v1407_v61 = vmax.f32 %v1374_v58, 0.0 }
 0x56f   : > { %v1378_v60 = vpop.f32.mrb[24].mxu1 }
 0x570   : > { %v1379_v62 = vadd.f32 %v4432_v56, %v1378_v60  ;;  %v4835_v63 = vpop.f32.mrb[25].mxu1  ;;  %v1428_v2 = vsel %vm333_vm1, %v1407_v61, 0.0 }
 0x572   : > { %v1408_v0 = vmax.f32 %v1379_v62, 0.0 }
 0x573   : > { %v1383_v1 = vpop.f32.mrb[26].mxu1 }
 0x574   : > { %v1429_v4 = vsel %vm333_vm1, %v1408_v0, 0.0  ;;  %v1384_v5 = vadd.f32 %v4432_v56, %v1383_v1  ;;  %v4838_v7 = vpop.f32.mrb[27].mxu1 }
 0x575   : > { %v1430_v8 = vadd.f32 %v1429_v4, %v1428_v2 }
 0x576   : > { %v1409_v9 = vmax.f32 %v1384_v5, 0.0 }
 0x577   : > { %v1388_v10 = vpop.f32.mrb[28].mxu1 }
 0x578   : > { %v1431_v11 = vsel %vm333_vm1, %v1409_v9, 0.0  ;;  %v1389_v12 = vadd.f32 %v4432_v56, %v1388_v10  ;;  %v4841_v13 = vpop.f32.mrb[29].mxu1 }
 0x579   : > { %v1432_v14 = vadd.f32 %v1431_v11, %v1430_v8 }
 0x57a   : > { %v1410_v15 = vmax.f32 %v1389_v12, 0.0 }
 0x57b   : > { %v1393_v16 = vpop.f32.mrb[30].mxu1 }
 0x57c   : > { %v1433_v17 = vsel %vm333_vm1, %v1410_v15, 0.0  ;;  %v1394_v18 = vadd.f32 %v4432_v56, %v1393_v16  ;;  %v4844_v19 = vpop.f32.mrb[31].mxu1 }
 0x57d   : > { %v1434_v20 = vadd.f32 %v1433_v17, %v1432_v14 }
 0x57e   : > { %v1411_v21 = vmax.f32 %v1394_v18, 0.0  ;;  %v1502_v18 = vpop.permute.xlu1 %1501 }
 0x57f   : > { %v1398_v22 = vpop.f32.mrb[32].mxu1 }
 0x580   : > { %v1435_v23 = vsel %vm333_vm1, %v1411_v21, 0.0  ;;  %v1399_v24 = vadd.f32 %v4432_v56, %v1398_v22  ;;  %v4847_v25 = vpop.f32.mrb[33].mxu1 }
 0x581   : > { %v1436_v26 = vadd.f32 %v1435_v23, %v1434_v20  ;;  %v1507_v20 = vpop.permute.xlu0 %1506 }
 0x582   : > { %v1412_v27 = vmax.f32 %v1399_v24, 0.0  ;;  %v1544_v23 = vpop.permute.xlu1 %1543 }
 0x583   : > { %v1403_v28 = vpop.f32.mrb[34].mxu1 }
 0x584   : > { %v1437_v29 = vsel %vm333_vm1, %v1412_v27, 0.0  ;;  %v1404_v30 = vadd.f32 %v4432_v56, %v1403_v28  ;;  %v4850_v38 = vpop.f32.mrb[35].mxu1 }
 0x585   : > { %v1438_v39 = vadd.f32 %v1437_v29, %v1436_v26  ;;  %v1549_v24 = vpop.permute.xlu0 %1548 }
 0x586   : > { %v1413_v40 = vmax.f32 %v1404_v30, 0.0  ;;  %v1512_v25 = vpop.permute.xlu1 %1511 }
 0x588   : > { %v1439_v41 = vsel %vm488_vm4, %v1413_v40, 0.0 }
 0x589   : > { %v1440_v42 = vadd.f32 %v1439_v41, %v1438_v39  ;;  %v1554_v26 = vpop.permute.xlu0 %1553 }
 0x58a   : > { %v1517_v29 = vpop.permute.xlu1 %1516 }
 0x58b   : > { %v1441_v43 = vrot.slane %v1440_v42, 4 }
 0x58d   : > { %v1442_v44 = vadd.f32 %v1441_v43, %v1440_v42  ;;  %v1559_v39 = vpop.permute.xlu0 %1558 }
 0x58e   : > { %v1522_v42 = vpop.permute.xlu1 %1521 }
 0x58f   : > { %v1443_v45 = vrot.slane %v1442_v44, 2 }
 0x591   : > { %v1444_v47 = vadd.f32 %v1443_v45, %v1442_v44  ;;  %v1564_v43 = vpop.permute.xlu0 %1563 }
 0x592   : > { %v1527_v44 = vpop.permute.xlu1 %1526 }
 0x593   : > { %v1445_v48 = vrot.slane %v1444_v47, 1 }
 0x595   : > { %v1446_v46 = vadd.f32 %v1445_v48, %v1444_v47  ;;  %v1569_v45 = vpop.permute.xlu0 %1568 }
 0x596   : > { %v1532_v36 = vpop.permute.xlu1 %1531 }
 0x597   : > { %v1447_v33 = vmul.f32 0.02, %v1446_v46 }
 0x599   : > { %v1448_v49 = vsub.f32 %v1407_v61, %v1447_v33  ;;  %v1449_v50 = vsub.f32 %v1408_v0, %v1447_v33  ;;  %v1450_v51 = vsub.f32 %v1409_v9, %v1447_v33  ;;  %v1451_v52 = vsub.f32 %v1410_v15, %v1447_v33 }
 0x59a   : > { %v1452_v53 = vsub.f32 %v1411_v21, %v1447_v33  ;;  %v1453_v54 = vsub.f32 %v1412_v27, %v1447_v33  ;;  %v1454_v55 = vsub.f32 %v1413_v40, %v1447_v33 }
 0x59b   : > { %v1455_v56 = vmul.f32 %v1448_v49, %v1448_v49  ;;  %v1456_v57 = vmul.f32 %v1449_v50, %v1449_v50  ;;  %v1457_v58 = vmul.f32 %v1450_v51, %v1450_v51  ;;  %v1458_v59 = vmul.f32 %v1451_v52, %v1451_v52 }
 0x59c   : > { %v1459_v61 = vmul.f32 %v1452_v53, %v1452_v53  ;;  %v1460_v2 = vmul.f32 %v1453_v54, %v1453_v54  ;;  %v1461_v7 = vmul.f32 %v1454_v55, %v1454_v55 }
 0x59d   : > { %v1462_v60 = vsel %vm333_vm1, %v1455_v56, 0.0  ;;  %v1463_v62 = vsel %vm333_vm1, %v1456_v57, 0.0  ;;  %v1465_v0 = vsel %vm333_vm1, %v1457_v58, 0.0  ;;  %v1467_v4 = vsel %vm333_vm1, %v1458_v59, 0.0  ;;  %v1692_v59 = vld [vmem:[%s6778_s3 + $0x20] sm:$0xff] }
 0x59e   : > { %v1464_v63 = vadd.f32 %v1463_v62, %v1462_v60  ;;  %v1469_v8 = vsel %vm333_vm1, %v1459_v61, 0.0  ;;  %v1471_v10 = vsel %vm333_vm1, %v1460_v2, 0.0  ;;  %v1473_v12 = vsel %vm488_vm4, %v1461_v7, 0.0  ;;  %v1693_v60 = vld [vmem:[%s6778_s3 + $0x28] sm:$0xff] }
 0x5a0   : > { %v1466_v1 = vadd.f32 %v1465_v0, %v1464_v63 }
 0x5a2   : > { %v1468_v5 = vadd.f32 %v1467_v4, %v1466_v1 }
 0x5a4   : > { %v1470_v9 = vadd.f32 %v1469_v8, %v1468_v5 }
 0x5a6   : > { %v1472_v11 = vadd.f32 %v1471_v10, %v1470_v9 }
 0x5a8   : > { %v1474_v13 = vadd.f32 %v1473_v12, %v1472_v11 }
 0x5aa   : > { %v1475_v14 = vrot.slane %v1474_v13, 4 }
 0x5ac   : > { %v1476_v15 = vadd.f32 %v1475_v14, %v1474_v13 }
 0x5ae   : > { %v1477_v16 = vrot.slane %v1476_v15, 2 }
 0x5b0   : > { %v1478_v17 = vadd.f32 %v1477_v16, %v1476_v15 }
 0x5b2   : > { %v1479_v19 = vrot.slane %v1478_v17, 1 }
 0x5b4   : > { %v1480_v21 = vadd.f32 %v1479_v19, %v1478_v17 }
 0x5b6   : > { %v1481_v22 = vmul.f32 0.020408163, %v1480_v21 }
 0x5b8   : > { %5287 = vrsqrt.f32 %v1481_v22  ;;  %vm1484_vm12 = vcmp.eq.f32.partialorder %v1481_v22, inf  ;;  %v1487_v30 = vand.u32 2147483648, %v1481_v22  ;;  %vm1486_vm13 = vcmp.eq.f32.partialorder %v1481_v22, 0.0 }
 0x5c2   : > { %v5288_v27 = vpop.eup %5287 }
 0x5c3   : > { %v1483_v28 = vmul.f32 %v5288_v27, %v1481_v22  ;;  %v1844_v27 = vld [vmem:[%s6781_s6 + $0x8] sm:$0xff] }
 0x5c5   : > { %v1485_v38 = vsel %vm1484_vm12, %v1481_v22, %v1483_v28  ;;  %v1843_v28 = vld [vmem:[%s6781_s6] sm:$0xff] }
 0x5c6   : > { %v1488_v40 = vsel %vm1486_vm13, %v1487_v30, %v1485_v38  ;;  %v1838_v30 = vld [vmem:[%s6780_s5 + $0x10] sm:$0xff]  ;;  %v1846_v38 = vld [vmem:[%s6781_s6 + $0x18] sm:$0xff] }
 0x5c7   : > { %v1489_v41 = vadd.f32 1e-06, %v1488_v40  ;;  %v1847_v40 = vld [vmem:[%s6781_s6 + $0x20] sm:$0xff] }
 0x5c9   : > { %5289 = vrcp.f32 %v1489_v41  ;;  %v1840_v41 = vld [vmem:[%s6780_s5 + $0x20] sm:$0xff] }
 0x5d3   : > { %v5290_v47 = vpop.eup %5289 }
 0x5d4   : > { %v1492_v48 = vmul.f32 %v5290_v47, %v1448_v49  ;;  %v1493_v46 = vmul.f32 %v5290_v47, %v1449_v50  ;;  %v1494_v32 = vmul.f32 %v5290_v47, %v1450_v51  ;;  %v1495_v31 = vmul.f32 %v5290_v47, %v1451_v52 }
 0x5d5   : > { %v1496_v33 = vmul.f32 %v5290_v47, %v1452_v53  ;;  %v1497_v34 = vmul.f32 %v5290_v47, %v1453_v54  ;;  %v1498_v35 = vmul.f32 %v5290_v47, %v1454_v55  ;;  %v5188_v52 = vpack.c.bf16 %v1693_v60, %v1692_v59  ;;  %v1574_v53 = vpop.permute.xlu0 %1573 }
 0x5d6   : > { %v1534_v37 = vmul.f32 %v1502_v18, %v1492_v48  ;;  %v1535_v56 = vmul.f32 %v1507_v20, %v1493_v46  ;;  %v1536_v57 = vmul.f32 %v1512_v25, %v1494_v32  ;;  %v1537_v58 = vmul.f32 %v1517_v29, %v1495_v31  ;;  %v1837_v25 = vld [vmem:[%s6780_s5 + $0x8] sm:$0xff]  ;;  %v1845_v29 = vld [vmem:[%s6781_s6 + $0x10] sm:$0xff] }
 0x5d7   : > { %v1538_v49 = vmul.f32 %v1522_v42, %v1496_v33  ;;  %v1539_v50 = vmul.f32 %v1527_v44, %v1497_v34  ;;  %v1540_v51 = vmul.f32 %v1532_v36, %v1498_v35  ;;  %5189 = vmatpush3.bf16.msra.mxu0 %v5188_v52  ;;  %v1848_v42 = vld [vmem:[%s6781_s6 + $0x28] sm:$0xff]  ;;  %v1849_v44 = vld [vmem:[%s6781_s6 + $0x30] sm:$0x3] }
 0x5d8   : > { %v1576_v54 = vadd.f32 %v1544_v23, %v1534_v37  ;;  %v1577_v55 = vadd.f32 %v1549_v24, %v1535_v56  ;;  %v1578_v62 = vadd.f32 %v1554_v26, %v1536_v57  ;;  %v1579_v63 = vadd.f32 %v1559_v39, %v1537_v58  ;;  %5199 = vmatprep.subr.bf16.mxu0 %v5311_v3  ;;  %v1836_v26 = vld [vmem:[%s6780_s5] sm:$0xff]  ;;  %v1839_v39 = vld [vmem:[%s6780_s5 + $0x18] sm:$0xff] }
 0x5d9   : > { %v1580_v61 = vadd.f32 %v1564_v43, %v1538_v49  ;;  %v1581_v0 = vadd.f32 %v1569_v45, %v1539_v50  ;;  %v1582_v1 = vadd.f32 %v1574_v53, %v1540_v51  ;;  %v1841_v43 = vld [vmem:[%s6780_s5 + $0x28] sm:$0xff]  ;;  %v1842_v45 = vld [vmem:[%s6780_s5 + $0x30] sm:$0x3] }
 0x5da   : > { %1583 = vst.msk [vmem:[#allocation2 + $0x2] sm:$0xff] %vm333_vm1, %v1576_v54  ;;  %1584 = vst.msk [vmem:[#allocation2 + $0xa] sm:$0xff] %vm333_vm1, %v1577_v55  ;;  %v4440_v55 = vld [vmem:[%s6779_s4] ss:$0 sm:$0xff] }
 0x5db   : > { %1585 = vst.msk [vmem:[#allocation2 + $0x12] sm:$0xff] %vm333_vm1, %v1578_v62  ;;  %1586 = vst.msk [vmem:[#allocation2 + $0x1a] sm:$0xff] %vm333_vm1, %v1579_v63 }
 0x5dc   : > { %1589 = vst.msk [vmem:[#allocation2 + $0x32] sm:$0x3] %vm488_vm4, %v1582_v1 }
 0x5dd   : > { %1587 = vst.msk [vmem:[#allocation2 + $0x22] sm:$0xff] %vm333_vm1, %v1580_v61  ;;  %1588 = vst.msk [vmem:[#allocation2 + $0x2a] sm:$0xff] %vm333_vm1, %v1581_v0 }
 0x5e1   : > { %v1646_v2 = vld [vmem:[#allocation2 + $0x3] sm:$0xff] }
 0x5e2   : > { %v1604_v4 = vld [vmem:[#allocation2 + $0x2] sm:$0xff]  ;;  %1660 = vrot.lane.b32.xlu0 %v1646_v2, %s5315_s20  ;;  %v1605_v5 = vld [vmem:[#allocation2 + $0xa] sm:$0xff]  ;;  %v1593_v11 = vld [vmem:[#allocation2 + $0x19] sm:$0xff] }
 0x5e3   : > { %1618 = vrot.lane.b32.xlu1 %v1604_v4, %s5314_s18  ;;  %v1647_v7 = vld [vmem:[#allocation2 + $0xb] sm:$0xff]  ;;  %v1590_v8 = vld [vmem:[#allocation2 + $0x1] sm:$0xff]  ;;  %1600 = vst.msk [vmem:[#allocation3 + $0x18] sm:$0xff] %vm333_vm1, %v1593_v11  ;;  %v1648_v16 = vld [vmem:[#allocation2 + $0x13] sm:$0xff] }
 0x5e4   : > { %1597 = vst.msk [vmem:[#allocation3] sm:$0xff] %vm333_vm1, %v1590_v8  ;;  %v1591_v9 = vld [vmem:[#allocation2 + $0x9] sm:$0xff]  ;;  %v1592_v10 = vld [vmem:[#allocation2 + $0x11] sm:$0xff]  ;;  %v1594_v12 = vld [vmem:[#allocation2 + $0x21] sm:$0xff] }
 0x5e5   : > { %1598 = vst.msk [vmem:[#allocation3 + $0x8] sm:$0xff] %vm333_vm1, %v1591_v9  ;;  %1599 = vst.msk [vmem:[#allocation3 + $0x10] sm:$0xff] %vm333_vm1, %v1592_v10  ;;  %v1595_v13 = vld [vmem:[#allocation2 + $0x29] sm:$0xff]  ;;  %v1596_v14 = vld [vmem:[#allocation2 + $0x31] sm:$0x3] }
 0x5e6   : > { %1662 = vrot.lane.b32.xlu0 %v1647_v7, %s5315_s20  ;;  %1601 = vst.msk [vmem:[#allocation3 + $0x20] sm:$0xff] %vm333_vm1, %v1594_v12  ;;  %1602 = vst.msk [vmem:[#allocation3 + $0x28] sm:$0xff] %vm333_vm1, %v1595_v13  ;;  %v1606_v15 = vld [vmem:[#allocation2 + $0x12] sm:$0xff]  ;;  %v1607_v17 = vld [vmem:[#allocation2 + $0x1a] sm:$0xff] }
 0x5e7   : > { %1620 = vrot.lane.b32.xlu1 %v1605_v5, %s5314_s18  ;;  %1603 = vst.msk [vmem:[#allocation3 + $0x30] sm:$0x3] %vm488_vm4, %v1596_v14  ;;  %v1649_v18 = vld [vmem:[#allocation2 + $0x1b] sm:$0xff]  ;;  %v1650_v20 = vld [vmem:[#allocation2 + $0x23] sm:$0xff]  ;;  %v1651_v22 = vld [vmem:[#allocation2 + $0x2b] sm:$0xff] }
 0x5e8   : > { %v1608_v19 = vld [vmem:[#allocation2 + $0x22] sm:$0xff]  ;;  %v1609_v21 = vld [vmem:[#allocation2 + $0x2a] sm:$0xff]  ;;  %v1652_v23 = vld [vmem:[#allocation2 + $0x33] sm:$0x3] }
 0x5e9   : > { %v1610_v24 = vld [vmem:[#allocation2 + $0x32] sm:$0x3] }
 0x5ea   : > { %1664 = vrot.lane.b32.xlu0 %v1648_v16, %s5315_s20 }
 0x5eb   : > { %1622 = vrot.lane.b32.xlu1 %v1606_v15, %s5314_s18 }
 0x5ee   : > { %1666 = vrot.lane.b32.xlu0 %v1649_v18, %s5315_s20 }
 0x5ef   : > { %1624 = vrot.lane.b32.xlu1 %v1607_v17, %s5314_s18 }
 0x5f2   : > { %1668 = vrot.lane.b32.xlu0 %v1650_v20, %s5315_s20  ;;  %v4448_v20 = vld [vmem:[%s6778_s3 + $0x30] sm:$0xff] }
 0x5f3   : > { %1626 = vrot.lane.b32.xlu1 %v1608_v19, %s5314_s18 }
 0x5f6   : > { %1670 = vrot.lane.b32.xlu0 %v1651_v22, %s5315_s20  ;;  %v4450_v22 = vld [vmem:[%s6778_s3 + $0x40] sm:$0xff] }
 0x5f7   : > { %1628 = vrot.lane.b32.xlu1 %v1609_v21, %s5314_s18  ;;  %v4449_v21 = vld [vmem:[%s6778_s3 + $0x38] sm:$0xff] }
 0x5fa   : > { %1672 = vrot.lane.b32.xlu0 %v1652_v23, %s5315_s20 }
 0x5fb   : > { %1630 = vrot.lane.b32.xlu1 %v1610_v24, %s5314_s18  ;;  %v5191_v24 = vpack.c.bf16 %v4449_v21, %v4448_v20 }
 0x5fd   : > { %5192 = vmatpush3.bf16.msra.mxu1 %v5191_v24 }
 0x5fe   : > { %1928 = vperm.xlu0 %5281, %v1837_v25   ;;  %v4451_v25 = vld [vmem:[%s6778_s3 + $0x48] sm:$0xff]  ;;  %5193 = vmatprep.subr.bf16.mxu1 %v5311_v3 }
 0x5ff   : > { %1923 = vperm.xlu1 %5282, %v1836_v26  }
 0x602   : > { %1970 = vperm.xlu0 %5281, %v1844_v27  }
 0x603   : > { %1965 = vperm.xlu1 %5282, %v1843_v28  }
 0x606   : > { %1975 = vperm.xlu0 %5281, %v1845_v29  }
 0x607   : > { %1933 = vperm.xlu1 %5282, %v1838_v30   ;;  %v5194_v30 = vpack.c.bf16 %v4451_v25, %v4450_v22 }
 0x609   : > { %5195 = vmatpush3.bf16.msra.mxu1 %v5194_v30 }
 0x60a   : > { %1980 = vperm.xlu0 %5281, %v1846_v38   ;;  %5196 = vmatprep.subr.bf16.mxu1 %v5311_v3 }
 0x60b   : > { %1938 = vperm.xlu1 %5282, %v1839_v39  }
 0x60e   : > { %1985 = vperm.xlu0 %5281, %v1847_v40  }
 0x60f   : > { %1943 = vperm.xlu1 %5282, %v1840_v41  }
 0x612   : > { %1990 = vperm.xlu0 %5281, %v1848_v42  }
 0x613   : > { %1948 = vperm.xlu1 %5282, %v1841_v43  }
 0x616   : > { %1995 = vperm.xlu0 %5281, %v1849_v44  }
 0x617   : > { %1953 = vperm.xlu1 %5282, %v1842_v45  }
 0x654   : > { %v1661_v47 = vpop.permute.xlu0 %1660 }
 0x655   : > { %v1619_v48 = vpop.permute.xlu1 %1618 }
 0x656   : > { %1639 = vst.msk [vmem:[#allocation3] sm:$0xff] %vm539_vm5, %v1619_v48 }
 0x657   : > { %1681 = vst.msk [vmem:[#allocation3] sm:$0xff] %vm583_vm6, %v1661_v47 }
 0x658   : > { %v1663_v46 = vpop.permute.xlu0 %1662 }
 0x659   : > { %v1621_v32 = vpop.permute.xlu1 %1620 }
 0x65a   : > { %1640 = vst.msk [vmem:[#allocation3 + $0x8] sm:$0xff] %vm539_vm5, %v1621_v32 }
 0x65b   : > { %1682 = vst.msk [vmem:[#allocation3 + $0x8] sm:$0xff] %vm583_vm6, %v1663_v46 }
 0x65c   : > { %v1665_v31 = vpop.permute.xlu0 %1664 }
 0x65d   : > { %v1623_v33 = vpop.permute.xlu1 %1622 }
 0x65e   : > { %1641 = vst.msk [vmem:[#allocation3 + $0x10] sm:$0xff] %vm539_vm5, %v1623_v33  ;;  %v1695_v34 = vld [vmem:[#allocation3] sm:$0xff] }
 0x65f   : > { %1683 = vst.msk [vmem:[#allocation3 + $0x10] sm:$0xff] %vm583_vm6, %v1665_v31  ;;  %4864 = vmatmul.mubr.msk.f32.vlgmr.msra.gmra.mrb[20].mxu0 %vm612_vm7, %v1695_v34 }
 0x660   : > { %4866 = vmatprep.mubr.msk.f32.mxu0 %vm5312_vm0, %v5313_v6  ;;  %v1667_v35 = vpop.permute.xlu0 %1666 }
 0x661   : > { %v1625_v36 = vpop.permute.xlu1 %1624 }
 0x662   : > { %1642 = vst.msk [vmem:[#allocation3 + $0x18] sm:$0xff] %vm539_vm5, %v1625_v36  ;;  %v1696_v37 = vld [vmem:[#allocation3 + $0x8] sm:$0xff] }
 0x663   : > { %1684 = vst.msk [vmem:[#allocation3 + $0x18] sm:$0xff] %vm583_vm6, %v1667_v35  ;;  %4867 = vmatmul.mubr.msk.f32.gmra.mrb[22].mxu0 %vm612_vm7, %v1696_v37 }
 0x664   : > { %4869 = vmatprep.mubr.msk.f32.mxu0 %vm5312_vm0, %v5313_v6  ;;  %v1669_v56 = vpop.permute.xlu0 %1668 }
 0x665   : > { %v1627_v57 = vpop.permute.xlu1 %1626 }
 0x666   : > { %1643 = vst.msk [vmem:[#allocation3 + $0x20] sm:$0xff] %vm539_vm5, %v1627_v57  ;;  %v1697_v58 = vld [vmem:[#allocation3 + $0x10] sm:$0xff] }
 0x667   : > { %1685 = vst.msk [vmem:[#allocation3 + $0x20] sm:$0xff] %vm583_vm6, %v1669_v56  ;;  %4870 = vmatmul.mubr.msk.f32.gmra.mrb[24].mxu0 %vm612_vm7, %v1697_v58 }
 0x668   : > { %4872 = vmatprep.mubr.msk.f32.mxu0 %vm5312_vm0, %v5313_v6  ;;  %v1671_v59 = vpop.permute.xlu0 %1670 }
 0x669   : > { %v1629_v60 = vpop.permute.xlu1 %1628 }
 0x66a   : > { %1644 = vst.msk [vmem:[#allocation3 + $0x28] sm:$0xff] %vm539_vm5, %v1629_v60  ;;  %v1698_v49 = vld [vmem:[#allocation3 + $0x18] sm:$0xff] }
 0x66b   : > { %1686 = vst.msk [vmem:[#allocation3 + $0x28] sm:$0xff] %vm583_vm6, %v1671_v59  ;;  %4873 = vmatmul.mubr.msk.f32.gmra.mrb[26].mxu0 %vm612_vm7, %v1698_v49 }
 0x66c   : > { %4875 = vmatprep.mubr.msk.f32.mxu0 %vm5312_vm0, %v5313_v6  ;;  %v1673_v50 = vpop.permute.xlu0 %1672 }
 0x66d   : > { %v1631_v51 = vpop.permute.xlu1 %1630 }
 0x66e   : > { %1645 = vst.msk [vmem:[#allocation3 + $0x30] sm:$0x3] %vm546_vm8, %v1631_v51  ;;  %v1699_v52 = vld [vmem:[#allocation3 + $0x20] sm:$0xff] }
 0x66f   : > { %1687 = vst.msk [vmem:[#allocation3 + $0x30] sm:$0x3] %vm590_vm9, %v1673_v50  ;;  %4876 = vmatmul.mubr.msk.f32.gmra.mrb[28].mxu0 %vm612_vm7, %v1699_v52 }
 0x670   : > { %4878 = vmatprep.mubr.msk.f32.mxu0 %vm5312_vm0, %v5313_v6 }
 0x672   : > { %v1700_v53 = vld [vmem:[#allocation3 + $0x28] sm:$0xff] }
 0x673   : > { %4879 = vmatmul.mubr.msk.f32.gmra.mrb[30].mxu0 %vm612_vm7, %v1700_v53 }
 0x674   : > { %4881 = vmatprep.mubr.msk.f32.mxu0 %vm5312_vm0, %v5313_v6 }
 0x676   : > { %v1701_v54 = vld [vmem:[#allocation3 + $0x30] sm:$0x3] }
 0x677   : > { %4882 = vmatmul.mubr.msk.f32.gmra.mrb[32].mxu0 %vm612_vm7, %v1701_v54 }
 0x678   : > { %4929 = vmatprep.mubr.msk.f32.mxu0 %vm5312_vm0, %v5313_v6 }
 0x67d   : > { %v1929_v24 = vpop.permute.xlu0 %1928 }
 0x67e   : > { %v1924_v22 = vpop.permute.xlu1 %1923 }
 0x732   : > { %v1795_v62 = vpop.f32.mrb[20].mxu0 }
 0x733   : > { %v1796_v63 = vadd.f32 %v4440_v55, %v1795_v62  ;;  %v4865_v61 = vpop.f32.mrb[21].mxu0 }
 0x735   : > { %v1829_v1 = vmax.f32 %v1796_v63, 0.0 }
 0x736   : > { %v1800_v0 = vpop.f32.mrb[22].mxu0 }
 0x737   : > { %v1801_v2 = vadd.f32 %v4440_v55, %v1800_v0  ;;  %v4868_v4 = vpop.f32.mrb[23].mxu0  ;;  %v1850_v8 = vsel %vm333_vm1, %v1829_v1, 0.0 }
 0x739   : > { %v1830_v5 = vmax.f32 %v1801_v2, 0.0 }
 0x73a   : > { %v1805_v7 = vpop.f32.mrb[24].mxu0 }
 0x73b   : > { %v1851_v9 = vsel %vm333_vm1, %v1830_v5, 0.0  ;;  %v1806_v10 = vadd.f32 %v4440_v55, %v1805_v7  ;;  %v4871_v11 = vpop.f32.mrb[25].mxu0 }
 0x73c   : > { %v1852_v12 = vadd.f32 %v1851_v9, %v1850_v8 }
 0x73d   : > { %v1831_v13 = vmax.f32 %v1806_v10, 0.0 }
 0x73e   : > { %v1810_v14 = vpop.f32.mrb[26].mxu0 }
 0x73f   : > { %v1853_v15 = vsel %vm333_vm1, %v1831_v13, 0.0  ;;  %v1811_v16 = vadd.f32 %v4440_v55, %v1810_v14  ;;  %v4874_v17 = vpop.f32.mrb[27].mxu0 }
 0x740   : > { %v1854_v18 = vadd.f32 %v1853_v15, %v1852_v12 }
 0x741   : > { %v1832_v19 = vmax.f32 %v1811_v16, 0.0 }
 0x742   : > { %v1815_v23 = vpop.f32.mrb[28].mxu0 }
 0x743   : > { %v1855_v26 = vsel %vm333_vm1, %v1832_v19, 0.0  ;;  %v1816_v27 = vadd.f32 %v4440_v55, %v1815_v23  ;;  %v4877_v28 = vpop.f32.mrb[29].mxu0 }
 0x744   : > { %v1856_v29 = vadd.f32 %v1855_v26, %v1854_v18  ;;  %v1971_v28 = vpop.permute.xlu0 %1970 }
 0x745   : > { %v1833_v38 = vmax.f32 %v1816_v27, 0.0  ;;  %v1966_v27 = vpop.permute.xlu1 %1965 }
 0x746   : > { %v1820_v39 = vpop.f32.mrb[30].mxu0 }
 0x747   : > { %v1857_v40 = vsel %vm333_vm1, %v1833_v38, 0.0  ;;  %v1821_v41 = vadd.f32 %v4440_v55, %v1820_v39  ;;  %v4880_v42 = vpop.f32.mrb[31].mxu0 }
 0x748   : > { %v1858_v43 = vadd.f32 %v1857_v40, %v1856_v29  ;;  %v1976_v30 = vpop.permute.xlu0 %1975 }
 0x749   : > { %v1834_v44 = vmax.f32 %v1821_v41, 0.0  ;;  %v1934_v29 = vpop.permute.xlu1 %1933 }
 0x74a   : > { %v1825_v45 = vpop.f32.mrb[32].mxu0 }
 0x74b   : > { %v1859_v47 = vsel %vm333_vm1, %v1834_v44, 0.0  ;;  %v1826_v48 = vadd.f32 %v4440_v55, %v1825_v45  ;;  %v4883_v46 = vpop.f32.mrb[33].mxu0 }
 0x74c   : > { %v1860_v32 = vadd.f32 %v1859_v47, %v1858_v43  ;;  %v1981_v43 = vpop.permute.xlu0 %1980 }
 0x74d   : > { %v1835_v31 = vmax.f32 %v1826_v48, 0.0  ;;  %v1939_v40 = vpop.permute.xlu1 %1938 }
 0x74f   : > { %v1861_v33 = vsel %vm488_vm4, %v1835_v31, 0.0 }
 0x750   : > { %v1862_v34 = vadd.f32 %v1861_v33, %v1860_v32  ;;  %v1986_v48 = vpop.permute.xlu0 %1985 }
 0x751   : > { %v1944_v47 = vpop.permute.xlu1 %1943 }
 0x752   : > { %v1863_v35 = vrot.slane %v1862_v34, 4 }
 0x754   : > { %v1864_v36 = vadd.f32 %v1863_v35, %v1862_v34  ;;  %v1991_v32 = vpop.permute.xlu0 %1990 }
 0x755   : > { %v1949_v46 = vpop.permute.xlu1 %1948 }
 0x756   : > { %v1865_v37 = vrot.slane %v1864_v36, 2 }
 0x758   : > { %v1866_v56 = vadd.f32 %v1865_v37, %v1864_v36 }
 0x75a   : > { %v1867_v57 = vrot.slane %v1866_v56, 1 }
 0x75c   : > { %v1868_v58 = vadd.f32 %v1867_v57, %v1866_v56 }
 0x75e   : > { %v1869_v59 = vmul.f32 0.02, %v1868_v58  ;;  %v1954_v58 = vpop.permute.xlu1 %1953 }
 0x760   : > { %v1870_v60 = vsub.f32 %v1829_v1, %v1869_v59  ;;  %v1871_v49 = vsub.f32 %v1830_v5, %v1869_v59  ;;  %v1872_v50 = vsub.f32 %v1831_v13, %v1869_v59  ;;  %v1873_v51 = vsub.f32 %v1832_v19, %v1869_v59 }
 0x761   : > { %v1874_v52 = vsub.f32 %v1833_v38, %v1869_v59  ;;  %v1875_v53 = vsub.f32 %v1834_v44, %v1869_v59  ;;  %v1876_v54 = vsub.f32 %v1835_v31, %v1869_v59 }
 0x762   : > { %v1877_v55 = vmul.f32 %v1870_v60, %v1870_v60  ;;  %v1878_v62 = vmul.f32 %v1871_v49, %v1871_v49  ;;  %v1879_v63 = vmul.f32 %v1872_v50, %v1872_v50  ;;  %v1880_v61 = vmul.f32 %v1873_v51, %v1873_v51 }
 0x763   : > { %v1881_v7 = vmul.f32 %v1874_v52, %v1874_v52  ;;  %v1882_v1 = vmul.f32 %v1875_v53, %v1875_v53  ;;  %v1883_v11 = vmul.f32 %v1876_v54, %v1876_v54 }
 0x764   : > { %v1884_v0 = vsel %vm333_vm1, %v1877_v55, 0.0  ;;  %v1885_v2 = vsel %vm333_vm1, %v1878_v62, 0.0  ;;  %v1887_v8 = vsel %vm333_vm1, %v1879_v63, 0.0  ;;  %v1889_v5 = vsel %vm333_vm1, %v1880_v61, 0.0  ;;  %v4452_v61 = vld [vmem:[%s6778_s3 + $0x50] sm:$0xff] }
 0x765   : > { %v1886_v4 = vadd.f32 %v1885_v2, %v1884_v0  ;;  %v1891_v12 = vsel %vm333_vm1, %v1881_v7, 0.0  ;;  %v1893_v14 = vsel %vm333_vm1, %v1882_v1, 0.0  ;;  %v1895_v16 = vsel %vm488_vm4, %v1883_v11, 0.0  ;;  %v4453_v0 = vld [vmem:[%s6778_s3 + $0x58] sm:$0xff] }
 0x767   : > { %v1888_v9 = vadd.f32 %v1887_v8, %v1886_v4 }
 0x769   : > { %v1890_v10 = vadd.f32 %v1889_v5, %v1888_v9 }
 0x76b   : > { %v1892_v13 = vadd.f32 %v1891_v12, %v1890_v10 }
 0x76d   : > { %v1894_v15 = vadd.f32 %v1893_v14, %v1892_v13 }
 0x76f   : > { %v1896_v17 = vadd.f32 %v1895_v16, %v1894_v15 }
 0x771   : > { %v1897_v18 = vrot.slane %v1896_v17, 4 }
 0x773   : > { %v1898_v19 = vadd.f32 %v1897_v18, %v1896_v17 }
 0x775   : > { %v1899_v20 = vrot.slane %v1898_v19, 2 }
 0x777   : > { %v1900_v21 = vadd.f32 %v1899_v20, %v1898_v19 }
 0x779   : > { %v1901_v23 = vrot.slane %v1900_v21, 1 }
 0x77b   : > { %v1902_v25 = vadd.f32 %v1901_v23, %v1900_v21 }
 0x77d   : > { %v1903_v26 = vmul.f32 0.020408163, %v1902_v25 }
 0x77f   : > { %5291 = vrsqrt.f32 %v1903_v26  ;;  %vm1906_vm14 = vcmp.eq.f32.partialorder %v1903_v26, inf  ;;  %v1909_v41 = vand.u32 2147483648, %v1903_v26  ;;  %vm1908_vm15 = vcmp.eq.f32.partialorder %v1903_v26, 0.0 }
 0x789   : > { %v5292_v38 = vpop.eup %5291 }
 0x78a   : > { %v1905_v39 = vmul.f32 %v5292_v38, %v1903_v26 }
 0x78c   : > { %v1907_v42 = vsel %vm1906_vm14, %v1903_v26, %v1905_v39 }
 0x78d   : > { %v1910_v44 = vsel %vm1908_vm15, %v1909_v41, %v1907_v42 }
 0x78e   : > { %v1911_v45 = vadd.f32 1e-06, %v1910_v44 }
 0x790   : > { %5293 = vrcp.f32 %v1911_v45 }
 0x79a   : > { %v5294_v31 = vpop.eup %5293 }
 0x79b   : > { %v1914_v33 = vmul.f32 %v5294_v31, %v1870_v60  ;;  %v1915_v34 = vmul.f32 %v5294_v31, %v1871_v49  ;;  %v1916_v35 = vmul.f32 %v5294_v31, %v1872_v50  ;;  %v1917_v36 = vmul.f32 %v5294_v31, %v1873_v51 }
 0x79c   : > { %v1918_v37 = vmul.f32 %v5294_v31, %v1874_v52  ;;  %v1919_v56 = vmul.f32 %v5294_v31, %v1875_v53  ;;  %v1920_v57 = vmul.f32 %v5294_v31, %v1876_v54  ;;  %v5197_v51 = vpack.c.bf16 %v4453_v0, %v4452_v61  ;;  %v1996_v52 = vpop.permute.xlu0 %1995  ;;  %v4455_v61 = vld [vmem:[%s6779_s4 + $0x1] ss:$0 sm:$0xff] }
 0x79d   : > { %v1956_v59 = vmul.f32 %v1924_v22, %v1914_v33  ;;  %v1957_v55 = vmul.f32 %v1929_v24, %v1915_v34  ;;  %v1958_v62 = vmul.f32 %v1934_v29, %v1916_v35  ;;  %v1959_v63 = vmul.f32 %v1939_v40, %v1917_v36  ;;  %v4467_v0 = vld [vmem:[%s6778_s3 + $0x80] sm:$0xff] }
 0x79e   : > { %v1960_v60 = vmul.f32 %v1944_v47, %v1918_v37  ;;  %v1961_v49 = vmul.f32 %v1949_v46, %v1919_v56  ;;  %v1962_v50 = vmul.f32 %v1954_v58, %v1920_v57  ;;  %5198 = vmatpush3.bf16.msra.mxu1 %v5197_v51  ;;  %v4463_v57 = vld [vmem:[%s6778_s3 + $0x60] sm:$0xff]  ;;  %v4464_v58 = vld [vmem:[%s6778_s3 + $0x68] sm:$0xff] }
 0x79f   : > { %v1998_v53 = vadd.f32 %v1966_v27, %v1956_v59  ;;  %v1999_v54 = vadd.f32 %v1971_v28, %v1957_v55  ;;  %v2000_v2 = vadd.f32 %v1976_v30, %v1958_v62  ;;  %v2001_v4 = vadd.f32 %v1981_v43, %v1959_v63  ;;  %5208 = vmatprep.subr.bf16.mxu1 %v5311_v3  ;;  %v4465_v59 = vld [vmem:[%s6778_s3 + $0x70] sm:$0xff]  ;;  %v4466_v62 = vld [vmem:[%s6778_s3 + $0x78] sm:$0xff] }
 0x7a0   : > { %v2002_v7 = vadd.f32 %v1986_v48, %v1960_v60  ;;  %v2003_v8 = vadd.f32 %v1991_v32, %v1961_v49  ;;  %v2004_v9 = vadd.f32 %v1996_v52, %v1962_v50  ;;  %v5200_v55 = vpack.c.bf16 %v4464_v58, %v4463_v57  ;;  %v4468_v60 = vld [vmem:[%s6778_s3 + $0x88] sm:$0xff] }
 0x7a1   : > { %2005 = vst.msk [vmem:[#allocation2 + $0x2] sm:$0xff] %vm333_vm1, %v1998_v53  ;;  %2006 = vst.msk [vmem:[#allocation2 + $0xa] sm:$0xff] %vm333_vm1, %v1999_v54  ;;  %v5203_v63 = vpack.c.bf16 %v4466_v62, %v4465_v59  ;;  %v5206_v49 = vpack.c.bf16 %v4468_v60, %v4467_v0 }
 0x7a2   : > { %2007 = vst.msk [vmem:[#allocation2 + $0x12] sm:$0xff] %vm333_vm1, %v2000_v2  ;;  %2008 = vst.msk [vmem:[#allocation2 + $0x1a] sm:$0xff] %vm333_vm1, %v2001_v4  ;;  %5201 = vmatpush3.bf16.msra.mxu0 %v5200_v55 }
 0x7a3   : > { %2009 = vst.msk [vmem:[#allocation2 + $0x22] sm:$0xff] %vm333_vm1, %v2002_v7  ;;  %2010 = vst.msk [vmem:[#allocation2 + $0x2a] sm:$0xff] %vm333_vm1, %v2003_v8  ;;  %5202 = vmatprep.subr.bf16.mxu0 %v5311_v3 }
 0x7a4   : > { %2011 = vst.msk [vmem:[#allocation2 + $0x32] sm:$0x3] %vm488_vm4, %v2004_v9 }
 0x7a6   : > { %5204 = vmatpush3.bf16.msra.mxu0 %v5203_v63 }
 0x7a7   : > { %5205 = vmatprep.subr.bf16.mxu0 %v5311_v3 }
 0x7a8   : > { %v2068_v1 = vld [vmem:[#allocation2 + $0x3] sm:$0xff] }
 0x7a9   : > { %v2026_v5 = vld [vmem:[#allocation2 + $0x2] sm:$0xff]  ;;  %2082 = vrot.lane.b32.xlu0 %v2068_v1, %s5315_s20  ;;  %v2069_v10 = vld [vmem:[#allocation2 + $0xb] sm:$0xff]  ;;  %v2015_v15 = vld [vmem:[#allocation2 + $0x19] sm:$0xff] }
 0x7aa   : > { %2040 = vrot.lane.b32.xlu1 %v2026_v5, %s5314_s18  ;;  %v2027_v11 = vld [vmem:[#allocation2 + $0xa] sm:$0xff]  ;;  %v2012_v12 = vld [vmem:[#allocation2 + $0x1] sm:$0xff]  ;;  %2022 = vst.msk [vmem:[#allocation3 + $0x18] sm:$0xff] %vm333_vm1, %v2015_v15  ;;  %v2070_v19 = vld [vmem:[#allocation2 + $0x13] sm:$0xff]  ;;  %5207 = vmatpush3.bf16.msra.mxu0 %v5206_v49 }
 0x7ab   : > { %2019 = vst.msk [vmem:[#allocation3] sm:$0xff] %vm333_vm1, %v2012_v12  ;;  %v2013_v13 = vld [vmem:[#allocation2 + $0x9] sm:$0xff]  ;;  %v2014_v14 = vld [vmem:[#allocation2 + $0x11] sm:$0xff]  ;;  %v2016_v16 = vld [vmem:[#allocation2 + $0x21] sm:$0xff]  ;;  %5217 = vmatprep.subr.bf16.mxu0 %v5311_v3 }
 0x7ac   : > { %2020 = vst.msk [vmem:[#allocation3 + $0x8] sm:$0xff] %vm333_vm1, %v2013_v13  ;;  %2021 = vst.msk [vmem:[#allocation3 + $0x10] sm:$0xff] %vm333_vm1, %v2014_v14  ;;  %v2017_v17 = vld [vmem:[#allocation2 + $0x29] sm:$0xff]  ;;  %v2018_v18 = vld [vmem:[#allocation2 + $0x31] sm:$0x3] }
 0x7ad   : > { %2084 = vrot.lane.b32.xlu0 %v2069_v10, %s5315_s20  ;;  %2023 = vst.msk [vmem:[#allocation3 + $0x20] sm:$0xff] %vm333_vm1, %v2016_v16  ;;  %2024 = vst.msk [vmem:[#allocation3 + $0x28] sm:$0xff] %vm333_vm1, %v2017_v17  ;;  %v2028_v20 = vld [vmem:[#allocation2 + $0x12] sm:$0xff]  ;;  %v2071_v21 = vld [vmem:[#allocation2 + $0x1b] sm:$0xff] }
 0x7ae   : > { %2042 = vrot.lane.b32.xlu1 %v2027_v11, %s5314_s18  ;;  %2025 = vst.msk [vmem:[#allocation3 + $0x30] sm:$0x3] %vm488_vm4, %v2018_v18  ;;  %v2029_v22 = vld [vmem:[#allocation2 + $0x1a] sm:$0xff]  ;;  %v2072_v23 = vld [vmem:[#allocation2 + $0x23] sm:$0xff]  ;;  %v2073_v25 = vld [vmem:[#allocation2 + $0x2b] sm:$0xff] }
 0x7af   : > { %v2030_v24 = vld [vmem:[#allocation2 + $0x22] sm:$0xff]  ;;  %v2031_v26 = vld [vmem:[#allocation2 + $0x2a] sm:$0xff]  ;;  %v2074_v27 = vld [vmem:[#allocation2 + $0x33] sm:$0x3] }
 0x7b0   : > { %v2032_v28 = vld [vmem:[#allocation2 + $0x32] sm:$0x3] }
 0x7b1   : > { %2086 = vrot.lane.b32.xlu0 %v2070_v19, %s5315_s20 }
 0x7b2   : > { %2044 = vrot.lane.b32.xlu1 %v2028_v20, %s5314_s18 }
 0x7b5   : > { %2088 = vrot.lane.b32.xlu0 %v2071_v21, %s5315_s20 }
 0x7b6   : > { %2046 = vrot.lane.b32.xlu1 %v2029_v22, %s5314_s18 }
 0x7b9   : > { %2090 = vrot.lane.b32.xlu0 %v2072_v23, %s5315_s20 }
 0x7ba   : > { %2048 = vrot.lane.b32.xlu1 %v2030_v24, %s5314_s18 }
 0x7bd   : > { %2092 = vrot.lane.b32.xlu0 %v2073_v25, %s5315_s20 }
 0x7be   : > { %2050 = vrot.lane.b32.xlu1 %v2031_v26, %s5314_s18 }
 0x7c1   : > { %2094 = vrot.lane.b32.xlu0 %v2074_v27, %s5315_s20 }
 0x7c2   : > { %2052 = vrot.lane.b32.xlu1 %v2032_v28, %s5314_s18 }
 0x81b   : > { %v2083_v29 = vpop.permute.xlu0 %2082 }
 0x81c   : > { %v2041_v30 = vpop.permute.xlu1 %2040 }
 0x81d   : > { %2061 = vst.msk [vmem:[#allocation3] sm:$0xff] %vm539_vm5, %v2041_v30 }
 0x81e   : > { %2103 = vst.msk [vmem:[#allocation3] sm:$0xff] %vm583_vm6, %v2083_v29 }
 0x81f   : > { %v2085_v38 = vpop.permute.xlu0 %2084 }
 0x820   : > { %v2043_v39 = vpop.permute.xlu1 %2042 }
 0x821   : > { %2062 = vst.msk [vmem:[#allocation3 + $0x8] sm:$0xff] %vm539_vm5, %v2043_v39 }
 0x822   : > { %2104 = vst.msk [vmem:[#allocation3 + $0x8] sm:$0xff] %vm583_vm6, %v2085_v38 }
 0x823   : > { %v2087_v40 = vpop.permute.xlu0 %2086 }
 0x824   : > { %v2045_v41 = vpop.permute.xlu1 %2044 }
 0x825   : > { %2063 = vst.msk [vmem:[#allocation3 + $0x10] sm:$0xff] %vm539_vm5, %v2045_v41  ;;  %v2117_v42 = vld [vmem:[#allocation3] sm:$0xff] }
 0x826   : > { %2105 = vst.msk [vmem:[#allocation3 + $0x10] sm:$0xff] %vm583_vm6, %v2087_v40  ;;  %4897 = vmatmul.mubr.msk.f32.vlgmr.msra.gmra.mrb[36].mxu1 %vm612_vm7, %v2117_v42 }
 0x827   : > { %4899 = vmatprep.mubr.msk.f32.mxu1 %vm5312_vm0, %v5313_v6  ;;  %v2089_v43 = vpop.permute.xlu0 %2088 }
 0x828   : > { %v2047_v44 = vpop.permute.xlu1 %2046 }
 0x829   : > { %2064 = vst.msk [vmem:[#allocation3 + $0x18] sm:$0xff] %vm539_vm5, %v2047_v44  ;;  %v2118_v45 = vld [vmem:[#allocation3 + $0x8] sm:$0xff] }
 0x82a   : > { %2106 = vst.msk [vmem:[#allocation3 + $0x18] sm:$0xff] %vm583_vm6, %v2089_v43  ;;  %4900 = vmatmul.mubr.msk.f32.gmra.mrb[38].mxu1 %vm612_vm7, %v2118_v45 }
 0x82b   : > { %4902 = vmatprep.mubr.msk.f32.mxu1 %vm5312_vm0, %v5313_v6  ;;  %v2091_v47 = vpop.permute.xlu0 %2090 }
 0x82c   : > { %v2049_v48 = vpop.permute.xlu1 %2048 }
 0x82d   : > { %2065 = vst.msk [vmem:[#allocation3 + $0x20] sm:$0xff] %vm539_vm5, %v2049_v48  ;;  %v2119_v46 = vld [vmem:[#allocation3 + $0x10] sm:$0xff] }
 0x82e   : > { %2107 = vst.msk [vmem:[#allocation3 + $0x20] sm:$0xff] %vm583_vm6, %v2091_v47  ;;  %4903 = vmatmul.mubr.msk.f32.gmra.mrb[40].mxu1 %vm612_vm7, %v2119_v46  ;;  %v2320_v47 = vld [vmem:[#allocation2 + $0x34] sm:$0x3] }
 0x82f   : > { %4905 = vmatprep.mubr.msk.f32.mxu1 %vm5312_vm0, %v5313_v6  ;;  %v2093_v32 = vpop.permute.xlu0 %2092 }
 0x830   : > { %v2051_v31 = vpop.permute.xlu1 %2050 }
 0x831   : > { %2066 = vst.msk [vmem:[#allocation3 + $0x28] sm:$0xff] %vm539_vm5, %v2051_v31  ;;  %v2120_v33 = vld [vmem:[#allocation3 + $0x18] sm:$0xff] }
 0x832   : > { %2108 = vst.msk [vmem:[#allocation3 + $0x28] sm:$0xff] %vm583_vm6, %v2093_v32  ;;  %4906 = vmatmul.mubr.msk.f32.gmra.mrb[42].mxu1 %vm612_vm7, %v2120_v33 }
 0x833   : > { %4908 = vmatprep.mubr.msk.f32.mxu1 %vm5312_vm0, %v5313_v6  ;;  %v2095_v34 = vpop.permute.xlu0 %2094 }
 0x834   : > { %v2053_v35 = vpop.permute.xlu1 %2052 }
 0x835   : > { %2067 = vst.msk [vmem:[#allocation3 + $0x30] sm:$0x3] %vm546_vm8, %v2053_v35  ;;  %v2121_v36 = vld [vmem:[#allocation3 + $0x20] sm:$0xff] }
 0x836   : > { %2109 = vst.msk [vmem:[#allocation3 + $0x30] sm:$0x3] %vm590_vm9, %v2095_v34  ;;  %4909 = vmatmul.mubr.msk.f32.gmra.mrb[44].mxu1 %vm612_vm7, %v2121_v36 }
 0x837   : > { %4911 = vmatprep.mubr.msk.f32.mxu1 %vm5312_vm0, %v5313_v6 }
 0x839   : > { %v2122_v37 = vld [vmem:[#allocation3 + $0x28] sm:$0xff] }
 0x83a   : > { %4912 = vmatmul.mubr.msk.f32.gmra.mrb[46].mxu1 %vm612_vm7, %v2122_v37 }
 0x83b   : > { %4914 = vmatprep.mubr.msk.f32.mxu1 %vm5312_vm0, %v5313_v6 }
 0x83d   : > { %v2123_v56 = vld [vmem:[#allocation3 + $0x30] sm:$0x3] }
 0x83e   : > { %4915 = vmatmul.mubr.msk.f32.gmra.mrb[48].mxu1 %vm612_vm7, %v2123_v56 }
 0x83f   : > { %4962 = vmatprep.mubr.msk.f32.mxu1 %vm5312_vm0, %v5313_v6 }
 0x8f9   : > { %v2217_v50 = vpop.f32.mrb[36].mxu1 }
 0x8fa   : > { %v2218_v51 = vadd.f32 %v4455_v61, %v2217_v50  ;;  %v4898_v52 = vpop.f32.mrb[37].mxu1 }
 0x8fb   : > { %v2603_v52 = vld [vmem:[%s6778_s3 + $0x8] sm:$0xff] }
 0x8fc   : > { %2251 = vst.msk [vmem:[#allocation2 + $0x2] sm:$0xff] %vm333_vm1, %v2218_v51  ;;  %v2602_v51 = vld [vmem:[%s6778_s3] sm:$0xff] }
 0x8fd   : > { %v2222_v53 = vpop.f32.mrb[38].mxu1 }
 0x8fe   : > { %v2223_v54 = vadd.f32 %v4455_v61, %v2222_v53  ;;  %v4901_v2 = vpop.f32.mrb[39].mxu1  ;;  %v2604_v53 = vld [vmem:[%s6778_s3 + $0x10] sm:$0xff] }
 0x8ff   : > { %v2605_v2 = vld [vmem:[%s6778_s3 + $0x18] sm:$0xff] }
 0x900   : > { %2252 = vst.msk [vmem:[#allocation2 + $0xa] sm:$0xff] %vm333_vm1, %v2223_v54  ;;  %v5209_v54 = vpack.c.bf16 %v2603_v52, %v2602_v51  ;;  %v2755_v51 = vld [vmem:[%s6780_s5 + $0x28] sm:$0xff] }
 0x901   : > { %v2227_v4 = vpop.f32.mrb[40].mxu1  ;;  %v2762_v52 = vld [vmem:[%s6781_s6 + $0x28] sm:$0xff] }
 0x902   : > { %v2228_v7 = vadd.f32 %v4455_v61, %v2227_v4  ;;  %v4904_v8 = vpop.f32.mrb[41].mxu1  ;;  %5210 = vmatpush3.bf16.msra.mxu1 %v5209_v54  ;;  %v5212_v4 = vpack.c.bf16 %v2605_v2, %v2604_v53  ;;  %v2756_v53 = vld [vmem:[%s6780_s5 + $0x30] sm:$0x3] }
 0x903   : > { %v2272_v9 = vld [vmem:[#allocation2 + $0x2] sm:$0xff]  ;;  %5211 = vmatprep.subr.bf16.mxu1 %v5311_v3  ;;  %v2763_v54 = vld [vmem:[%s6781_s6 + $0x30] sm:$0x3] }
 0x904   : > { %v2258_v1 = vld [vmem:[#allocation2] sm:$0xff]  ;;  %2253 = vst.msk [vmem:[#allocation2 + $0x12] sm:$0xff] %vm333_vm1, %v2228_v7  ;;  %2286 = vrot.lane.b32.xlu1 %v2272_v9, %s5314_s18  ;;  %v2607_v9 = vld [vmem:[%s6778_s3 + $0x28] sm:$0xff] }
 0x905   : > { %2265 = vst.msk [vmem:[#allocation3] sm:$0xff] %vm333_vm1, %v2258_v1  ;;  %v2232_v5 = vpop.f32.mrb[42].mxu1  ;;  %v4470_v7 = vld [vmem:[%s6779_s4 + $0x2] ss:$0 sm:$0xff] }
 0x906   : > { %v2233_v10 = vadd.f32 %v4455_v61, %v2232_v5  ;;  %v4907_v11 = vpop.f32.mrb[43].mxu1  ;;  %5213 = vmatpush3.bf16.msra.mxu1 %v5212_v4  ;;  %v2606_v8 = vld [vmem:[%s6778_s3 + $0x20] sm:$0xff] }
 0x907   : > { %v2314_v12 = vld [vmem:[#allocation2 + $0x4] sm:$0xff]  ;;  %5214 = vmatprep.subr.bf16.mxu1 %v5311_v3  ;;  %v5215_v1 = vpack.c.bf16 %v2607_v9, %v2606_v8 }
 0x908   : > { %v2273_v13 = vld [vmem:[#allocation2 + $0xa] sm:$0xff]  ;;  %2254 = vst.msk [vmem:[#allocation2 + $0x1a] sm:$0xff] %vm333_vm1, %v2233_v10  ;;  %2328 = vrot.lane.b32.xlu0 %v2314_v12, %s5315_s20 }
 0x909   : > { %v2259_v14 = vld [vmem:[#allocation2 + $0x8] sm:$0xff]  ;;  %2288 = vrot.lane.b32.xlu1 %v2273_v13, %s5314_s18  ;;  %v2237_v15 = vpop.f32.mrb[44].mxu1 }
 0x90a   : > { %2266 = vst.msk [vmem:[#allocation3 + $0x8] sm:$0xff] %vm333_vm1, %v2259_v14  ;;  %v2238_v16 = vadd.f32 %v4455_v61, %v2237_v15  ;;  %v4910_v17 = vpop.f32.mrb[45].mxu1  ;;  %5216 = vmatpush3.bf16.msra.mxu1 %v5215_v1 }
 0x90b   : > { %v2315_v18 = vld [vmem:[#allocation2 + $0xc] sm:$0xff]  ;;  %5226 = vmatprep.subr.bf16.mxu1 %v5311_v3 }
 0x90c   : > { %v2274_v19 = vld [vmem:[#allocation2 + $0x12] sm:$0xff]  ;;  %2255 = vst.msk [vmem:[#allocation2 + $0x22] sm:$0xff] %vm333_vm1, %v2238_v16  ;;  %2330 = vrot.lane.b32.xlu0 %v2315_v18, %s5315_s20 }
 0x90d   : > { %v2260_v20 = vld [vmem:[#allocation2 + $0x10] sm:$0xff]  ;;  %2290 = vrot.lane.b32.xlu1 %v2274_v19, %s5314_s18  ;;  %v2242_v21 = vpop.f32.mrb[46].mxu1 }
 0x90e   : > { %2267 = vst.msk [vmem:[#allocation3 + $0x10] sm:$0xff] %vm333_vm1, %v2260_v20  ;;  %v2243_v22 = vadd.f32 %v4455_v61, %v2242_v21  ;;  %v4913_v23 = vpop.f32.mrb[47].mxu1 }
 0x90f   : > { %v2316_v24 = vld [vmem:[#allocation2 + $0x14] sm:$0xff] }
 0x910   : > { %v2275_v25 = vld [vmem:[#allocation2 + $0x1a] sm:$0xff]  ;;  %2256 = vst.msk [vmem:[#allocation2 + $0x2a] sm:$0xff] %vm333_vm1, %v2243_v22  ;;  %2332 = vrot.lane.b32.xlu0 %v2316_v24, %s5315_s20 }
 0x911   : > { %v2261_v26 = vld [vmem:[#allocation2 + $0x18] sm:$0xff]  ;;  %2292 = vrot.lane.b32.xlu1 %v2275_v25, %s5314_s18  ;;  %v2247_v27 = vpop.f32.mrb[48].mxu1 }
 0x912   : > { %2268 = vst.msk [vmem:[#allocation3 + $0x18] sm:$0xff] %vm333_vm1, %v2261_v26  ;;  %v2248_v28 = vadd.f32 %v4455_v61, %v2247_v27  ;;  %v4916_v29 = vpop.f32.mrb[49].mxu1 }
 0x913   : > { %v2317_v30 = vld [vmem:[#allocation2 + $0x1c] sm:$0xff] }
 0x914   : > { %v2276_v38 = vld [vmem:[#allocation2 + $0x22] sm:$0xff]  ;;  %2257 = vst.msk [vmem:[#allocation2 + $0x32] sm:$0x3] %vm488_vm4, %v2248_v28  ;;  %2334 = vrot.lane.b32.xlu0 %v2317_v30, %s5315_s20 }
 0x915   : > { %v2262_v39 = vld [vmem:[#allocation2 + $0x20] sm:$0xff]  ;;  %2294 = vrot.lane.b32.xlu1 %v2276_v38, %s5314_s18 }
 0x916   : > { %2269 = vst.msk [vmem:[#allocation3 + $0x20] sm:$0xff] %vm333_vm1, %v2262_v39 }
 0x917   : > { %v2318_v40 = vld [vmem:[#allocation2 + $0x24] sm:$0xff]  ;;  %v2264_v43 = vld [vmem:[#allocation2 + $0x30] sm:$0x3] }
 0x918   : > { %v2277_v41 = vld [vmem:[#allocation2 + $0x2a] sm:$0xff]  ;;  %2336 = vrot.lane.b32.xlu0 %v2318_v40, %s5315_s20  ;;  %2271 = vst.msk [vmem:[#allocation3 + $0x30] sm:$0x3] %vm488_vm4, %v2264_v43 }
 0x919   : > { %v2263_v42 = vld [vmem:[#allocation2 + $0x28] sm:$0xff]  ;;  %2296 = vrot.lane.b32.xlu1 %v2277_v41, %s5314_s18 }
 0x91a   : > { %2270 = vst.msk [vmem:[#allocation3 + $0x28] sm:$0xff] %vm333_vm1, %v2263_v42 }
 0x91b   : > { %v2319_v44 = vld [vmem:[#allocation2 + $0x2c] sm:$0xff] }
 0x91c   : > { %v2278_v45 = vld [vmem:[#allocation2 + $0x32] sm:$0x3]  ;;  %2338 = vrot.lane.b32.xlu0 %v2319_v44, %s5315_s20 }
 0x91d   : > { %2298 = vrot.lane.b32.xlu1 %v2278_v45, %s5314_s18 }
 0x920   : > { %2340 = vrot.lane.b32.xlu0 %v2320_v47, %s5315_s20 }
 0x976   : > { %v2287_v48 = vpop.permute.xlu1 %2286 }
 0x977   : > { %2307 = vst.msk [vmem:[#allocation3] sm:$0xff] %vm539_vm5, %v2287_v48 }
 0x97a   : > { %v2329_v46 = vpop.permute.xlu0 %2328 }
 0x97b   : > { %v2289_v32 = vpop.permute.xlu1 %2288  ;;  %2349 = vst.msk [vmem:[#allocation3] sm:$0xff] %vm583_vm6, %v2329_v46 }
 0x97c   : > { %2308 = vst.msk [vmem:[#allocation3 + $0x8] sm:$0xff] %vm539_vm5, %v2289_v32 }
 0x97e   : > { %v2331_v31 = vpop.permute.xlu0 %2330 }
 0x97f   : > { %v2291_v33 = vpop.permute.xlu1 %2290  ;;  %2350 = vst.msk [vmem:[#allocation3 + $0x8] sm:$0xff] %vm583_vm6, %v2331_v31 }
 0x980   : > { %2309 = vst.msk [vmem:[#allocation3 + $0x10] sm:$0xff] %vm539_vm5, %v2291_v33 }
 0x982   : > { %v2333_v34 = vpop.permute.xlu0 %2332  ;;  %v2363_v36 = vld [vmem:[#allocation3] sm:$0xff] }
 0x983   : > { %v2293_v35 = vpop.permute.xlu1 %2292  ;;  %2351 = vst.msk [vmem:[#allocation3 + $0x10] sm:$0xff] %vm583_vm6, %v2333_v34  ;;  %4930 = vmatmul.mubr.msk.f32.vlgmr.msra.gmra.mrb[34].mxu0 %vm612_vm7, %v2363_v36 }
 0x984   : > { %2310 = vst.msk [vmem:[#allocation3 + $0x18] sm:$0xff] %vm539_vm5, %v2293_v35  ;;  %4932 = vmatprep.mubr.msk.f32.mxu0 %vm5312_vm0, %v5313_v6 }
 0x986   : > { %v2335_v37 = vpop.permute.xlu0 %2334  ;;  %v2364_v57 = vld [vmem:[#allocation3 + $0x8] sm:$0xff] }
 0x987   : > { %v2295_v56 = vpop.permute.xlu1 %2294  ;;  %2352 = vst.msk [vmem:[#allocation3 + $0x18] sm:$0xff] %vm583_vm6, %v2335_v37  ;;  %4933 = vmatmul.mubr.msk.f32.gmra.mrb[36].mxu0 %vm612_vm7, %v2364_v57  ;;  %v2750_v57 = vld [vmem:[%s6780_s5] sm:$0xff] }
 0x988   : > { %2311 = vst.msk [vmem:[#allocation3 + $0x20] sm:$0xff] %vm539_vm5, %v2295_v56  ;;  %4935 = vmatprep.mubr.msk.f32.mxu0 %vm5312_vm0, %v5313_v6 }
 0x98a   : > { %v2337_v58 = vpop.permute.xlu0 %2336  ;;  %v2365_v55 = vld [vmem:[#allocation3 + $0x10] sm:$0xff] }
 0x98b   : > { %v2297_v59 = vpop.permute.xlu1 %2296  ;;  %2353 = vst.msk [vmem:[#allocation3 + $0x20] sm:$0xff] %vm583_vm6, %v2337_v58  ;;  %4936 = vmatmul.mubr.msk.f32.gmra.mrb[38].mxu0 %vm612_vm7, %v2365_v55  ;;  %v2757_v55 = vld [vmem:[%s6781_s6] sm:$0xff] }
 0x98c   : > { %2312 = vst.msk [vmem:[#allocation3 + $0x28] sm:$0xff] %vm539_vm5, %v2297_v59  ;;  %4938 = vmatprep.mubr.msk.f32.mxu0 %vm5312_vm0, %v5313_v6  ;;  %v2751_v59 = vld [vmem:[%s6780_s5 + $0x8] sm:$0xff] }
 0x98e   : > { %v2339_v62 = vpop.permute.xlu0 %2338  ;;  %v2366_v61 = vld [vmem:[#allocation3 + $0x18] sm:$0xff] }
 0x98f   : > { %v2299_v63 = vpop.permute.xlu1 %2298  ;;  %2354 = vst.msk [vmem:[#allocation3 + $0x28] sm:$0xff] %vm583_vm6, %v2339_v62  ;;  %4939 = vmatmul.mubr.msk.f32.gmra.mrb[40].mxu0 %vm612_vm7, %v2366_v61  ;;  %v2758_v62 = vld [vmem:[%s6781_s6 + $0x8] sm:$0xff]  ;;  %v2759_v61 = vld [vmem:[%s6781_s6 + $0x10] sm:$0xff] }
 0x990   : > { %2313 = vst.msk [vmem:[#allocation3 + $0x30] sm:$0x3] %vm546_vm8, %v2299_v63  ;;  %4941 = vmatprep.mubr.msk.f32.mxu0 %vm5312_vm0, %v5313_v6  ;;  %v2752_v63 = vld [vmem:[%s6780_s5 + $0x10] sm:$0xff] }
 0x992   : > { %v2341_v0 = vpop.permute.xlu0 %2340  ;;  %v2367_v60 = vld [vmem:[#allocation3 + $0x20] sm:$0xff] }
 0x993   : > { %2355 = vst.msk [vmem:[#allocation3 + $0x30] sm:$0x3] %vm590_vm9, %v2341_v0  ;;  %4942 = vmatmul.mubr.msk.f32.gmra.mrb[42].mxu0 %vm612_vm7, %v2367_v60  ;;  %v2753_v0 = vld [vmem:[%s6780_s5 + $0x18] sm:$0xff] }
 0x994   : > { %4944 = vmatprep.mubr.msk.f32.mxu0 %vm5312_vm0, %v5313_v6  ;;  %v2760_v60 = vld [vmem:[%s6781_s6 + $0x18] sm:$0xff] }
 0x996   : > { %v2368_v49 = vld [vmem:[#allocation3 + $0x28] sm:$0xff] }
 0x997   : > { %4945 = vmatmul.mubr.msk.f32.gmra.mrb[44].mxu0 %vm612_vm7, %v2368_v49  ;;  %v2754_v49 = vld [vmem:[%s6780_s5 + $0x20] sm:$0xff] }
 0x998   : > { %4947 = vmatprep.mubr.msk.f32.mxu0 %vm5312_vm0, %v5313_v6 }
 0x99a   : > { %v2369_v50 = vld [vmem:[#allocation3 + $0x30] sm:$0x3] }
 0x99b   : > { %4948 = vmatmul.mubr.msk.f32.gmra.mrb[46].mxu0 %vm612_vm7, %v2369_v50  ;;  %v2761_v50 = vld [vmem:[%s6781_s6 + $0x20] sm:$0xff] }
 0x99c   : > { %4995 = vmatprep.mubr.msk.f32.mxu0 %vm5312_vm0, %v5313_v6 }
 0xa56   : > { %v2463_v5 = vpop.f32.mrb[34].mxu0 }
 0xa57   : > { %v2464_v10 = vadd.f32 %v4470_v7, %v2463_v5  ;;  %v4931_v11 = vpop.f32.mrb[35].mxu0 }
 0xa59   : > { %2497 = vst.msk [vmem:[#allocation2 + $0x2] sm:$0xff] %vm333_vm1, %v2464_v10 }
 0xa5a   : > { %v2468_v12 = vpop.f32.mrb[36].mxu0 }
 0xa5b   : > { %v2469_v13 = vadd.f32 %v4470_v7, %v2468_v12  ;;  %v4934_v14 = vpop.f32.mrb[37].mxu0 }
 0xa5d   : > { %2498 = vst.msk [vmem:[#allocation2 + $0xa] sm:$0xff] %vm333_vm1, %v2469_v13 }
 0xa5e   : > { %v2473_v15 = vpop.f32.mrb[38].mxu0 }
 0xa5f   : > { %v2474_v16 = vadd.f32 %v4470_v7, %v2473_v15  ;;  %v4937_v17 = vpop.f32.mrb[39].mxu0 }
 0xa60   : > { %v2518_v18 = vld [vmem:[#allocation2 + $0x2] sm:$0xff] }
 0xa61   : > { %v2504_v19 = vld [vmem:[#allocation2 + $0x1] sm:$0xff]  ;;  %2499 = vst.msk [vmem:[#allocation2 + $0x12] sm:$0xff] %vm333_vm1, %v2474_v16  ;;  %2532 = vrot.lane.b32.xlu1 %v2518_v18, %s5314_s18 }
 0xa62   : > { %2511 = vst.msk [vmem:[#allocation3] sm:$0xff] %vm333_vm1, %v2504_v19  ;;  %v2478_v20 = vpop.f32.mrb[40].mxu0 }
 0xa63   : > { %v2479_v21 = vadd.f32 %v4470_v7, %v2478_v20  ;;  %v4940_v22 = vpop.f32.mrb[41].mxu0 }
 0xa64   : > { %v2560_v23 = vld [vmem:[#allocation2 + $0x3] sm:$0xff] }
 0xa65   : > { %v2519_v24 = vld [vmem:[#allocation2 + $0xa] sm:$0xff]  ;;  %2500 = vst.msk [vmem:[#allocation2 + $0x1a] sm:$0xff] %vm333_vm1, %v2479_v21  ;;  %2574 = vrot.lane.b32.xlu0 %v2560_v23, %s5315_s20 }
 0xa66   : > { %v2505_v25 = vld [vmem:[#allocation2 + $0x9] sm:$0xff]  ;;  %2534 = vrot.lane.b32.xlu1 %v2519_v24, %s5314_s18  ;;  %v2483_v26 = vpop.f32.mrb[42].mxu0  ;;  %v4478_v24 = vld [vmem:[%s6779_s4] ss:$0 sm:$0xff] }
 0xa67   : > { %2512 = vst.msk [vmem:[#allocation3 + $0x8] sm:$0xff] %vm333_vm1, %v2505_v25  ;;  %v2484_v27 = vadd.f32 %v4470_v7, %v2483_v26  ;;  %v4943_v28 = vpop.f32.mrb[43].mxu0 }
 0xa68   : > { %v2561_v29 = vld [vmem:[#allocation2 + $0xb] sm:$0xff] }
 0xa69   : > { %v2520_v30 = vld [vmem:[#allocation2 + $0x12] sm:$0xff]  ;;  %2501 = vst.msk [vmem:[#allocation2 + $0x22] sm:$0xff] %vm333_vm1, %v2484_v27  ;;  %2576 = vrot.lane.b32.xlu0 %v2561_v29, %s5315_s20 }
 0xa6a   : > { %v2506_v38 = vld [vmem:[#allocation2 + $0x11] sm:$0xff]  ;;  %2536 = vrot.lane.b32.xlu1 %v2520_v30, %s5314_s18  ;;  %v2488_v39 = vpop.f32.mrb[44].mxu0 }
 0xa6b   : > { %2513 = vst.msk [vmem:[#allocation3 + $0x10] sm:$0xff] %vm333_vm1, %v2506_v38  ;;  %v2489_v40 = vadd.f32 %v4470_v7, %v2488_v39  ;;  %v4946_v41 = vpop.f32.mrb[45].mxu0 }
 0xa6c   : > { %v2562_v42 = vld [vmem:[#allocation2 + $0x13] sm:$0xff] }
 0xa6d   : > { %v2521_v43 = vld [vmem:[#allocation2 + $0x1a] sm:$0xff]  ;;  %2502 = vst.msk [vmem:[#allocation2 + $0x2a] sm:$0xff] %vm333_vm1, %v2489_v40  ;;  %2578 = vrot.lane.b32.xlu0 %v2562_v42, %s5315_s20 }
 0xa6e   : > { %v2507_v44 = vld [vmem:[#allocation2 + $0x19] sm:$0xff]  ;;  %2538 = vrot.lane.b32.xlu1 %v2521_v43, %s5314_s18  ;;  %v2493_v45 = vpop.f32.mrb[46].mxu0 }
 0xa6f   : > { %2514 = vst.msk [vmem:[#allocation3 + $0x18] sm:$0xff] %vm333_vm1, %v2507_v44  ;;  %v2494_v47 = vadd.f32 %v4470_v7, %v2493_v45  ;;  %v4949_v48 = vpop.f32.mrb[47].mxu0 }
 0xa70   : > { %v2563_v46 = vld [vmem:[#allocation2 + $0x1b] sm:$0xff] }
 0xa71   : > { %v2522_v32 = vld [vmem:[#allocation2 + $0x22] sm:$0xff]  ;;  %2503 = vst.msk [vmem:[#allocation2 + $0x32] sm:$0x3] %vm488_vm4, %v2494_v47  ;;  %2580 = vrot.lane.b32.xlu0 %v2563_v46, %s5315_s20 }
 0xa72   : > { %v2508_v31 = vld [vmem:[#allocation2 + $0x21] sm:$0xff]  ;;  %2540 = vrot.lane.b32.xlu1 %v2522_v32, %s5314_s18 }
 0xa73   : > { %2515 = vst.msk [vmem:[#allocation3 + $0x20] sm:$0xff] %vm333_vm1, %v2508_v31 }
 0xa74   : > { %v2564_v33 = vld [vmem:[#allocation2 + $0x23] sm:$0xff] }
 0xa75   : > { %v2523_v34 = vld [vmem:[#allocation2 + $0x2a] sm:$0xff]  ;;  %2582 = vrot.lane.b32.xlu0 %v2564_v33, %s5315_s20 }
 0xa76   : > { %v2509_v35 = vld [vmem:[#allocation2 + $0x29] sm:$0xff]  ;;  %2542 = vrot.lane.b32.xlu1 %v2523_v34, %s5314_s18 }
 0xa77   : > { %2516 = vst.msk [vmem:[#allocation3 + $0x28] sm:$0xff] %vm333_vm1, %v2509_v35  ;;  %v4486_v35 = vld [vmem:[%s6778_s3 + $0x30] sm:$0xff] }
 0xa78   : > { %v2565_v36 = vld [vmem:[#allocation2 + $0x2b] sm:$0xff]  ;;  %v2566_v58 = vld [vmem:[#allocation2 + $0x33] sm:$0x3] }
 0xa79   : > { %v2524_v37 = vld [vmem:[#allocation2 + $0x32] sm:$0x3]  ;;  %2584 = vrot.lane.b32.xlu0 %v2565_v36, %s5315_s20  ;;  %v4487_v36 = vld [vmem:[%s6778_s3 + $0x38] sm:$0xff] }
 0xa7a   : > { %2544 = vrot.lane.b32.xlu1 %v2524_v37, %s5314_s18  ;;  %v2510_v56 = vld [vmem:[#allocation2 + $0x31] sm:$0x3]  ;;  %v4488_v37 = vld [vmem:[%s6778_s3 + $0x40] sm:$0xff] }
 0xa7b   : > { %2517 = vst.msk [vmem:[#allocation3 + $0x30] sm:$0x3] %vm488_vm4, %v2510_v56 }
 0xa7d   : > { %2586 = vrot.lane.b32.xlu0 %v2566_v58, %s5315_s20  ;;  %v4489_v58 = vld [vmem:[%s6778_s3 + $0x48] sm:$0xff] }
 0xa7e   : > { %2837 = vperm.xlu1 %5282, %v2750_v57   ;;  %v5218_v57 = vpack.c.bf16 %v4487_v36, %v4486_v35 }
 0xa80   : > { %5219 = vmatpush3.bf16.msra.mxu0 %v5218_v57 }
 0xa81   : > { %2842 = vperm.xlu0 %5281, %v2751_v59   ;;  %5220 = vmatprep.subr.bf16.mxu0 %v5311_v3 }
 0xa82   : > { %2879 = vperm.xlu1 %5282, %v2757_v55  }
 0xa85   : > { %2884 = vperm.xlu0 %5281, %v2758_v62  }
 0xa86   : > { %2847 = vperm.xlu1 %5282, %v2752_v63  }
 0xa89   : > { %2889 = vperm.xlu0 %5281, %v2759_v61   ;;  %v5221_v61 = vpack.c.bf16 %v4489_v58, %v4488_v37 }
 0xa8a   : > { %2852 = vperm.xlu1 %5282, %v2753_v0  }
 0xa8b   : > { %5222 = vmatpush3.bf16.msra.mxu0 %v5221_v61 }
 0xa8c   : > { %5223 = vmatprep.subr.bf16.mxu0 %v5311_v3 }
 0xa8d   : > { %2894 = vperm.xlu0 %5281, %v2760_v60  }
 0xa8e   : > { %2857 = vperm.xlu1 %5282, %v2754_v49  }
 0xa91   : > { %2899 = vperm.xlu0 %5281, %v2761_v50  }
 0xa92   : > { %2862 = vperm.xlu1 %5282, %v2755_v51  }
 0xa95   : > { %2904 = vperm.xlu0 %5281, %v2762_v52  }
 0xa96   : > { %2867 = vperm.xlu1 %5282, %v2756_v53  }
 0xa99   : > { %2909 = vperm.xlu0 %5281, %v2763_v54  }
 0xad3   : > { %v2533_v2 = vpop.permute.xlu1 %2532 }
 0xad4   : > { %2553 = vst.msk [vmem:[#allocation3] sm:$0xff] %vm539_vm5, %v2533_v2 }
 0xad7   : > { %v2575_v4 = vpop.permute.xlu0 %2574 }
 0xad8   : > { %v2535_v7 = vpop.permute.xlu1 %2534  ;;  %2595 = vst.msk [vmem:[#allocation3] sm:$0xff] %vm583_vm6, %v2575_v4 }
 0xad9   : > { %2554 = vst.msk [vmem:[#allocation3 + $0x8] sm:$0xff] %vm539_vm5, %v2535_v7 }
 0xadb   : > { %v2577_v8 = vpop.permute.xlu0 %2576 }
 0xadc   : > { %v2537_v9 = vpop.permute.xlu1 %2536  ;;  %2596 = vst.msk [vmem:[#allocation3 + $0x8] sm:$0xff] %vm583_vm6, %v2577_v8 }
 0xadd   : > { %2555 = vst.msk [vmem:[#allocation3 + $0x10] sm:$0xff] %vm539_vm5, %v2537_v9 }
 0xadf   : > { %v2579_v1 = vpop.permute.xlu0 %2578  ;;  %v2609_v10 = vld [vmem:[#allocation3] sm:$0xff] }
 0xae0   : > { %v2539_v5 = vpop.permute.xlu1 %2538  ;;  %2597 = vst.msk [vmem:[#allocation3 + $0x10] sm:$0xff] %vm583_vm6, %v2579_v1  ;;  %4963 = vmatmul.mubr.msk.f32.vlgmr.msra.gmra.mrb[50].mxu1 %vm612_vm7, %v2609_v10 }
 0xae1   : > { %2556 = vst.msk [vmem:[#allocation3 + $0x18] sm:$0xff] %vm539_vm5, %v2539_v5  ;;  %4965 = vmatprep.mubr.msk.f32.mxu1 %vm5312_vm0, %v5313_v6 }
 0xae3   : > { %v2581_v11 = vpop.permute.xlu0 %2580  ;;  %v2610_v13 = vld [vmem:[#allocation3 + $0x8] sm:$0xff] }
 0xae4   : > { %v2541_v12 = vpop.permute.xlu1 %2540  ;;  %2598 = vst.msk [vmem:[#allocation3 + $0x18] sm:$0xff] %vm583_vm6, %v2581_v11  ;;  %4966 = vmatmul.mubr.msk.f32.gmra.mrb[52].mxu1 %vm612_vm7, %v2610_v13 }
 0xae5   : > { %2557 = vst.msk [vmem:[#allocation3 + $0x20] sm:$0xff] %vm539_vm5, %v2541_v12  ;;  %4968 = vmatprep.mubr.msk.f32.mxu1 %vm5312_vm0, %v5313_v6 }
 0xae7   : > { %v2583_v14 = vpop.permute.xlu0 %2582  ;;  %v2611_v16 = vld [vmem:[#allocation3 + $0x10] sm:$0xff] }
 0xae8   : > { %v2543_v15 = vpop.permute.xlu1 %2542  ;;  %2599 = vst.msk [vmem:[#allocation3 + $0x20] sm:$0xff] %vm583_vm6, %v2583_v14  ;;  %4969 = vmatmul.mubr.msk.f32.gmra.mrb[54].mxu1 %vm612_vm7, %v2611_v16 }
 0xae9   : > { %2558 = vst.msk [vmem:[#allocation3 + $0x28] sm:$0xff] %vm539_vm5, %v2543_v15  ;;  %4971 = vmatprep.mubr.msk.f32.mxu1 %vm5312_vm0, %v5313_v6 }
 0xaeb   : > { %v2585_v17 = vpop.permute.xlu0 %2584  ;;  %v2612_v19 = vld [vmem:[#allocation3 + $0x18] sm:$0xff] }
 0xaec   : > { %v2545_v18 = vpop.permute.xlu1 %2544  ;;  %2600 = vst.msk [vmem:[#allocation3 + $0x28] sm:$0xff] %vm583_vm6, %v2585_v17  ;;  %4972 = vmatmul.mubr.msk.f32.gmra.mrb[56].mxu1 %vm612_vm7, %v2612_v19 }
 0xaed   : > { %2559 = vst.msk [vmem:[#allocation3 + $0x30] sm:$0x3] %vm546_vm8, %v2545_v18  ;;  %4974 = vmatprep.mubr.msk.f32.mxu1 %vm5312_vm0, %v5313_v6 }
 0xaef   : > { %v2587_v20 = vpop.permute.xlu0 %2586  ;;  %v2613_v21 = vld [vmem:[#allocation3 + $0x20] sm:$0xff] }
 0xaf0   : > { %2601 = vst.msk [vmem:[#allocation3 + $0x30] sm:$0x3] %vm590_vm9, %v2587_v20  ;;  %4975 = vmatmul.mubr.msk.f32.gmra.mrb[58].mxu1 %vm612_vm7, %v2613_v21 }
 0xaf1   : > { %4977 = vmatprep.mubr.msk.f32.mxu1 %vm5312_vm0, %v5313_v6 }
 0xaf3   : > { %v2614_v22 = vld [vmem:[#allocation3 + $0x28] sm:$0xff] }
 0xaf4   : > { %4978 = vmatmul.mubr.msk.f32.gmra.mrb[60].mxu1 %vm612_vm7, %v2614_v22 }
 0xaf5   : > { %4980 = vmatprep.mubr.msk.f32.mxu1 %vm5312_vm0, %v5313_v6 }
 0xaf7   : > { %v2615_v23 = vld [vmem:[#allocation3 + $0x30] sm:$0x3] }
 0xaf8   : > { %4981 = vmatmul.mubr.msk.f32.gmra.mrb[62].mxu1 %vm612_vm7, %v2615_v23 }
 0xaf9   : > { %5028 = vmatprep.mubr.msk.f32.mxu1 %vm5312_vm0, %v5313_v6 }
 0xafd   : > { %v2838_v37 = vpop.permute.xlu1 %2837 }
 0xb00   : > { %v2843_v57 = vpop.permute.xlu0 %2842 }
 0xbb3   : > { %v2709_v25 = vpop.f32.mrb[50].mxu1 }
 0xbb4   : > { %v2710_v26 = vadd.f32 %v4478_v24, %v2709_v25  ;;  %v4964_v27 = vpop.f32.mrb[51].mxu1 }
 0xbb6   : > { %v2743_v29 = vmax.f32 %v2710_v26, 0.0 }
 0xbb7   : > { %v2714_v28 = vpop.f32.mrb[52].mxu1 }
 0xbb8   : > { %v2715_v30 = vadd.f32 %v4478_v24, %v2714_v28  ;;  %v4967_v38 = vpop.f32.mrb[53].mxu1  ;;  %v2764_v41 = vsel %vm333_vm1, %v2743_v29, 0.0 }
 0xbba   : > { %v2744_v39 = vmax.f32 %v2715_v30, 0.0 }
 0xbbb   : > { %v2719_v40 = vpop.f32.mrb[54].mxu1 }
 0xbbc   : > { %v2765_v42 = vsel %vm333_vm1, %v2744_v39, 0.0  ;;  %v2720_v43 = vadd.f32 %v4478_v24, %v2719_v40  ;;  %v4970_v44 = vpop.f32.mrb[55].mxu1 }
 0xbbd   : > { %v2766_v45 = vadd.f32 %v2765_v42, %v2764_v41 }
 0xbbe   : > { %v2745_v47 = vmax.f32 %v2720_v43, 0.0 }
 0xbbf   : > { %v2724_v48 = vpop.f32.mrb[56].mxu1 }
 0xbc0   : > { %v2767_v46 = vsel %vm333_vm1, %v2745_v47, 0.0  ;;  %v2725_v32 = vadd.f32 %v4478_v24, %v2724_v48  ;;  %v4973_v31 = vpop.f32.mrb[57].mxu1 }
 0xbc1   : > { %v2768_v33 = vadd.f32 %v2767_v46, %v2766_v45 }
 0xbc2   : > { %v2746_v34 = vmax.f32 %v2725_v32, 0.0 }
 0xbc3   : > { %v2729_v56 = vpop.f32.mrb[58].mxu1 }
 0xbc4   : > { %v2769_v59 = vsel %vm333_vm1, %v2746_v34, 0.0  ;;  %v2730_v55 = vadd.f32 %v4478_v24, %v2729_v56  ;;  %v4976_v62 = vpop.f32.mrb[59].mxu1 }
 0xbc5   : > { %v2770_v63 = vadd.f32 %v2769_v59, %v2768_v33  ;;  %v2885_v62 = vpop.permute.xlu0 %2884 }
 0xbc6   : > { %v2747_v0 = vmax.f32 %v2730_v55, 0.0  ;;  %v2880_v55 = vpop.permute.xlu1 %2879 }
 0xbc7   : > { %v2734_v60 = vpop.f32.mrb[60].mxu1 }
 0xbc8   : > { %v2771_v49 = vsel %vm333_vm1, %v2747_v0, 0.0  ;;  %v2735_v50 = vadd.f32 %v4478_v24, %v2734_v60  ;;  %v4979_v51 = vpop.f32.mrb[61].mxu1 }
 0xbc9   : > { %v2772_v52 = vadd.f32 %v2771_v49, %v2770_v63  ;;  %v2890_v61 = vpop.permute.xlu0 %2889 }
 0xbca   : > { %v2748_v53 = vmax.f32 %v2735_v50, 0.0  ;;  %v2848_v63 = vpop.permute.xlu1 %2847 }
 0xbcb   : > { %v2739_v54 = vpop.f32.mrb[62].mxu1 }
 0xbcc   : > { %v2773_v2 = vsel %vm333_vm1, %v2748_v53, 0.0  ;;  %v2740_v4 = vadd.f32 %v4478_v24, %v2739_v54  ;;  %v4982_v7 = vpop.f32.mrb[63].mxu1 }
 0xbcd   : > { %v2774_v8 = vadd.f32 %v2773_v2, %v2772_v52  ;;  %v2895_v52 = vpop.permute.xlu0 %2894 }
 0xbce   : > { %v2749_v9 = vmax.f32 %v2740_v4, 0.0  ;;  %v2853_v49 = vpop.permute.xlu1 %2852 }
 0xbd0   : > { %v2775_v1 = vsel %vm488_vm4, %v2749_v9, 0.0 }
 0xbd1   : > { %v2776_v5 = vadd.f32 %v2775_v1, %v2774_v8  ;;  %v2900_v4 = vpop.permute.xlu0 %2899 }
 0xbd2   : > { %v2858_v2 = vpop.permute.xlu1 %2857 }
 0xbd3   : > { %v2777_v10 = vrot.slane %v2776_v5, 4 }
 0xbd5   : > { %v2778_v11 = vadd.f32 %v2777_v10, %v2776_v5  ;;  %v2905_v8 = vpop.permute.xlu0 %2904 }
 0xbd6   : > { %v2863_v7 = vpop.permute.xlu1 %2862 }
 0xbd7   : > { %v2779_v12 = vrot.slane %v2778_v11, 2 }
 0xbd9   : > { %v2780_v13 = vadd.f32 %v2779_v12, %v2778_v11 }
 0xbdb   : > { %v2781_v14 = vrot.slane %v2780_v13, 1 }
 0xbdd   : > { %v2782_v15 = vadd.f32 %v2781_v14, %v2780_v13 }
 0xbdf   : > { %v2783_v16 = vmul.f32 0.02, %v2782_v15  ;;  %v2868_v15 = vpop.permute.xlu1 %2867 }
 0xbe1   : > { %v2784_v17 = vsub.f32 %v2743_v29, %v2783_v16  ;;  %v2785_v18 = vsub.f32 %v2744_v39, %v2783_v16  ;;  %v2786_v19 = vsub.f32 %v2745_v47, %v2783_v16  ;;  %v2787_v20 = vsub.f32 %v2746_v34, %v2783_v16 }
 0xbe2   : > { %v2788_v21 = vsub.f32 %v2747_v0, %v2783_v16  ;;  %v2789_v22 = vsub.f32 %v2748_v53, %v2783_v16  ;;  %v2790_v23 = vsub.f32 %v2749_v9, %v2783_v16 }
 0xbe3   : > { %v2791_v24 = vmul.f32 %v2784_v17, %v2784_v17  ;;  %v2792_v25 = vmul.f32 %v2785_v18, %v2785_v18  ;;  %v2793_v26 = vmul.f32 %v2786_v19, %v2786_v19  ;;  %v2794_v27 = vmul.f32 %v2787_v20, %v2787_v20 }
 0xbe4   : > { %v2795_v40 = vmul.f32 %v2788_v21, %v2788_v21  ;;  %v2796_v29 = vmul.f32 %v2789_v22, %v2789_v22  ;;  %v2797_v44 = vmul.f32 %v2790_v23, %v2790_v23 }
 0xbe5   : > { %v2798_v28 = vsel %vm333_vm1, %v2791_v24, 0.0  ;;  %v2799_v30 = vsel %vm333_vm1, %v2792_v25, 0.0  ;;  %v2801_v41 = vsel %vm333_vm1, %v2793_v26, 0.0  ;;  %v2803_v39 = vsel %vm333_vm1, %v2794_v27, 0.0  ;;  %v4490_v27 = vld [vmem:[%s6778_s3 + $0x50] sm:$0xff] }
 0xbe6   : > { %v2800_v38 = vadd.f32 %v2799_v30, %v2798_v28  ;;  %v2805_v45 = vsel %vm333_vm1, %v2795_v40, 0.0  ;;  %v2807_v48 = vsel %vm333_vm1, %v2796_v29, 0.0  ;;  %v2809_v32 = vsel %vm488_vm4, %v2797_v44, 0.0  ;;  %v4491_v28 = vld [vmem:[%s6778_s3 + $0x58] sm:$0xff] }
 0xbe8   : > { %v2802_v42 = vadd.f32 %v2801_v41, %v2800_v38 }
 0xbea   : > { %v2804_v43 = vadd.f32 %v2803_v39, %v2802_v42 }
 0xbec   : > { %v2806_v47 = vadd.f32 %v2805_v45, %v2804_v43 }
 0xbee   : > { %v2808_v46 = vadd.f32 %v2807_v48, %v2806_v47 }
 0xbf0   : > { %v2810_v31 = vadd.f32 %v2809_v32, %v2808_v46 }
 0xbf2   : > { %v2811_v33 = vrot.slane %v2810_v31, 4 }
 0xbf4   : > { %v2812_v34 = vadd.f32 %v2811_v33, %v2810_v31 }
 0xbf6   : > { %v2813_v35 = vrot.slane %v2812_v34, 2 }
 0xbf8   : > { %v2814_v36 = vadd.f32 %v2813_v35, %v2812_v34 }
 0xbfa   : > { %v2815_v56 = vrot.slane %v2814_v36, 1 }
 0xbfc   : > { %v2816_v58 = vadd.f32 %v2815_v56, %v2814_v36 }
 0xbfe   : > { %v2817_v59 = vmul.f32 0.020408163, %v2816_v58 }
 0xc00   : > { %5295 = vrsqrt.f32 %v2817_v59  ;;  %vm2820_vm2 = vcmp.eq.f32.partialorder %v2817_v59, inf  ;;  %v2823_v50 = vand.u32 2147483648, %v2817_v59  ;;  %vm2822_vm3 = vcmp.eq.f32.partialorder %v2817_v59, 0.0 }
 0xc0a   : > { %v5296_v0 = vpop.eup %5295 }
 0xc0b   : > { %v2819_v60 = vmul.f32 %v5296_v0, %v2817_v59 }
 0xc0d   : > { %v2821_v51 = vsel %vm2820_vm2, %v2817_v59, %v2819_v60 }
 0xc0e   : > { %v2824_v53 = vsel %vm2822_vm3, %v2823_v50, %v2821_v51 }
 0xc0f   : > { %v2825_v54 = vadd.f32 1e-06, %v2824_v53 }
 0xc11   : > { %5297 = vrcp.f32 %v2825_v54 }
 0xc1b   : > { %v5298_v9 = vpop.eup %5297 }
 0xc1c   : > { %v2828_v1 = vmul.f32 %v5298_v9, %v2784_v17  ;;  %v2829_v5 = vmul.f32 %v5298_v9, %v2785_v18  ;;  %v2830_v10 = vmul.f32 %v5298_v9, %v2786_v19  ;;  %v2831_v11 = vmul.f32 %v5298_v9, %v2787_v20 }
 0xc1d   : > { %v2832_v12 = vmul.f32 %v5298_v9, %v2788_v21  ;;  %v2833_v13 = vmul.f32 %v5298_v9, %v2789_v22  ;;  %v2834_v14 = vmul.f32 %v5298_v9, %v2790_v23  ;;  %v5224_v20 = vpack.c.bf16 %v4491_v28, %v4490_v27  ;;  %v2910_v21 = vpop.permute.xlu0 %2909  ;;  %v4493_v27 = vld [vmem:[%s6779_s4 + $0x1] ss:$0 sm:$0xff] }
 0xc1e   : > { %v2870_v16 = vmul.f32 %v2838_v37, %v2828_v1  ;;  %v2871_v24 = vmul.f32 %v2843_v57, %v2829_v5  ;;  %v2872_v25 = vmul.f32 %v2848_v63, %v2830_v10  ;;  %v2873_v26 = vmul.f32 %v2853_v49, %v2831_v11  ;;  %v4505_v28 = vld [vmem:[%s6778_s3 + $0x80] sm:$0xff] }
 0xc1f   : > { %v2874_v17 = vmul.f32 %v2858_v2, %v2832_v12  ;;  %v2875_v18 = vmul.f32 %v2863_v7, %v2833_v13  ;;  %v2876_v19 = vmul.f32 %v2868_v15, %v2834_v14  ;;  %5225 = vmatpush3.bf16.msra.mxu0 %v5224_v20  ;;  %v4501_v14 = vld [vmem:[%s6778_s3 + $0x60] sm:$0xff]  ;;  %v4502_v15 = vld [vmem:[%s6778_s3 + $0x68] sm:$0xff] }
 0xc20   : > { %v2912_v22 = vadd.f32 %v2880_v55, %v2870_v16  ;;  %v2913_v23 = vadd.f32 %v2885_v62, %v2871_v24  ;;  %v2914_v30 = vadd.f32 %v2890_v61, %v2872_v25  ;;  %v2915_v38 = vadd.f32 %v2895_v52, %v2873_v26  ;;  %5235 = vmatprep.subr.bf16.mxu0 %v5311_v3  ;;  %v4503_v16 = vld [vmem:[%s6778_s3 + $0x70] sm:$0xff]  ;;  %v4504_v25 = vld [vmem:[%s6778_s3 + $0x78] sm:$0xff] }
 0xc21   : > { %v2916_v40 = vadd.f32 %v2900_v4, %v2874_v17  ;;  %v2917_v41 = vadd.f32 %v2905_v8, %v2875_v18  ;;  %v2918_v42 = vadd.f32 %v2910_v21, %v2876_v19  ;;  %v5227_v24 = vpack.c.bf16 %v4502_v15, %v4501_v14  ;;  %v4506_v17 = vld [vmem:[%s6778_s3 + $0x88] sm:$0xff] }
 0xc22   : > { %2919 = vst.msk [vmem:[#allocation2 + $0x2] sm:$0xff] %vm333_vm1, %v2912_v22  ;;  %2920 = vst.msk [vmem:[#allocation2 + $0xa] sm:$0xff] %vm333_vm1, %v2913_v23  ;;  %v5230_v26 = vpack.c.bf16 %v4504_v25, %v4503_v16  ;;  %v5233_v18 = vpack.c.bf16 %v4506_v17, %v4505_v28 }
 0xc23   : > { %2921 = vst.msk [vmem:[#allocation2 + $0x12] sm:$0xff] %vm333_vm1, %v2914_v30  ;;  %2922 = vst.msk [vmem:[#allocation2 + $0x1a] sm:$0xff] %vm333_vm1, %v2915_v38  ;;  %5228 = vmatpush3.bf16.msra.mxu1 %v5227_v24 }
 0xc24   : > { %2923 = vst.msk [vmem:[#allocation2 + $0x22] sm:$0xff] %vm333_vm1, %v2916_v40  ;;  %2924 = vst.msk [vmem:[#allocation2 + $0x2a] sm:$0xff] %vm333_vm1, %v2917_v41  ;;  %5229 = vmatprep.subr.bf16.mxu1 %v5311_v3 }
 0xc25   : > { %2925 = vst.msk [vmem:[#allocation2 + $0x32] sm:$0x3] %vm488_vm4, %v2918_v42 }
 0xc27   : > { %5231 = vmatpush3.bf16.msra.mxu1 %v5230_v26 }
 0xc28   : > { %5232 = vmatprep.subr.bf16.mxu1 %v5311_v3 }
 0xc29   : > { %v2982_v29 = vld [vmem:[#allocation2 + $0x3] sm:$0xff] }
 0xc2a   : > { %v2940_v39 = vld [vmem:[#allocation2 + $0x2] sm:$0xff]  ;;  %2996 = vrot.lane.b32.xlu0 %v2982_v29, %s5315_s20  ;;  %v2983_v43 = vld [vmem:[#allocation2 + $0xb] sm:$0xff]  ;;  %v2929_v46 = vld [vmem:[#allocation2 + $0x19] sm:$0xff] }
 0xc2b   : > { %2954 = vrot.lane.b32.xlu1 %v2940_v39, %s5314_s18  ;;  %v2941_v44 = vld [vmem:[#allocation2 + $0xa] sm:$0xff]  ;;  %v2926_v45 = vld [vmem:[#allocation2 + $0x1] sm:$0xff]  ;;  %2936 = vst.msk [vmem:[#allocation3 + $0x18] sm:$0xff] %vm333_vm1, %v2929_v46  ;;  %v2984_v34 = vld [vmem:[#allocation2 + $0x13] sm:$0xff]  ;;  %5234 = vmatpush3.bf16.msra.mxu1 %v5233_v18 }
 0xc2c   : > { %2933 = vst.msk [vmem:[#allocation3] sm:$0xff] %vm333_vm1, %v2926_v45  ;;  %v2927_v47 = vld [vmem:[#allocation2 + $0x9] sm:$0xff]  ;;  %v2928_v48 = vld [vmem:[#allocation2 + $0x11] sm:$0xff]  ;;  %v2930_v32 = vld [vmem:[#allocation2 + $0x21] sm:$0xff]  ;;  %5244 = vmatprep.subr.bf16.mxu1 %v5311_v3 }
 0xc2d   : > { %2934 = vst.msk [vmem:[#allocation3 + $0x8] sm:$0xff] %vm333_vm1, %v2927_v47  ;;  %2935 = vst.msk [vmem:[#allocation3 + $0x10] sm:$0xff] %vm333_vm1, %v2928_v48  ;;  %v2931_v31 = vld [vmem:[#allocation2 + $0x29] sm:$0xff]  ;;  %v2932_v33 = vld [vmem:[#allocation2 + $0x31] sm:$0x3] }
 0xc2e   : > { %2998 = vrot.lane.b32.xlu0 %v2983_v43, %s5315_s20  ;;  %2937 = vst.msk [vmem:[#allocation3 + $0x20] sm:$0xff] %vm333_vm1, %v2930_v32  ;;  %2938 = vst.msk [vmem:[#allocation3 + $0x28] sm:$0xff] %vm333_vm1, %v2931_v31  ;;  %v2942_v35 = vld [vmem:[#allocation2 + $0x12] sm:$0xff]  ;;  %v2985_v36 = vld [vmem:[#allocation2 + $0x1b] sm:$0xff] }
 0xc2f   : > { %2956 = vrot.lane.b32.xlu1 %v2941_v44, %s5314_s18  ;;  %2939 = vst.msk [vmem:[#allocation3 + $0x30] sm:$0x3] %vm488_vm4, %v2932_v33  ;;  %v2943_v37 = vld [vmem:[#allocation2 + $0x1a] sm:$0xff]  ;;  %v2986_v56 = vld [vmem:[#allocation2 + $0x23] sm:$0xff]  ;;  %v2987_v58 = vld [vmem:[#allocation2 + $0x2b] sm:$0xff] }
 0xc30   : > { %v2944_v57 = vld [vmem:[#allocation2 + $0x22] sm:$0xff]  ;;  %v2945_v59 = vld [vmem:[#allocation2 + $0x2a] sm:$0xff]  ;;  %v2988_v55 = vld [vmem:[#allocation2 + $0x33] sm:$0x3] }
 0xc31   : > { %v2946_v62 = vld [vmem:[#allocation2 + $0x32] sm:$0x3] }
 0xc32   : > { %3000 = vrot.lane.b32.xlu0 %v2984_v34, %s5315_s20 }
 0xc33   : > { %2958 = vrot.lane.b32.xlu1 %v2942_v35, %s5314_s18 }
 0xc36   : > { %3002 = vrot.lane.b32.xlu0 %v2985_v36, %s5315_s20 }
 0xc37   : > { %2960 = vrot.lane.b32.xlu1 %v2943_v37, %s5314_s18 }
 0xc3a   : > { %3004 = vrot.lane.b32.xlu0 %v2986_v56, %s5315_s20 }
 0xc3b   : > { %2962 = vrot.lane.b32.xlu1 %v2944_v57, %s5314_s18 }
 0xc3e   : > { %3006 = vrot.lane.b32.xlu0 %v2987_v58, %s5315_s20 }
 0xc3f   : > { %2964 = vrot.lane.b32.xlu1 %v2945_v59, %s5314_s18 }
 0xc42   : > { %3008 = vrot.lane.b32.xlu0 %v2988_v55, %s5315_s20 }
 0xc43   : > { %2966 = vrot.lane.b32.xlu1 %v2946_v62, %s5314_s18 }
 0xc9c   : > { %v2997_v63 = vpop.permute.xlu0 %2996 }
 0xc9d   : > { %v2955_v61 = vpop.permute.xlu1 %2954 }
 0xc9e   : > { %2975 = vst.msk [vmem:[#allocation3] sm:$0xff] %vm539_vm5, %v2955_v61 }
 0xc9f   : > { %3017 = vst.msk [vmem:[#allocation3] sm:$0xff] %vm583_vm6, %v2997_v63 }
 0xca0   : > { %v2999_v0 = vpop.permute.xlu0 %2998 }
 0xca1   : > { %v2957_v60 = vpop.permute.xlu1 %2956 }
 0xca2   : > { %2976 = vst.msk [vmem:[#allocation3 + $0x8] sm:$0xff] %vm539_vm5, %v2957_v60 }
 0xca3   : > { %3018 = vst.msk [vmem:[#allocation3 + $0x8] sm:$0xff] %vm583_vm6, %v2999_v0 }
 0xca4   : > { %v3001_v49 = vpop.permute.xlu0 %3000 }
 0xca5   : > { %v2959_v50 = vpop.permute.xlu1 %2958 }
 0xca6   : > { %2977 = vst.msk [vmem:[#allocation3 + $0x10] sm:$0xff] %vm539_vm5, %v2959_v50  ;;  %v3031_v51 = vld [vmem:[#allocation3] sm:$0xff] }
 0xca7   : > { %3019 = vst.msk [vmem:[#allocation3 + $0x10] sm:$0xff] %vm583_vm6, %v3001_v49  ;;  %4996 = vmatmul.mubr.msk.f32.vlgmr.msra.gmra.mrb[48].mxu0 %vm612_vm7, %v3031_v51 }
 0xca8   : > { %4998 = vmatprep.mubr.msk.f32.mxu0 %vm5312_vm0, %v5313_v6  ;;  %v3003_v52 = vpop.permute.xlu0 %3002 }
 0xca9   : > { %v2961_v53 = vpop.permute.xlu1 %2960 }
 0xcaa   : > { %2978 = vst.msk [vmem:[#allocation3 + $0x18] sm:$0xff] %vm539_vm5, %v2961_v53  ;;  %v3032_v54 = vld [vmem:[#allocation3 + $0x8] sm:$0xff] }
 0xcab   : > { %3020 = vst.msk [vmem:[#allocation3 + $0x18] sm:$0xff] %vm583_vm6, %v3003_v52  ;;  %4999 = vmatmul.mubr.msk.f32.gmra.mrb[50].mxu0 %vm612_vm7, %v3032_v54 }
 0xcac   : > { %5001 = vmatprep.mubr.msk.f32.mxu0 %vm5312_vm0, %v5313_v6  ;;  %v3005_v2 = vpop.permute.xlu0 %3004 }
 0xcad   : > { %v2963_v4 = vpop.permute.xlu1 %2962 }
 0xcae   : > { %2979 = vst.msk [vmem:[#allocation3 + $0x20] sm:$0xff] %vm539_vm5, %v2963_v4  ;;  %v3033_v7 = vld [vmem:[#allocation3 + $0x10] sm:$0xff] }
 0xcaf   : > { %3021 = vst.msk [vmem:[#allocation3 + $0x20] sm:$0xff] %vm583_vm6, %v3005_v2  ;;  %5002 = vmatmul.mubr.msk.f32.gmra.mrb[52].mxu0 %vm612_vm7, %v3033_v7  ;;  %v3234_v2 = vld [vmem:[#allocation2 + $0x34] sm:$0x3] }
 0xcb0   : > { %5004 = vmatprep.mubr.msk.f32.mxu0 %vm5312_vm0, %v5313_v6  ;;  %v3007_v8 = vpop.permute.xlu0 %3006 }
 0xcb1   : > { %v2965_v9 = vpop.permute.xlu1 %2964 }
 0xcb2   : > { %2980 = vst.msk [vmem:[#allocation3 + $0x28] sm:$0xff] %vm539_vm5, %v2965_v9  ;;  %v3034_v1 = vld [vmem:[#allocation3 + $0x18] sm:$0xff] }
 0xcb3   : > { %3022 = vst.msk [vmem:[#allocation3 + $0x28] sm:$0xff] %vm583_vm6, %v3007_v8  ;;  %5005 = vmatmul.mubr.msk.f32.gmra.mrb[54].mxu0 %vm612_vm7, %v3034_v1 }
 0xcb4   : > { %5007 = vmatprep.mubr.msk.f32.mxu0 %vm5312_vm0, %v5313_v6  ;;  %v3009_v5 = vpop.permute.xlu0 %3008 }
 0xcb5   : > { %v2967_v10 = vpop.permute.xlu1 %2966 }
 0xcb6   : > { %2981 = vst.msk [vmem:[#allocation3 + $0x30] sm:$0x3] %vm546_vm8, %v2967_v10  ;;  %v3035_v11 = vld [vmem:[#allocation3 + $0x20] sm:$0xff] }
 0xcb7   : > { %3023 = vst.msk [vmem:[#allocation3 + $0x30] sm:$0x3] %vm590_vm9, %v3009_v5  ;;  %5008 = vmatmul.mubr.msk.f32.gmra.mrb[56].mxu0 %vm612_vm7, %v3035_v11 }
 0xcb8   : > { %5010 = vmatprep.mubr.msk.f32.mxu0 %vm5312_vm0, %v5313_v6 }
 0xcba   : > { %v3036_v12 = vld [vmem:[#allocation3 + $0x28] sm:$0xff] }
 0xcbb   : > { %5011 = vmatmul.mubr.msk.f32.gmra.mrb[58].mxu0 %vm612_vm7, %v3036_v12 }
 0xcbc   : > { %5013 = vmatprep.mubr.msk.f32.mxu0 %vm5312_vm0, %v5313_v6 }
 0xcbe   : > { %v3037_v13 = vld [vmem:[#allocation3 + $0x30] sm:$0x3] }
 0xcbf   : > { %5014 = vmatmul.mubr.msk.f32.gmra.mrb[60].mxu0 %vm612_vm7, %v3037_v13 }
 0xcc0   : > { %5061 = vmatprep.mubr.msk.f32.mxu0 %vm5312_vm0, %v5313_v6 }
 0xd7a   : > { %v3131_v19 = vpop.f32.mrb[48].mxu0 }
 0xd7b   : > { %v3132_v20 = vadd.f32 %v4493_v27, %v3131_v19  ;;  %v4997_v21 = vpop.f32.mrb[49].mxu0 }
 0xd7c   : > { %v3517_v21 = vld [vmem:[%s6778_s3 + $0x8] sm:$0xff] }
 0xd7d   : > { %3165 = vst.msk [vmem:[#allocation2 + $0x2] sm:$0xff] %vm333_vm1, %v3132_v20  ;;  %v3516_v20 = vld [vmem:[%s6778_s3] sm:$0xff] }
 0xd7e   : > { %v3136_v22 = vpop.f32.mrb[50].mxu0 }
 0xd7f   : > { %v3137_v23 = vadd.f32 %v4493_v27, %v3136_v22  ;;  %v5000_v30 = vpop.f32.mrb[51].mxu0  ;;  %v3518_v22 = vld [vmem:[%s6778_s3 + $0x10] sm:$0xff] }
 0xd80   : > { %v3519_v30 = vld [vmem:[%s6778_s3 + $0x18] sm:$0xff] }
 0xd81   : > { %3166 = vst.msk [vmem:[#allocation2 + $0xa] sm:$0xff] %vm333_vm1, %v3137_v23  ;;  %v5236_v23 = vpack.c.bf16 %v3517_v21, %v3516_v20  ;;  %v3669_v20 = vld [vmem:[%s6780_s5 + $0x28] sm:$0xff] }
 0xd82   : > { %v3141_v38 = vpop.f32.mrb[52].mxu0  ;;  %v3676_v21 = vld [vmem:[%s6781_s6 + $0x28] sm:$0xff] }
 0xd83   : > { %v3142_v40 = vadd.f32 %v4493_v27, %v3141_v38  ;;  %v5003_v41 = vpop.f32.mrb[53].mxu0  ;;  %5237 = vmatpush3.bf16.msra.mxu0 %v5236_v23  ;;  %v5239_v38 = vpack.c.bf16 %v3519_v30, %v3518_v22  ;;  %v3670_v22 = vld [vmem:[%s6780_s5 + $0x30] sm:$0x3] }
 0xd84   : > { %v3186_v42 = vld [vmem:[#allocation2 + $0x2] sm:$0xff]  ;;  %5238 = vmatprep.subr.bf16.mxu0 %v5311_v3  ;;  %v3677_v23 = vld [vmem:[%s6781_s6 + $0x30] sm:$0x3] }
 0xd85   : > { %v3172_v29 = vld [vmem:[#allocation2] sm:$0xff]  ;;  %3167 = vst.msk [vmem:[#allocation2 + $0x12] sm:$0xff] %vm333_vm1, %v3142_v40  ;;  %3200 = vrot.lane.b32.xlu1 %v3186_v42, %s5314_s18  ;;  %v3521_v42 = vld [vmem:[%s6778_s3 + $0x28] sm:$0xff] }
 0xd86   : > { %3179 = vst.msk [vmem:[#allocation3] sm:$0xff] %vm333_vm1, %v3172_v29  ;;  %v3146_v39 = vpop.f32.mrb[54].mxu0  ;;  %v4508_v40 = vld [vmem:[%s6779_s4 + $0x2] ss:$0 sm:$0xff] }
 0xd87   : > { %v3147_v43 = vadd.f32 %v4493_v27, %v3146_v39  ;;  %v5006_v44 = vpop.f32.mrb[55].mxu0  ;;  %5240 = vmatpush3.bf16.msra.mxu0 %v5239_v38  ;;  %v3520_v41 = vld [vmem:[%s6778_s3 + $0x20] sm:$0xff] }
 0xd88   : > { %v3228_v45 = vld [vmem:[#allocation2 + $0x4] sm:$0xff]  ;;  %5241 = vmatprep.subr.bf16.mxu0 %v5311_v3  ;;  %v5242_v29 = vpack.c.bf16 %v3521_v42, %v3520_v41 }
 0xd89   : > { %v3187_v47 = vld [vmem:[#allocation2 + $0xa] sm:$0xff]  ;;  %3168 = vst.msk [vmem:[#allocation2 + $0x1a] sm:$0xff] %vm333_vm1, %v3147_v43  ;;  %3242 = vrot.lane.b32.xlu0 %v3228_v45, %s5315_s20 }
 0xd8a   : > { %v3173_v48 = vld [vmem:[#allocation2 + $0x8] sm:$0xff]  ;;  %3202 = vrot.lane.b32.xlu1 %v3187_v47, %s5314_s18  ;;  %v3151_v46 = vpop.f32.mrb[56].mxu0 }
 0xd8b   : > { %3180 = vst.msk [vmem:[#allocation3 + $0x8] sm:$0xff] %vm333_vm1, %v3173_v48  ;;  %v3152_v32 = vadd.f32 %v4493_v27, %v3151_v46  ;;  %v5009_v31 = vpop.f32.mrb[57].mxu0  ;;  %5243 = vmatpush3.bf16.msra.mxu0 %v5242_v29 }
 0xd8c   : > { %v3229_v33 = vld [vmem:[#allocation2 + $0xc] sm:$0xff]  ;;  %5253 = vmatprep.subr.bf16.mxu0 %v5311_v3 }
 0xd8d   : > { %v3188_v34 = vld [vmem:[#allocation2 + $0x12] sm:$0xff]  ;;  %3169 = vst.msk [vmem:[#allocation2 + $0x22] sm:$0xff] %vm333_vm1, %v3152_v32  ;;  %3244 = vrot.lane.b32.xlu0 %v3229_v33, %s5315_s20 }
 0xd8e   : > { %v3174_v35 = vld [vmem:[#allocation2 + $0x10] sm:$0xff]  ;;  %3204 = vrot.lane.b32.xlu1 %v3188_v34, %s5314_s18  ;;  %v3156_v36 = vpop.f32.mrb[58].mxu0 }
 0xd8f   : > { %3181 = vst.msk [vmem:[#allocation3 + $0x10] sm:$0xff] %vm333_vm1, %v3174_v35  ;;  %v3157_v37 = vadd.f32 %v4493_v27, %v3156_v36  ;;  %v5012_v56 = vpop.f32.mrb[59].mxu0 }
 0xd90   : > { %v3230_v57 = vld [vmem:[#allocation2 + $0x14] sm:$0xff] }
 0xd91   : > { %v3189_v58 = vld [vmem:[#allocation2 + $0x1a] sm:$0xff]  ;;  %3170 = vst.msk [vmem:[#allocation2 + $0x2a] sm:$0xff] %vm333_vm1, %v3157_v37  ;;  %3246 = vrot.lane.b32.xlu0 %v3230_v57, %s5315_s20 }
 0xd92   : > { %v3175_v59 = vld [vmem:[#allocation2 + $0x18] sm:$0xff]  ;;  %3206 = vrot.lane.b32.xlu1 %v3189_v58, %s5314_s18  ;;  %v3161_v55 = vpop.f32.mrb[60].mxu0 }
 0xd93   : > { %3182 = vst.msk [vmem:[#allocation3 + $0x18] sm:$0xff] %vm333_vm1, %v3175_v59  ;;  %v3162_v62 = vadd.f32 %v4493_v27, %v3161_v55  ;;  %v5015_v63 = vpop.f32.mrb[61].mxu0 }
 0xd94   : > { %v3231_v61 = vld [vmem:[#allocation2 + $0x1c] sm:$0xff] }
 0xd95   : > { %v3190_v0 = vld [vmem:[#allocation2 + $0x22] sm:$0xff]  ;;  %3171 = vst.msk [vmem:[#allocation2 + $0x32] sm:$0x3] %vm488_vm4, %v3162_v62  ;;  %3248 = vrot.lane.b32.xlu0 %v3231_v61, %s5315_s20 }
 0xd96   : > { %v3176_v60 = vld [vmem:[#allocation2 + $0x20] sm:$0xff]  ;;  %3208 = vrot.lane.b32.xlu1 %v3190_v0, %s5314_s18 }
 0xd97   : > { %3183 = vst.msk [vmem:[#allocation3 + $0x20] sm:$0xff] %vm333_vm1, %v3176_v60 }
 0xd98   : > { %v3232_v49 = vld [vmem:[#allocation2 + $0x24] sm:$0xff]  ;;  %v3178_v52 = vld [vmem:[#allocation2 + $0x30] sm:$0x3] }
 0xd99   : > { %v3191_v50 = vld [vmem:[#allocation2 + $0x2a] sm:$0xff]  ;;  %3250 = vrot.lane.b32.xlu0 %v3232_v49, %s5315_s20  ;;  %3185 = vst.msk [vmem:[#allocation3 + $0x30] sm:$0x3] %vm488_vm4, %v3178_v52 }
 0xd9a   : > { %v3177_v51 = vld [vmem:[#allocation2 + $0x28] sm:$0xff]  ;;  %3210 = vrot.lane.b32.xlu1 %v3191_v50, %s5314_s18 }
 0xd9b   : > { %3184 = vst.msk [vmem:[#allocation3 + $0x28] sm:$0xff] %vm333_vm1, %v3177_v51 }
 0xd9c   : > { %v3233_v53 = vld [vmem:[#allocation2 + $0x2c] sm:$0xff] }
 0xd9d   : > { %v3192_v54 = vld [vmem:[#allocation2 + $0x32] sm:$0x3]  ;;  %3252 = vrot.lane.b32.xlu0 %v3233_v53, %s5315_s20 }
 0xd9e   : > { %3212 = vrot.lane.b32.xlu1 %v3192_v54, %s5314_s18 }
 0xda1   : > { %3254 = vrot.lane.b32.xlu0 %v3234_v2, %s5315_s20 }
 0xdf7   : > { %v3201_v4 = vpop.permute.xlu1 %3200 }
 0xdf8   : > { %3221 = vst.msk [vmem:[#allocation3] sm:$0xff] %vm539_vm5, %v3201_v4 }
 0xdfb   : > { %v3243_v7 = vpop.permute.xlu0 %3242 }
 0xdfc   : > { %v3203_v8 = vpop.permute.xlu1 %3202  ;;  %3263 = vst.msk [vmem:[#allocation3] sm:$0xff] %vm583_vm6, %v3243_v7 }
 0xdfd   : > { %3222 = vst.msk [vmem:[#allocation3 + $0x8] sm:$0xff] %vm539_vm5, %v3203_v8 }
 0xdff   : > { %v3245_v9 = vpop.permute.xlu0 %3244 }
 0xe00   : > { %v3205_v1 = vpop.permute.xlu1 %3204  ;;  %3264 = vst.msk [vmem:[#allocation3 + $0x8] sm:$0xff] %vm583_vm6, %v3245_v9 }
 0xe01   : > { %3223 = vst.msk [vmem:[#allocation3 + $0x10] sm:$0xff] %vm539_vm5, %v3205_v1 }
 0xe03   : > { %v3247_v5 = vpop.permute.xlu0 %3246  ;;  %v3277_v11 = vld [vmem:[#allocation3] sm:$0xff] }
 0xe04   : > { %v3207_v10 = vpop.permute.xlu1 %3206  ;;  %3265 = vst.msk [vmem:[#allocation3 + $0x10] sm:$0xff] %vm583_vm6, %v3247_v5  ;;  %5029 = vmatmul.mubr.msk.f32.vlgmr.msra.gmra.mrb[64].mxu1 %vm612_vm7, %v3277_v11 }
 0xe05   : > { %3224 = vst.msk [vmem:[#allocation3 + $0x18] sm:$0xff] %vm539_vm5, %v3207_v10  ;;  %5031 = vmatprep.mubr.msk.f32.mxu1 %vm5312_vm0, %v5313_v6 }
 0xe07   : > { %v3249_v12 = vpop.permute.xlu0 %3248  ;;  %v3278_v14 = vld [vmem:[#allocation3 + $0x8] sm:$0xff] }
 0xe08   : > { %v3209_v13 = vpop.permute.xlu1 %3208  ;;  %3266 = vst.msk [vmem:[#allocation3 + $0x18] sm:$0xff] %vm583_vm6, %v3249_v12  ;;  %5032 = vmatmul.mubr.msk.f32.gmra.mrb[66].mxu1 %vm612_vm7, %v3278_v14  ;;  %v3664_v14 = vld [vmem:[%s6780_s5] sm:$0xff] }
 0xe09   : > { %3225 = vst.msk [vmem:[#allocation3 + $0x20] sm:$0xff] %vm539_vm5, %v3209_v13  ;;  %5034 = vmatprep.mubr.msk.f32.mxu1 %vm5312_vm0, %v5313_v6 }
 0xe0b   : > { %v3251_v15 = vpop.permute.xlu0 %3250  ;;  %v3279_v24 = vld [vmem:[#allocation3 + $0x10] sm:$0xff] }
 0xe0c   : > { %v3211_v16 = vpop.permute.xlu1 %3210  ;;  %3267 = vst.msk [vmem:[#allocation3 + $0x20] sm:$0xff] %vm583_vm6, %v3251_v15  ;;  %5035 = vmatmul.mubr.msk.f32.gmra.mrb[68].mxu1 %vm612_vm7, %v3279_v24  ;;  %v3671_v24 = vld [vmem:[%s6781_s6] sm:$0xff] }
 0xe0d   : > { %3226 = vst.msk [vmem:[#allocation3 + $0x28] sm:$0xff] %vm539_vm5, %v3211_v16  ;;  %5037 = vmatprep.mubr.msk.f32.mxu1 %vm5312_vm0, %v5313_v6  ;;  %v3665_v16 = vld [vmem:[%s6780_s5 + $0x8] sm:$0xff] }
 0xe0f   : > { %v3253_v25 = vpop.permute.xlu0 %3252  ;;  %v3280_v27 = vld [vmem:[#allocation3 + $0x18] sm:$0xff] }
 0xe10   : > { %v3213_v26 = vpop.permute.xlu1 %3212  ;;  %3268 = vst.msk [vmem:[#allocation3 + $0x28] sm:$0xff] %vm583_vm6, %v3253_v25  ;;  %5038 = vmatmul.mubr.msk.f32.gmra.mrb[70].mxu1 %vm612_vm7, %v3280_v27  ;;  %v3672_v25 = vld [vmem:[%s6781_s6 + $0x8] sm:$0xff]  ;;  %v3673_v27 = vld [vmem:[%s6781_s6 + $0x10] sm:$0xff] }
 0xe11   : > { %3227 = vst.msk [vmem:[#allocation3 + $0x30] sm:$0x3] %vm546_vm8, %v3213_v26  ;;  %5040 = vmatprep.mubr.msk.f32.mxu1 %vm5312_vm0, %v5313_v6  ;;  %v3666_v26 = vld [vmem:[%s6780_s5 + $0x10] sm:$0xff] }
 0xe13   : > { %v3255_v28 = vpop.permute.xlu0 %3254  ;;  %v3281_v17 = vld [vmem:[#allocation3 + $0x20] sm:$0xff] }
 0xe14   : > { %3269 = vst.msk [vmem:[#allocation3 + $0x30] sm:$0x3] %vm590_vm9, %v3255_v28  ;;  %5041 = vmatmul.mubr.msk.f32.gmra.mrb[72].mxu1 %vm612_vm7, %v3281_v17  ;;  %v3667_v28 = vld [vmem:[%s6780_s5 + $0x18] sm:$0xff] }
 0xe15   : > { %5043 = vmatprep.mubr.msk.f32.mxu1 %vm5312_vm0, %v5313_v6  ;;  %v3674_v17 = vld [vmem:[%s6781_s6 + $0x18] sm:$0xff] }
 0xe17   : > { %v3282_v18 = vld [vmem:[#allocation3 + $0x28] sm:$0xff] }
 0xe18   : > { %5044 = vmatmul.mubr.msk.f32.gmra.mrb[74].mxu1 %vm612_vm7, %v3282_v18  ;;  %v3668_v18 = vld [vmem:[%s6780_s5 + $0x20] sm:$0xff] }
 0xe19   : > { %5046 = vmatprep.mubr.msk.f32.mxu1 %vm5312_vm0, %v5313_v6 }
 0xe1b   : > { %v3283_v19 = vld [vmem:[#allocation3 + $0x30] sm:$0x3] }
 0xe1c   : > { %5047 = vmatmul.mubr.msk.f32.gmra.mrb[76].mxu1 %vm612_vm7, %v3283_v19  ;;  %v3675_v19 = vld [vmem:[%s6781_s6 + $0x20] sm:$0xff] }
 0xe1d   : > { %5094 = vmatprep.mubr.msk.f32.mxu1 %vm5312_vm0, %v5313_v6 }
 0xed7   : > { %v3377_v39 = vpop.f32.mrb[64].mxu1 }
 0xed8   : > { %v3378_v43 = vadd.f32 %v4508_v40, %v3377_v39  ;;  %v5030_v44 = vpop.f32.mrb[65].mxu1 }
 0xeda   : > { %3411 = vst.msk [vmem:[#allocation2 + $0x2] sm:$0xff] %vm333_vm1, %v3378_v43 }
 0xedb   : > { %v3382_v45 = vpop.f32.mrb[66].mxu1 }
 0xedc   : > { %v3383_v47 = vadd.f32 %v4508_v40, %v3382_v45  ;;  %v5033_v48 = vpop.f32.mrb[67].mxu1 }
 0xede   : > { %3412 = vst.msk [vmem:[#allocation2 + $0xa] sm:$0xff] %vm333_vm1, %v3383_v47 }
 0xedf   : > { %v3387_v46 = vpop.f32.mrb[68].mxu1 }
 0xee0   : > { %v3388_v32 = vadd.f32 %v4508_v40, %v3387_v46  ;;  %v5036_v31 = vpop.f32.mrb[69].mxu1 }
 0xee1   : > { %v3432_v33 = vld [vmem:[#allocation2 + $0x2] sm:$0xff] }
 0xee2   : > { %v3418_v34 = vld [vmem:[#allocation2 + $0x1] sm:$0xff]  ;;  %3413 = vst.msk [vmem:[#allocation2 + $0x12] sm:$0xff] %vm333_vm1, %v3388_v32  ;;  %3446 = vrot.lane.b32.xlu1 %v3432_v33, %s5314_s18 }
 0xee3   : > { %3425 = vst.msk [vmem:[#allocation3] sm:$0xff] %vm333_vm1, %v3418_v34  ;;  %v3392_v35 = vpop.f32.mrb[70].mxu1 }
 0xee4   : > { %v3393_v36 = vadd.f32 %v4508_v40, %v3392_v35  ;;  %v5039_v37 = vpop.f32.mrb[71].mxu1 }
 0xee5   : > { %v3474_v56 = vld [vmem:[#allocation2 + $0x3] sm:$0xff] }
 0xee6   : > { %v3433_v57 = vld [vmem:[#allocation2 + $0xa] sm:$0xff]  ;;  %3414 = vst.msk [vmem:[#allocation2 + $0x1a] sm:$0xff] %vm333_vm1, %v3393_v36  ;;  %3488 = vrot.lane.b32.xlu0 %v3474_v56, %s5315_s20 }
 0xee7   : > { %v3419_v58 = vld [vmem:[#allocation2 + $0x9] sm:$0xff]  ;;  %3448 = vrot.lane.b32.xlu1 %v3433_v57, %s5314_s18  ;;  %v3397_v59 = vpop.f32.mrb[72].mxu1  ;;  %v4516_v57 = vld [vmem:[%s6779_s4] ss:$0 sm:$0xff] }
 0xee8   : > { %3426 = vst.msk [vmem:[#allocation3 + $0x8] sm:$0xff] %vm333_vm1, %v3419_v58  ;;  %v3398_v55 = vadd.f32 %v4508_v40, %v3397_v59  ;;  %v5042_v62 = vpop.f32.mrb[73].mxu1 }
 0xee9   : > { %v3475_v63 = vld [vmem:[#allocation2 + $0xb] sm:$0xff] }
 0xeea   : > { %v3434_v61 = vld [vmem:[#allocation2 + $0x12] sm:$0xff]  ;;  %3415 = vst.msk [vmem:[#allocation2 + $0x22] sm:$0xff] %vm333_vm1, %v3398_v55  ;;  %3490 = vrot.lane.b32.xlu0 %v3475_v63, %s5315_s20 }
 0xeeb   : > { %v3420_v0 = vld [vmem:[#allocation2 + $0x11] sm:$0xff]  ;;  %3450 = vrot.lane.b32.xlu1 %v3434_v61, %s5314_s18  ;;  %v3402_v60 = vpop.f32.mrb[74].mxu1 }
 0xeec   : > { %3427 = vst.msk [vmem:[#allocation3 + $0x10] sm:$0xff] %vm333_vm1, %v3420_v0  ;;  %v3403_v49 = vadd.f32 %v4508_v40, %v3402_v60  ;;  %v5045_v50 = vpop.f32.mrb[75].mxu1 }
 0xeed   : > { %v3476_v51 = vld [vmem:[#allocation2 + $0x13] sm:$0xff] }
 0xeee   : > { %v3435_v52 = vld [vmem:[#allocation2 + $0x1a] sm:$0xff]  ;;  %3416 = vst.msk [vmem:[#allocation2 + $0x2a] sm:$0xff] %vm333_vm1, %v3403_v49  ;;  %3492 = vrot.lane.b32.xlu0 %v3476_v51, %s5315_s20 }
 0xeef   : > { %v3421_v53 = vld [vmem:[#allocation2 + $0x19] sm:$0xff]  ;;  %3452 = vrot.lane.b32.xlu1 %v3435_v52, %s5314_s18  ;;  %v3407_v54 = vpop.f32.mrb[76].mxu1 }
 0xef0   : > { %3428 = vst.msk [vmem:[#allocation3 + $0x18] sm:$0xff] %vm333_vm1, %v3421_v53  ;;  %v3408_v2 = vadd.f32 %v4508_v40, %v3407_v54  ;;  %v5048_v4 = vpop.f32.mrb[77].mxu1 }
 0xef1   : > { %v3477_v7 = vld [vmem:[#allocation2 + $0x1b] sm:$0xff] }
 0xef2   : > { %v3436_v8 = vld [vmem:[#allocation2 + $0x22] sm:$0xff]  ;;  %3417 = vst.msk [vmem:[#allocation2 + $0x32] sm:$0x3] %vm488_vm4, %v3408_v2  ;;  %3494 = vrot.lane.b32.xlu0 %v3477_v7, %s5315_s20 }
 0xef3   : > { %v3422_v9 = vld [vmem:[#allocation2 + $0x21] sm:$0xff]  ;;  %3454 = vrot.lane.b32.xlu1 %v3436_v8, %s5314_s18 }
 0xef4   : > { %3429 = vst.msk [vmem:[#allocation3 + $0x20] sm:$0xff] %vm333_vm1, %v3422_v9 }
 0xef5   : > { %v3478_v1 = vld [vmem:[#allocation2 + $0x23] sm:$0xff] }
 0xef6   : > { %v3437_v5 = vld [vmem:[#allocation2 + $0x2a] sm:$0xff]  ;;  %3496 = vrot.lane.b32.xlu0 %v3478_v1, %s5315_s20 }
 0xef7   : > { %v3423_v10 = vld [vmem:[#allocation2 + $0x29] sm:$0xff]  ;;  %3456 = vrot.lane.b32.xlu1 %v3437_v5, %s5314_s18 }
 0xef8   : > { %3430 = vst.msk [vmem:[#allocation3 + $0x28] sm:$0xff] %vm333_vm1, %v3423_v10  ;;  %v4524_v10 = vld [vmem:[%s6778_s3 + $0x30] sm:$0xff] }
 0xef9   : > { %v3479_v11 = vld [vmem:[#allocation2 + $0x2b] sm:$0xff]  ;;  %v3480_v15 = vld [vmem:[#allocation2 + $0x33] sm:$0x3] }
 0xefa   : > { %v3438_v12 = vld [vmem:[#allocation2 + $0x32] sm:$0x3]  ;;  %3498 = vrot.lane.b32.xlu0 %v3479_v11, %s5315_s20  ;;  %v4525_v11 = vld [vmem:[%s6778_s3 + $0x38] sm:$0xff] }
 0xefb   : > { %3458 = vrot.lane.b32.xlu1 %v3438_v12, %s5314_s18  ;;  %v3424_v13 = vld [vmem:[#allocation2 + $0x31] sm:$0x3]  ;;  %v4526_v12 = vld [vmem:[%s6778_s3 + $0x40] sm:$0xff] }
 0xefc   : > { %3431 = vst.msk [vmem:[#allocation3 + $0x30] sm:$0x3] %vm488_vm4, %v3424_v13 }
 0xefe   : > { %3500 = vrot.lane.b32.xlu0 %v3480_v15, %s5315_s20  ;;  %v4527_v15 = vld [vmem:[%s6778_s3 + $0x48] sm:$0xff] }
 0xeff   : > { %3751 = vperm.xlu1 %5282, %v3664_v14   ;;  %v5245_v14 = vpack.c.bf16 %v4525_v11, %v4524_v10 }
 0xf01   : > { %5246 = vmatpush3.bf16.msra.mxu1 %v5245_v14 }
 0xf02   : > { %3756 = vperm.xlu0 %5281, %v3665_v16   ;;  %5247 = vmatprep.subr.bf16.mxu1 %v5311_v3 }
 0xf03   : > { %3793 = vperm.xlu1 %5282, %v3671_v24  }
 0xf06   : > { %3798 = vperm.xlu0 %5281, %v3672_v25  }
 0xf07   : > { %3761 = vperm.xlu1 %5282, %v3666_v26  }
 0xf0a   : > { %3803 = vperm.xlu0 %5281, %v3673_v27   ;;  %v5248_v27 = vpack.c.bf16 %v4527_v15, %v4526_v12 }
 0xf0b   : > { %3766 = vperm.xlu1 %5282, %v3667_v28  }
 0xf0c   : > { %5249 = vmatpush3.bf16.msra.mxu1 %v5248_v27 }
 0xf0d   : > { %5250 = vmatprep.subr.bf16.mxu1 %v5311_v3 }
 0xf0e   : > { %3808 = vperm.xlu0 %5281, %v3674_v17  }
 0xf0f   : > { %3771 = vperm.xlu1 %5282, %v3668_v18  }
 0xf12   : > { %3813 = vperm.xlu0 %5281, %v3675_v19  }
 0xf13   : > { %3776 = vperm.xlu1 %5282, %v3669_v20  }
 0xf16   : > { %3818 = vperm.xlu0 %5281, %v3676_v21  }
 0xf17   : > { %3781 = vperm.xlu1 %5282, %v3670_v22  }
 0xf1a   : > { %3823 = vperm.xlu0 %5281, %v3677_v23  }
 0xf54   : > { %v3447_v30 = vpop.permute.xlu1 %3446 }
 0xf55   : > { %3467 = vst.msk [vmem:[#allocation3] sm:$0xff] %vm539_vm5, %v3447_v30 }
 0xf58   : > { %v3489_v38 = vpop.permute.xlu0 %3488 }
 0xf59   : > { %v3449_v40 = vpop.permute.xlu1 %3448  ;;  %3509 = vst.msk [vmem:[#allocation3] sm:$0xff] %vm583_vm6, %v3489_v38 }
 0xf5a   : > { %3468 = vst.msk [vmem:[#allocation3 + $0x8] sm:$0xff] %vm539_vm5, %v3449_v40 }
 0xf5c   : > { %v3491_v41 = vpop.permute.xlu0 %3490 }
 0xf5d   : > { %v3451_v42 = vpop.permute.xlu1 %3450  ;;  %3510 = vst.msk [vmem:[#allocation3 + $0x8] sm:$0xff] %vm583_vm6, %v3491_v41 }
 0xf5e   : > { %3469 = vst.msk [vmem:[#allocation3 + $0x10] sm:$0xff] %vm539_vm5, %v3451_v42 }
 0xf60   : > { %v3493_v29 = vpop.permute.xlu0 %3492  ;;  %v3523_v43 = vld [vmem:[#allocation3] sm:$0xff] }
 0xf61   : > { %v3453_v39 = vpop.permute.xlu1 %3452  ;;  %3511 = vst.msk [vmem:[#allocation3 + $0x10] sm:$0xff] %vm583_vm6, %v3493_v29  ;;  %5062 = vmatmul.mubr.msk.f32.vlgmr.msra.gmra.mrb[62].mxu0 %vm612_vm7, %v3523_v43 }
 0xf62   : > { %3470 = vst.msk [vmem:[#allocation3 + $0x18] sm:$0xff] %vm539_vm5, %v3453_v39  ;;  %5064 = vmatprep.mubr.msk.f32.mxu0 %vm5312_vm0, %v5313_v6 }
 0xf64   : > { %v3495_v44 = vpop.permute.xlu0 %3494  ;;  %v3524_v47 = vld [vmem:[#allocation3 + $0x8] sm:$0xff] }
 0xf65   : > { %v3455_v45 = vpop.permute.xlu1 %3454  ;;  %3512 = vst.msk [vmem:[#allocation3 + $0x18] sm:$0xff] %vm583_vm6, %v3495_v44  ;;  %5065 = vmatmul.mubr.msk.f32.gmra.mrb[64].mxu0 %vm612_vm7, %v3524_v47 }
 0xf66   : > { %3471 = vst.msk [vmem:[#allocation3 + $0x20] sm:$0xff] %vm539_vm5, %v3455_v45  ;;  %5067 = vmatprep.mubr.msk.f32.mxu0 %vm5312_vm0, %v5313_v6 }
 0xf68   : > { %v3497_v48 = vpop.permute.xlu0 %3496  ;;  %v3525_v32 = vld [vmem:[#allocation3 + $0x10] sm:$0xff] }
 0xf69   : > { %v3457_v46 = vpop.permute.xlu1 %3456  ;;  %3513 = vst.msk [vmem:[#allocation3 + $0x20] sm:$0xff] %vm583_vm6, %v3497_v48  ;;  %5068 = vmatmul.mubr.msk.f32.gmra.mrb[66].mxu0 %vm612_vm7, %v3525_v32 }
 0xf6a   : > { %3472 = vst.msk [vmem:[#allocation3 + $0x28] sm:$0xff] %vm539_vm5, %v3457_v46  ;;  %5070 = vmatprep.mubr.msk.f32.mxu0 %vm5312_vm0, %v5313_v6 }
 0xf6c   : > { %v3499_v31 = vpop.permute.xlu0 %3498  ;;  %v3526_v34 = vld [vmem:[#allocation3 + $0x18] sm:$0xff] }
 0xf6d   : > { %v3459_v33 = vpop.permute.xlu1 %3458  ;;  %3514 = vst.msk [vmem:[#allocation3 + $0x28] sm:$0xff] %vm583_vm6, %v3499_v31  ;;  %5071 = vmatmul.mubr.msk.f32.gmra.mrb[68].mxu0 %vm612_vm7, %v3526_v34 }
 0xf6e   : > { %3473 = vst.msk [vmem:[#allocation3 + $0x30] sm:$0x3] %vm546_vm8, %v3459_v33  ;;  %5073 = vmatprep.mubr.msk.f32.mxu0 %vm5312_vm0, %v5313_v6 }
 0xf70   : > { %v3501_v35 = vpop.permute.xlu0 %3500  ;;  %v3527_v36 = vld [vmem:[#allocation3 + $0x20] sm:$0xff] }
 0xf71   : > { %3515 = vst.msk [vmem:[#allocation3 + $0x30] sm:$0x3] %vm590_vm9, %v3501_v35  ;;  %5074 = vmatmul.mubr.msk.f32.gmra.mrb[70].mxu0 %vm612_vm7, %v3527_v36 }
 0xf72   : > { %5076 = vmatprep.mubr.msk.f32.mxu0 %vm5312_vm0, %v5313_v6 }
 0xf74   : > { %v3528_v37 = vld [vmem:[#allocation3 + $0x28] sm:$0xff] }
 0xf75   : > { %5077 = vmatmul.mubr.msk.f32.gmra.mrb[72].mxu0 %vm612_vm7, %v3528_v37 }
 0xf76   : > { %5079 = vmatprep.mubr.msk.f32.mxu0 %vm5312_vm0, %v5313_v6 }
 0xf78   : > { %v3529_v56 = vld [vmem:[#allocation3 + $0x30] sm:$0x3] }
 0xf79   : > { %5080 = vmatmul.mubr.msk.f32.gmra.mrb[74].mxu0 %vm612_vm7, %v3529_v56 }
 0xf7a   : > { %5127 = vmatprep.mubr.msk.f32.mxu0 %vm5312_vm0, %v5313_v6 }
 0xf7e   : > { %v3752_v12 = vpop.permute.xlu1 %3751 }
 0xf81   : > { %v3757_v14 = vpop.permute.xlu0 %3756 }
0x1034   : > { %v3623_v58 = vpop.f32.mrb[62].mxu0 }
0x1035   : > { %v3624_v59 = vadd.f32 %v4516_v57, %v3623_v58  ;;  %v5063_v55 = vpop.f32.mrb[63].mxu0 }
0x1037   : > { %v3657_v63 = vmax.f32 %v3624_v59, 0.0 }
0x1038   : > { %v3628_v62 = vpop.f32.mrb[64].mxu0 }
0x1039   : > { %v3629_v61 = vadd.f32 %v4516_v57, %v3628_v62  ;;  %v5066_v0 = vpop.f32.mrb[65].mxu0  ;;  %v3678_v50 = vsel %vm333_vm1, %v3657_v63, 0.0 }
0x103b   : > { %v3658_v60 = vmax.f32 %v3629_v61, 0.0 }
0x103c   : > { %v3633_v49 = vpop.f32.mrb[66].mxu0 }
0x103d   : > { %v3679_v51 = vsel %vm333_vm1, %v3658_v60, 0.0  ;;  %v3634_v52 = vadd.f32 %v4516_v57, %v3633_v49  ;;  %v5069_v53 = vpop.f32.mrb[67].mxu0 }
0x103e   : > { %v3680_v54 = vadd.f32 %v3679_v51, %v3678_v50 }
0x103f   : > { %v3659_v2 = vmax.f32 %v3634_v52, 0.0 }
0x1040   : > { %v3638_v4 = vpop.f32.mrb[68].mxu0 }
0x1041   : > { %v3681_v7 = vsel %vm333_vm1, %v3659_v2, 0.0  ;;  %v3639_v8 = vadd.f32 %v4516_v57, %v3638_v4  ;;  %v5072_v9 = vpop.f32.mrb[69].mxu0 }
0x1042   : > { %v3682_v1 = vadd.f32 %v3681_v7, %v3680_v54 }
0x1043   : > { %v3660_v5 = vmax.f32 %v3639_v8, 0.0 }
0x1044   : > { %v3643_v13 = vpop.f32.mrb[70].mxu0 }
0x1045   : > { %v3683_v16 = vsel %vm333_vm1, %v3660_v5, 0.0  ;;  %v3644_v24 = vadd.f32 %v4516_v57, %v3643_v13  ;;  %v5075_v25 = vpop.f32.mrb[71].mxu0 }
0x1046   : > { %v3684_v26 = vadd.f32 %v3683_v16, %v3682_v1  ;;  %v3799_v25 = vpop.permute.xlu0 %3798 }
0x1047   : > { %v3661_v28 = vmax.f32 %v3644_v24, 0.0  ;;  %v3794_v24 = vpop.permute.xlu1 %3793 }
0x1048   : > { %v3648_v17 = vpop.f32.mrb[72].mxu0 }
0x1049   : > { %v3685_v18 = vsel %vm333_vm1, %v3661_v28, 0.0  ;;  %v3649_v19 = vadd.f32 %v4516_v57, %v3648_v17  ;;  %v5078_v20 = vpop.f32.mrb[73].mxu0 }
0x104a   : > { %v3686_v21 = vadd.f32 %v3685_v18, %v3684_v26  ;;  %v3804_v27 = vpop.permute.xlu0 %3803 }
0x104b   : > { %v3662_v22 = vmax.f32 %v3649_v19, 0.0  ;;  %v3762_v26 = vpop.permute.xlu1 %3761 }
0x104c   : > { %v3653_v23 = vpop.f32.mrb[74].mxu0 }
0x104d   : > { %v3687_v30 = vsel %vm333_vm1, %v3662_v22, 0.0  ;;  %v3654_v38 = vadd.f32 %v4516_v57, %v3653_v23  ;;  %v5081_v40 = vpop.f32.mrb[75].mxu0 }
0x104e   : > { %v3688_v41 = vadd.f32 %v3687_v30, %v3686_v21  ;;  %v3809_v21 = vpop.permute.xlu0 %3808 }
0x104f   : > { %v3663_v42 = vmax.f32 %v3654_v38, 0.0  ;;  %v3767_v18 = vpop.permute.xlu1 %3766 }
0x1051   : > { %v3689_v29 = vsel %vm488_vm4, %v3663_v42, 0.0 }
0x1052   : > { %v3690_v39 = vadd.f32 %v3689_v29, %v3688_v41  ;;  %v3814_v38 = vpop.permute.xlu0 %3813 }
0x1053   : > { %v3772_v30 = vpop.permute.xlu1 %3771 }
0x1054   : > { %v3691_v43 = vrot.slane %v3690_v39, 4 }
0x1056   : > { %v3692_v44 = vadd.f32 %v3691_v43, %v3690_v39  ;;  %v3819_v41 = vpop.permute.xlu0 %3818 }
0x1057   : > { %v3777_v40 = vpop.permute.xlu1 %3776 }
0x1058   : > { %v3693_v45 = vrot.slane %v3692_v44, 2 }
0x105a   : > { %v3694_v47 = vadd.f32 %v3693_v45, %v3692_v44 }
0x105c   : > { %v3695_v48 = vrot.slane %v3694_v47, 1 }
0x105e   : > { %v3696_v46 = vadd.f32 %v3695_v48, %v3694_v47 }
0x1060   : > { %v3697_v32 = vmul.f32 0.02, %v3696_v46  ;;  %v3782_v46 = vpop.permute.xlu1 %3781 }
0x1062   : > { %v3698_v31 = vsub.f32 %v3657_v63, %v3697_v32  ;;  %v3699_v33 = vsub.f32 %v3658_v60, %v3697_v32  ;;  %v3700_v34 = vsub.f32 %v3659_v2, %v3697_v32  ;;  %v3701_v35 = vsub.f32 %v3660_v5, %v3697_v32 }
0x1063   : > { %v3702_v36 = vsub.f32 %v3661_v28, %v3697_v32  ;;  %v3703_v37 = vsub.f32 %v3662_v22, %v3697_v32  ;;  %v3704_v56 = vsub.f32 %v3663_v42, %v3697_v32 }
0x1064   : > { %v3705_v57 = vmul.f32 %v3698_v31, %v3698_v31  ;;  %v3706_v58 = vmul.f32 %v3699_v33, %v3699_v33  ;;  %v3707_v59 = vmul.f32 %v3700_v34, %v3700_v34  ;;  %v3708_v55 = vmul.f32 %v3701_v35, %v3701_v35 }
0x1065   : > { %v3709_v49 = vmul.f32 %v3702_v36, %v3702_v36  ;;  %v3710_v63 = vmul.f32 %v3703_v37, %v3703_v37  ;;  %v3711_v53 = vmul.f32 %v3704_v56, %v3704_v56 }
0x1066   : > { %v3712_v62 = vsel %vm333_vm1, %v3705_v57, 0.0  ;;  %v3713_v61 = vsel %vm333_vm1, %v3706_v58, 0.0  ;;  %v3715_v50 = vsel %vm333_vm1, %v3707_v59, 0.0  ;;  %v3717_v60 = vsel %vm333_vm1, %v3708_v55, 0.0  ;;  %v4528_v55 = vld [vmem:[%s6778_s3 + $0x50] sm:$0xff] }
0x1067   : > { %v3714_v0 = vadd.f32 %v3713_v61, %v3712_v62  ;;  %v3719_v54 = vsel %vm333_vm1, %v3709_v49, 0.0  ;;  %v3721_v4 = vsel %vm333_vm1, %v3710_v63, 0.0  ;;  %v3723_v8 = vsel %vm488_vm4, %v3711_v53, 0.0  ;;  %v4529_v62 = vld [vmem:[%s6778_s3 + $0x58] sm:$0xff] }
0x1069   : > { %v3716_v51 = vadd.f32 %v3715_v50, %v3714_v0 }
0x106b   : > { %v3718_v52 = vadd.f32 %v3717_v60, %v3716_v51 }
0x106d   : > { %v3720_v2 = vadd.f32 %v3719_v54, %v3718_v52 }
0x106f   : > { %v3722_v7 = vadd.f32 %v3721_v4, %v3720_v2 }
0x1071   : > { %v3724_v9 = vadd.f32 %v3723_v8, %v3722_v7 }
0x1073   : > { %v3725_v1 = vrot.slane %v3724_v9, 4 }
0x1075   : > { %v3726_v5 = vadd.f32 %v3725_v1, %v3724_v9 }
0x1077   : > { %v3727_v10 = vrot.slane %v3726_v5, 2 }
0x1079   : > { %v3728_v11 = vadd.f32 %v3727_v10, %v3726_v5 }
0x107b   : > { %v3729_v13 = vrot.slane %v3728_v11, 1 }
0x107d   : > { %v3730_v15 = vadd.f32 %v3729_v13, %v3728_v11 }
0x107f   : > { %v3731_v16 = vmul.f32 0.020408163, %v3730_v15 }
0x1081   : > { %5299 = vrsqrt.f32 %v3731_v16  ;;  %vm3734_vm10 = vcmp.eq.f32.partialorder %v3731_v16, inf  ;;  %v3737_v19 = vand.u32 2147483648, %v3731_v16  ;;  %vm3736_vm11 = vcmp.eq.f32.partialorder %v3731_v16, 0.0 }
0x108b   : > { %v5300_v28 = vpop.eup %5299 }
0x108c   : > { %v3733_v17 = vmul.f32 %v5300_v28, %v3731_v16 }
0x108e   : > { %v3735_v20 = vsel %vm3734_vm10, %v3731_v16, %v3733_v17 }
0x108f   : > { %v3738_v22 = vsel %vm3736_vm11, %v3737_v19, %v3735_v20 }
0x1090   : > { %v3739_v23 = vadd.f32 1e-06, %v3738_v22 }
0x1092   : > { %5301 = vrcp.f32 %v3739_v23 }
0x109c   : > { %v5302_v42 = vpop.eup %5301 }
0x109d   : > { %v3742_v29 = vmul.f32 %v5302_v42, %v3698_v31  ;;  %v3743_v39 = vmul.f32 %v5302_v42, %v3699_v33  ;;  %v3744_v43 = vmul.f32 %v5302_v42, %v3700_v34  ;;  %v3745_v44 = vmul.f32 %v5302_v42, %v3701_v35 }
0x109e   : > { %v3746_v45 = vmul.f32 %v5302_v42, %v3702_v36  ;;  %v3747_v47 = vmul.f32 %v5302_v42, %v3703_v37  ;;  %v3748_v48 = vmul.f32 %v5302_v42, %v3704_v56  ;;  %v5251_v35 = vpack.c.bf16 %v4529_v62, %v4528_v55  ;;  %v3824_v36 = vpop.permute.xlu0 %3823  ;;  %v4531_v55 = vld [vmem:[%s6779_s4 + $0x1] ss:$0 sm:$0xff] }
0x109f   : > { %v3784_v32 = vmul.f32 %v3752_v12, %v3742_v29  ;;  %v3785_v57 = vmul.f32 %v3757_v14, %v3743_v39  ;;  %v3786_v58 = vmul.f32 %v3762_v26, %v3744_v43  ;;  %v3787_v59 = vmul.f32 %v3767_v18, %v3745_v44  ;;  %v4543_v62 = vld [vmem:[%s6778_s3 + $0x80] sm:$0xff] }
0x10a0   : > { %v3788_v31 = vmul.f32 %v3772_v30, %v3746_v45  ;;  %v3789_v33 = vmul.f32 %v3777_v40, %v3747_v47  ;;  %v3790_v34 = vmul.f32 %v3782_v46, %v3748_v48  ;;  %5252 = vmatpush3.bf16.msra.mxu1 %v5251_v35  ;;  %v4539_v48 = vld [vmem:[%s6778_s3 + $0x60] sm:$0xff]  ;;  %v4540_v46 = vld [vmem:[%s6778_s3 + $0x68] sm:$0xff] }
0x10a1   : > { %v3826_v37 = vadd.f32 %v3794_v24, %v3784_v32  ;;  %v3827_v56 = vadd.f32 %v3799_v25, %v3785_v57  ;;  %v3828_v61 = vadd.f32 %v3804_v27, %v3786_v58  ;;  %v3829_v0 = vadd.f32 %v3809_v21, %v3787_v59  ;;  %v4541_v32 = vld [vmem:[%s6778_s3 + $0x70] sm:$0xff]  ;;  %v4542_v58 = vld [vmem:[%s6778_s3 + $0x78] sm:$0xff] }
0x10a2   : > { %v3830_v49 = vadd.f32 %v3814_v38, %v3788_v31  ;;  %v3831_v50 = vadd.f32 %v3819_v41, %v3789_v33  ;;  %v3832_v51 = vadd.f32 %v3824_v36, %v3790_v34  ;;  %v5254_v57 = vpack.c.bf16 %v4540_v46, %v4539_v48  ;;  %v4544_v31 = vld [vmem:[%s6778_s3 + $0x88] sm:$0xff] }
0x10a3   : > { %3833 = vst.msk [vmem:[#allocation2 + $0x2] sm:$0xff] %vm333_vm1, %v3826_v37  ;;  %3834 = vst.msk [vmem:[#allocation2 + $0xa] sm:$0xff] %vm333_vm1, %v3827_v56  ;;  %v5257_v59 = vpack.c.bf16 %v4542_v58, %v4541_v32  ;;  %v5260_v33 = vpack.c.bf16 %v4544_v31, %v4543_v62 }
0x10a4   : > { %3835 = vst.msk [vmem:[#allocation2 + $0x12] sm:$0xff] %vm333_vm1, %v3828_v61  ;;  %3836 = vst.msk [vmem:[#allocation2 + $0x1a] sm:$0xff] %vm333_vm1, %v3829_v0  ;;  %5255 = vmatpush3.bf16.msra.mxu0 %v5254_v57 }
0x10a5   : > { %3837 = vst.msk [vmem:[#allocation2 + $0x22] sm:$0xff] %vm333_vm1, %v3830_v49  ;;  %3838 = vst.msk [vmem:[#allocation2 + $0x2a] sm:$0xff] %vm333_vm1, %v3831_v50  ;;  %5256 = vmatprep.subr.bf16.mxu0 %v5311_v3 }
0x10a6   : > { %3839 = vst.msk [vmem:[#allocation2 + $0x32] sm:$0x3] %vm488_vm4, %v3832_v51 }
0x10a8   : > { %5258 = vmatpush3.bf16.msra.mxu0 %v5257_v59 }
0x10a9   : > { %5259 = vmatprep.subr.bf16.mxu0 %v5311_v3 }
0x10aa   : > { %v3896_v63 = vld [vmem:[#allocation2 + $0x3] sm:$0xff] }
0x10ab   : > { %v3854_v60 = vld [vmem:[#allocation2 + $0x2] sm:$0xff]  ;;  %3910 = vrot.lane.b32.xlu0 %v3896_v63, %s5315_s20  ;;  %v3897_v52 = vld [vmem:[#allocation2 + $0xb] sm:$0xff]  ;;  %v3843_v7 = vld [vmem:[#allocation2 + $0x19] sm:$0xff] }
0x10ac   : > { %3868 = vrot.lane.b32.xlu1 %v3854_v60, %s5314_s18  ;;  %v3855_v53 = vld [vmem:[#allocation2 + $0xa] sm:$0xff]  ;;  %v3840_v54 = vld [vmem:[#allocation2 + $0x1] sm:$0xff]  ;;  %3850 = vst.msk [vmem:[#allocation3 + $0x18] sm:$0xff] %vm333_vm1, %v3843_v7  ;;  %v3898_v5 = vld [vmem:[#allocation2 + $0x13] sm:$0xff]  ;;  %5261 = vmatpush3.bf16.msra.mxu0 %v5260_v33 }
0x10ad   : > { %3847 = vst.msk [vmem:[#allocation3] sm:$0xff] %vm333_vm1, %v3840_v54  ;;  %v3841_v2 = vld [vmem:[#allocation2 + $0x9] sm:$0xff]  ;;  %v3842_v4 = vld [vmem:[#allocation2 + $0x11] sm:$0xff]  ;;  %v3844_v8 = vld [vmem:[#allocation2 + $0x21] sm:$0xff] }
0x10ae   : > { %3848 = vst.msk [vmem:[#allocation3 + $0x8] sm:$0xff] %vm333_vm1, %v3841_v2  ;;  %3849 = vst.msk [vmem:[#allocation3 + $0x10] sm:$0xff] %vm333_vm1, %v3842_v4  ;;  %v3845_v9 = vld [vmem:[#allocation2 + $0x29] sm:$0xff]  ;;  %v3846_v1 = vld [vmem:[#allocation2 + $0x31] sm:$0x3] }
0x10af   : > { %3912 = vrot.lane.b32.xlu0 %v3897_v52, %s5315_s20  ;;  %3851 = vst.msk [vmem:[#allocation3 + $0x20] sm:$0xff] %vm333_vm1, %v3844_v8  ;;  %3852 = vst.msk [vmem:[#allocation3 + $0x28] sm:$0xff] %vm333_vm1, %v3845_v9  ;;  %v3856_v10 = vld [vmem:[#allocation2 + $0x12] sm:$0xff]  ;;  %v3899_v11 = vld [vmem:[#allocation2 + $0x1b] sm:$0xff] }
0x10b0   : > { %3870 = vrot.lane.b32.xlu1 %v3855_v53, %s5314_s18  ;;  %3853 = vst.msk [vmem:[#allocation3 + $0x30] sm:$0x3] %vm488_vm4, %v3846_v1  ;;  %v3857_v12 = vld [vmem:[#allocation2 + $0x1a] sm:$0xff]  ;;  %v3900_v13 = vld [vmem:[#allocation2 + $0x23] sm:$0xff]  ;;  %v3901_v15 = vld [vmem:[#allocation2 + $0x2b] sm:$0xff] }
0x10b1   : > { %v3858_v14 = vld [vmem:[#allocation2 + $0x22] sm:$0xff]  ;;  %v3859_v16 = vld [vmem:[#allocation2 + $0x2a] sm:$0xff]  ;;  %v3902_v24 = vld [vmem:[#allocation2 + $0x33] sm:$0x3] }
0x10b2   : > { %v3860_v25 = vld [vmem:[#allocation2 + $0x32] sm:$0x3] }
0x10b3   : > { %3914 = vrot.lane.b32.xlu0 %v3898_v5, %s5315_s20 }
0x10b4   : > { %3872 = vrot.lane.b32.xlu1 %v3856_v10, %s5314_s18 }
0x10b7   : > { %3916 = vrot.lane.b32.xlu0 %v3899_v11, %s5315_s20 }
0x10b8   : > { %3874 = vrot.lane.b32.xlu1 %v3857_v12, %s5314_s18 }
0x10bb   : > { %3918 = vrot.lane.b32.xlu0 %v3900_v13, %s5315_s20 }
0x10bc   : > { %3876 = vrot.lane.b32.xlu1 %v3858_v14, %s5314_s18 }
0x10bf   : > { %3920 = vrot.lane.b32.xlu0 %v3901_v15, %s5315_s20 }
0x10c0   : > { %3878 = vrot.lane.b32.xlu1 %v3859_v16, %s5314_s18 }
0x10c3   : > { %3922 = vrot.lane.b32.xlu0 %v3902_v24, %s5315_s20 }
0x10c4   : > { %3880 = vrot.lane.b32.xlu1 %v3860_v25, %s5314_s18 }
0x111d   : > { %v3911_v26 = vpop.permute.xlu0 %3910 }
0x111e   : > { %v3869_v27 = vpop.permute.xlu1 %3868 }
0x111f   : > { %3889 = vst.msk [vmem:[#allocation3] sm:$0xff] %vm539_vm5, %v3869_v27 }
0x1120   : > { %3931 = vst.msk [vmem:[#allocation3] sm:$0xff] %vm583_vm6, %v3911_v26 }
0x1121   : > { %v3913_v28 = vpop.permute.xlu0 %3912 }
0x1122   : > { %v3871_v17 = vpop.permute.xlu1 %3870 }
0x1123   : > { %3890 = vst.msk [vmem:[#allocation3 + $0x8] sm:$0xff] %vm539_vm5, %v3871_v17 }
0x1124   : > { %3932 = vst.msk [vmem:[#allocation3 + $0x8] sm:$0xff] %vm583_vm6, %v3913_v28 }
0x1125   : > { %v3915_v18 = vpop.permute.xlu0 %3914 }
0x1126   : > { %v3873_v19 = vpop.permute.xlu1 %3872 }
0x1127   : > { %3891 = vst.msk [vmem:[#allocation3 + $0x10] sm:$0xff] %vm539_vm5, %v3873_v19  ;;  %v3945_v20 = vld [vmem:[#allocation3] sm:$0xff] }
0x1128   : > { %3933 = vst.msk [vmem:[#allocation3 + $0x10] sm:$0xff] %vm583_vm6, %v3915_v18  ;;  %5095 = vmatmul.mubr.msk.f32.vlgmr.msra.gmra.mrb[78].mxu1 %vm612_vm7, %v3945_v20 }
0x1129   : > { %5097 = vmatprep.mubr.msk.f32.mxu1 %vm5312_vm0, %v5313_v6  ;;  %v3917_v21 = vpop.permute.xlu0 %3916 }
0x112a   : > { %v3875_v22 = vpop.permute.xlu1 %3874 }
0x112b   : > { %3892 = vst.msk [vmem:[#allocation3 + $0x18] sm:$0xff] %vm539_vm5, %v3875_v22  ;;  %v3946_v23 = vld [vmem:[#allocation3 + $0x8] sm:$0xff] }
0x112c   : > { %3934 = vst.msk [vmem:[#allocation3 + $0x18] sm:$0xff] %vm583_vm6, %v3917_v21  ;;  %5098 = vmatmul.mubr.msk.f32.gmra.mrb[80].mxu1 %vm612_vm7, %v3946_v23  ;;  %v4148_v23 = vld [vmem:[#allocation2 + $0x34] sm:$0x3] }
0x112d   : > { %5100 = vmatprep.mubr.msk.f32.mxu1 %vm5312_vm0, %v5313_v6  ;;  %v3919_v30 = vpop.permute.xlu0 %3918 }
0x112e   : > { %v3877_v38 = vpop.permute.xlu1 %3876 }
0x112f   : > { %3893 = vst.msk [vmem:[#allocation3 + $0x20] sm:$0xff] %vm539_vm5, %v3877_v38  ;;  %v3947_v40 = vld [vmem:[#allocation3 + $0x10] sm:$0xff] }
0x1130   : > { %3935 = vst.msk [vmem:[#allocation3 + $0x20] sm:$0xff] %vm583_vm6, %v3919_v30  ;;  %5101 = vmatmul.mubr.msk.f32.gmra.mrb[82].mxu1 %vm612_vm7, %v3947_v40 }
0x1131   : > { %5103 = vmatprep.mubr.msk.f32.mxu1 %vm5312_vm0, %v5313_v6  ;;  %v3921_v41 = vpop.permute.xlu0 %3920 }
0x1132   : > { %v3879_v42 = vpop.permute.xlu1 %3878 }
0x1133   : > { %3894 = vst.msk [vmem:[#allocation3 + $0x28] sm:$0xff] %vm539_vm5, %v3879_v42  ;;  %v3948_v29 = vld [vmem:[#allocation3 + $0x18] sm:$0xff] }
0x1134   : > { %3936 = vst.msk [vmem:[#allocation3 + $0x28] sm:$0xff] %vm583_vm6, %v3921_v41  ;;  %5104 = vmatmul.mubr.msk.f32.gmra.mrb[84].mxu1 %vm612_vm7, %v3948_v29 }
0x1135   : > { %5106 = vmatprep.mubr.msk.f32.mxu1 %vm5312_vm0, %v5313_v6  ;;  %v3923_v39 = vpop.permute.xlu0 %3922 }
0x1136   : > { %v3881_v43 = vpop.permute.xlu1 %3880 }
0x1137   : > { %3895 = vst.msk [vmem:[#allocation3 + $0x30] sm:$0x3] %vm546_vm8, %v3881_v43  ;;  %v3949_v44 = vld [vmem:[#allocation3 + $0x20] sm:$0xff] }
0x1138   : > { %3937 = vst.msk [vmem:[#allocation3 + $0x30] sm:$0x3] %vm590_vm9, %v3923_v39  ;;  %5107 = vmatmul.mubr.msk.f32.gmra.mrb[86].mxu1 %vm612_vm7, %v3949_v44 }
0x1139   : > { %5109 = vmatprep.mubr.msk.f32.mxu1 %vm5312_vm0, %v5313_v6 }
0x113b   : > { %v3950_v45 = vld [vmem:[#allocation3 + $0x28] sm:$0xff] }
0x113c   : > { %5110 = vmatmul.mubr.msk.f32.gmra.mrb[88].mxu1 %vm612_vm7, %v3950_v45 }
0x113d   : > { %5112 = vmatprep.mubr.msk.f32.mxu1 %vm5312_vm0, %v5313_v6 }
0x113f   : > { %v3951_v47 = vld [vmem:[#allocation3 + $0x30] sm:$0x3] }
0x1140   : > { %5113 = vmatmul.mubr.msk.f32.gmra.mrb[90].mxu1 %vm612_vm7, %v3951_v47 }
0x11fb   : > { %v4045_v34 = vpop.f32.mrb[78].mxu1 }
0x11fc   : > { %v4046_v35 = vadd.f32 %v4531_v55, %v4045_v34  ;;  %v5096_v36 = vpop.f32.mrb[79].mxu1  ;;  %v4546_v34 = vld [vmem:[%s6779_s4 + $0x2] ss:$0 sm:$0xff] }
0x11fe   : > { %4079 = vst.msk [vmem:[#allocation2 + $0x2] sm:$0xff] %vm333_vm1, %v4046_v35 }
0x11ff   : > { %v4050_v3 = vpop.f32.mrb[80].mxu1 }
0x1200   : > { %v4051_v37 = vadd.f32 %v4531_v55, %v4050_v3  ;;  %v5099_v56 = vpop.f32.mrb[81].mxu1 }
0x1202   : > { %4080 = vst.msk [vmem:[#allocation2 + $0xa] sm:$0xff] %vm333_vm1, %v4051_v37 }
0x1203   : > { %v4055_v61 = vpop.f32.mrb[82].mxu1 }
0x1204   : > { %v4056_v0 = vadd.f32 %v4531_v55, %v4055_v61  ;;  %v5102_v49 = vpop.f32.mrb[83].mxu1 }
0x1205   : > { %v4100_v50 = vld [vmem:[#allocation2 + $0x2] sm:$0xff] }
0x1206   : > { %v4086_v51 = vld [vmem:[#allocation2] sm:$0xff]  ;;  %4081 = vst.msk [vmem:[#allocation2 + $0x12] sm:$0xff] %vm333_vm1, %v4056_v0  ;;  %4114 = vrot.lane.b32.xlu1 %v4100_v50, %s5314_s18 }
0x1207   : > { %4093 = vst.msk [vmem:[#allocation3] sm:$0xff] %vm333_vm1, %v4086_v51  ;;  %v4060_v63 = vpop.f32.mrb[84].mxu1 }
0x1208   : > { %v4061_v60 = vadd.f32 %v4531_v55, %v4060_v63  ;;  %v5105_v52 = vpop.f32.mrb[85].mxu1 }
0x1209   : > { %v4142_v53 = vld [vmem:[#allocation2 + $0x4] sm:$0xff] }
0x120a   : > { %v4101_v54 = vld [vmem:[#allocation2 + $0xa] sm:$0xff]  ;;  %4082 = vst.msk [vmem:[#allocation2 + $0x1a] sm:$0xff] %vm333_vm1, %v4061_v60  ;;  %4156 = vrot.lane.b32.xlu0 %v4142_v53, %s5315_s20 }
0x120b   : > { %v4087_v2 = vld [vmem:[#allocation2 + $0x8] sm:$0xff]  ;;  %4116 = vrot.lane.b32.xlu1 %v4101_v54, %s5314_s18  ;;  %v4065_v4 = vpop.f32.mrb[86].mxu1 }
0x120c   : > { %4094 = vst.msk [vmem:[#allocation3 + $0x8] sm:$0xff] %vm333_vm1, %v4087_v2  ;;  %v4066_v7 = vadd.f32 %v4531_v55, %v4065_v4  ;;  %v5108_v8 = vpop.f32.mrb[87].mxu1 }
0x120d   : > { %v4143_v9 = vld [vmem:[#allocation2 + $0xc] sm:$0xff] }
0x120e   : > { %v4102_v1 = vld [vmem:[#allocation2 + $0x12] sm:$0xff]  ;;  %4083 = vst.msk [vmem:[#allocation2 + $0x22] sm:$0xff] %vm333_vm1, %v4066_v7  ;;  %4158 = vrot.lane.b32.xlu0 %v4143_v9, %s5315_s20 }
0x120f   : > { %v4088_v5 = vld [vmem:[#allocation2 + $0x10] sm:$0xff]  ;;  %4118 = vrot.lane.b32.xlu1 %v4102_v1, %s5314_s18  ;;  %v4070_v10 = vpop.f32.mrb[88].mxu1 }
0x1210   : > { %4095 = vst.msk [vmem:[#allocation3 + $0x10] sm:$0xff] %vm333_vm1, %v4088_v5  ;;  %v4071_v11 = vadd.f32 %v4531_v55, %v4070_v10  ;;  %v5111_v12 = vpop.f32.mrb[89].mxu1 }
0x1211   : > { %v4144_v13 = vld [vmem:[#allocation2 + $0x14] sm:$0xff] }
0x1212   : > { %v4103_v14 = vld [vmem:[#allocation2 + $0x1a] sm:$0xff]  ;;  %4084 = vst.msk [vmem:[#allocation2 + $0x2a] sm:$0xff] %vm333_vm1, %v4071_v11  ;;  %4160 = vrot.lane.b32.xlu0 %v4144_v13, %s5315_s20 }
0x1213   : > { %v4089_v15 = vld [vmem:[#allocation2 + $0x18] sm:$0xff]  ;;  %4120 = vrot.lane.b32.xlu1 %v4103_v14, %s5314_s18  ;;  %v4075_v16 = vpop.f32.mrb[90].mxu1 }
0x1214   : > { %4096 = vst.msk [vmem:[#allocation3 + $0x18] sm:$0xff] %vm333_vm1, %v4089_v15  ;;  %v4076_v24 = vadd.f32 %v4531_v55, %v4075_v16  ;;  %v5114_v25 = vpop.f32.mrb[91].mxu1 }
0x1215   : > { %v4145_v26 = vld [vmem:[#allocation2 + $0x1c] sm:$0xff] }
0x1216   : > { %v4104_v27 = vld [vmem:[#allocation2 + $0x22] sm:$0xff]  ;;  %4085 = vst.msk [vmem:[#allocation2 + $0x32] sm:$0x3] %vm488_vm4, %v4076_v24  ;;  %4162 = vrot.lane.b32.xlu0 %v4145_v26, %s5315_s20 }
0x1217   : > { %v4090_v28 = vld [vmem:[#allocation2 + $0x20] sm:$0xff]  ;;  %4122 = vrot.lane.b32.xlu1 %v4104_v27, %s5314_s18 }
0x1218   : > { %4097 = vst.msk [vmem:[#allocation3 + $0x20] sm:$0xff] %vm333_vm1, %v4090_v28 }
0x1219   : > { %v4146_v17 = vld [vmem:[#allocation2 + $0x24] sm:$0xff]  ;;  %v4092_v20 = vld [vmem:[#allocation2 + $0x30] sm:$0x3] }
0x121a   : > { %v4105_v18 = vld [vmem:[#allocation2 + $0x2a] sm:$0xff]  ;;  %4164 = vrot.lane.b32.xlu0 %v4146_v17, %s5315_s20  ;;  %4099 = vst.msk [vmem:[#allocation3 + $0x30] sm:$0x3] %vm488_vm4, %v4092_v20 }
0x121b   : > { %v4091_v19 = vld [vmem:[#allocation2 + $0x28] sm:$0xff]  ;;  %4124 = vrot.lane.b32.xlu1 %v4105_v18, %s5314_s18 }
0x121c   : > { %4098 = vst.msk [vmem:[#allocation3 + $0x28] sm:$0xff] %vm333_vm1, %v4091_v19 }
0x121d   : > { %v4147_v21 = vld [vmem:[#allocation2 + $0x2c] sm:$0xff] }
0x121e   : > { %v4106_v22 = vld [vmem:[#allocation2 + $0x32] sm:$0x3]  ;;  %4166 = vrot.lane.b32.xlu0 %v4147_v21, %s5315_s20 }
0x121f   : > { %4126 = vrot.lane.b32.xlu1 %v4106_v22, %s5314_s18 }
0x1222   : > { %4168 = vrot.lane.b32.xlu0 %v4148_v23, %s5315_s20 }
0x1278   : > { %v4115_v30 = vpop.permute.xlu1 %4114 }
0x1279   : > { %4135 = vst.msk [vmem:[#allocation3] sm:$0xff] %vm539_vm5, %v4115_v30 }
0x127c   : > { %v4157_v38 = vpop.permute.xlu0 %4156 }
0x127d   : > { %v4117_v40 = vpop.permute.xlu1 %4116  ;;  %4177 = vst.msk [vmem:[#allocation3] sm:$0xff] %vm583_vm6, %v4157_v38 }
0x127e   : > { %4136 = vst.msk [vmem:[#allocation3 + $0x8] sm:$0xff] %vm539_vm5, %v4117_v40 }
0x1280   : > { %v4159_v41 = vpop.permute.xlu0 %4158 }
0x1281   : > { %v4119_v42 = vpop.permute.xlu1 %4118  ;;  %4178 = vst.msk [vmem:[#allocation3 + $0x8] sm:$0xff] %vm583_vm6, %v4159_v41 }
0x1282   : > { %4137 = vst.msk [vmem:[#allocation3 + $0x10] sm:$0xff] %vm539_vm5, %v4119_v42 }
0x1284   : > { %v4161_v29 = vpop.permute.xlu0 %4160  ;;  %v4191_v43 = vld [vmem:[#allocation3] sm:$0xff] }
0x1285   : > { %v4121_v39 = vpop.permute.xlu1 %4120  ;;  %4179 = vst.msk [vmem:[#allocation3 + $0x10] sm:$0xff] %vm583_vm6, %v4161_v29  ;;  %5128 = vmatmul.mubr.msk.f32.vlgmr.msra.gmra.mrb[76].mxu0 %vm612_vm7, %v4191_v43 }
0x1286   : > { %4138 = vst.msk [vmem:[#allocation3 + $0x18] sm:$0xff] %vm539_vm5, %v4121_v39  ;;  %5130 = vmatprep.mubr.msk.f32.mxu0 %vm5312_vm0, %v5313_v6 }
0x1288   : > { %v4163_v44 = vpop.permute.xlu0 %4162  ;;  %v4192_v47 = vld [vmem:[#allocation3 + $0x8] sm:$0xff] }
0x1289   : > { %v4123_v45 = vpop.permute.xlu1 %4122  ;;  %4180 = vst.msk [vmem:[#allocation3 + $0x18] sm:$0xff] %vm583_vm6, %v4163_v44  ;;  %5131 = vmatmul.mubr.msk.f32.gmra.mrb[78].mxu0 %vm612_vm7, %v4192_v47 }
0x128a   : > { %4139 = vst.msk [vmem:[#allocation3 + $0x20] sm:$0xff] %vm539_vm5, %v4123_v45  ;;  %5133 = vmatprep.mubr.msk.f32.mxu0 %vm5312_vm0, %v5313_v6 }
0x128c   : > { %v4165_v48 = vpop.permute.xlu0 %4164  ;;  %v4193_v32 = vld [vmem:[#allocation3 + $0x10] sm:$0xff] }
0x128d   : > { %v4125_v46 = vpop.permute.xlu1 %4124  ;;  %4181 = vst.msk [vmem:[#allocation3 + $0x20] sm:$0xff] %vm583_vm6, %v4165_v48  ;;  %5134 = vmatmul.mubr.msk.f32.gmra.mrb[80].mxu0 %vm612_vm7, %v4193_v32 }
0x128e   : > { %4140 = vst.msk [vmem:[#allocation3 + $0x28] sm:$0xff] %vm539_vm5, %v4125_v46  ;;  %5136 = vmatprep.mubr.msk.f32.mxu0 %vm5312_vm0, %v5313_v6 }
0x1290   : > { %v4167_v57 = vpop.permute.xlu0 %4166  ;;  %v4194_v59 = vld [vmem:[#allocation3 + $0x18] sm:$0xff] }
0x1291   : > { %v4127_v58 = vpop.permute.xlu1 %4126  ;;  %4182 = vst.msk [vmem:[#allocation3 + $0x28] sm:$0xff] %vm583_vm6, %v4167_v57  ;;  %5137 = vmatmul.mubr.msk.f32.gmra.mrb[82].mxu0 %vm612_vm7, %v4194_v59 }
0x1292   : > { %4141 = vst.msk [vmem:[#allocation3 + $0x30] sm:$0x3] %vm546_vm8, %v4127_v58  ;;  %5139 = vmatprep.mubr.msk.f32.mxu0 %vm5312_vm0, %v5313_v6 }
0x1294   : > { %v4169_v55 = vpop.permute.xlu0 %4168  ;;  %v4195_v62 = vld [vmem:[#allocation3 + $0x20] sm:$0xff] }
0x1295   : > { %4183 = vst.msk [vmem:[#allocation3 + $0x30] sm:$0x3] %vm590_vm9, %v4169_v55  ;;  %5140 = vmatmul.mubr.msk.f32.gmra.mrb[84].mxu0 %vm612_vm7, %v4195_v62 }
0x1296   : > { %5142 = vmatprep.mubr.msk.f32.mxu0 %vm5312_vm0, %v5313_v6 }
0x1298   : > { %v4196_v31 = vld [vmem:[#allocation3 + $0x28] sm:$0xff] }
0x1299   : > { %5143 = vmatmul.mubr.msk.f32.gmra.mrb[86].mxu0 %vm612_vm7, %v4196_v31 }
0x129a   : > { %5145 = vmatprep.mubr.msk.f32.mxu0 %vm5312_vm0, %v5313_v6 }
0x129c   : > { %v4197_v33 = vld [vmem:[#allocation3 + $0x30] sm:$0x3] }
0x129d   : > { %5146 = vmatmul.mubr.msk.f32.gmra.mrb[88].mxu0 %vm612_vm7, %v4197_v33 }
0x1358   : > { %v4291_v35 = vpop.f32.mrb[76].mxu0 }
0x1359   : > { %v4292_v36 = vadd.f32 %v4546_v34, %v4291_v35  ;;  %v5129_v3 = vpop.f32.mrb[77].mxu0 }
0x135b   : > { %4325 = vst.msk [vmem:[%s332_s29] sm:$0xff] %vm333_vm1, %v4292_v36 }
0x135c   : > { %v4296_v37 = vpop.f32.mrb[78].mxu0 }
0x135d   : > { %v4297_v56 = vadd.f32 %v4546_v34, %v4296_v37  ;;  %v5132_v6 = vpop.f32.mrb[79].mxu0 }
0x135f   : > { %4326 = vst.msk [vmem:[%s332_s29 + $0x8] sm:$0xff] %vm333_vm1, %v4297_v56 }
0x1360   : > { %v4301_v61 = vpop.f32.mrb[80].mxu0 }
0x1361   : > { %v4302_v0 = vadd.f32 %v4546_v34, %v4301_v61  ;;  %v5135_v49 = vpop.f32.mrb[81].mxu0 }
0x1363   : > { %4327 = vst.msk [vmem:[%s332_s29 + $0x10] sm:$0xff] %vm333_vm1, %v4302_v0 }
0x1364   : > { %v4306_v50 = vpop.f32.mrb[82].mxu0 }
0x1365   : > { %v4307_v51 = vadd.f32 %v4546_v34, %v4306_v50  ;;  %v5138_v63 = vpop.f32.mrb[83].mxu0 }
0x1367   : > { %4328 = vst.msk [vmem:[%s332_s29 + $0x18] sm:$0xff] %vm333_vm1, %v4307_v51 }
0x1368   : > { %v4311_v60 = vpop.f32.mrb[84].mxu0 }
0x1369   : > { %v4312_v52 = vadd.f32 %v4546_v34, %v4311_v60  ;;  %v5141_v53 = vpop.f32.mrb[85].mxu0 }
0x136b   : > { %4329 = vst.msk [vmem:[%s332_s29 + $0x20] sm:$0xff] %vm333_vm1, %v4312_v52 }
0x136c   : > { %v4316_v54 = vpop.f32.mrb[86].mxu0 }
0x136d   : > { %v4317_v2 = vadd.f32 %v4546_v34, %v4316_v54  ;;  %v5144_v4 = vpop.f32.mrb[87].mxu0 }
0x136f   : > { %4330 = vst.msk [vmem:[%s332_s29 + $0x28] sm:$0xff] %vm333_vm1, %v4317_v2 }
0x1370   : > { %v4321_v7 = vpop.f32.mrb[88].mxu0 }
0x1371   : > { %v4322_v8 = vadd.f32 %v4546_v34, %v4321_v7  ;;  %v5147_v9 = vpop.f32.mrb[89].mxu0 }
0x1373   : > { %4331 = vst.msk [vmem:[%s332_s29 + $0x30] sm:$0x3] %vm488_vm4, %v4322_v8 }
0x1374 PF: > { %s19_s30 = sadd.s32 1, %s5309_s30  }
0x1375   : > { %p16_p4 = scmp.ge.s32.totalorder %s19_s30, 4  }
0x1377   :  { %18 = sbr.rel (!%p16_p4) target bundleno = 1 (0x1), region = 90 }

</bundles_post_ra>
